<compile_context>
chip_gen: v7x
topology: tpu7x:2x2x1
jax: 0.10.0
libtpu: 0.0.40
codegen_flags: <defaults>
</compile_context>

<pallas_src>
import math
from functools import partial

import numpy as np
import jax
import jax.numpy as jnp
from jax.experimental import pallas as pl
from jax.experimental.pallas import tpu as pltpu

_LANE = 128
_ROW_PAD = 8   # flat-row slack so the 9 shifted slices never run off the tile


# ----------------------------- Pallas kernel --------------------------------

def _conv3x3_flat(src_ref, w_ref, m_rows, wp):
    """3x3/pad-1 conv as 9 shifted matmuls on a row-flattened (rows, Cin) tile.

    Rows are laid out as flat = h * wp + w (row stride wp), so the input needed
    for output row `flat` and filter tap (dh, dw) sits at flat + dh*wp + dw.
    Accumulates in f32 on the MXU.
    """
    acc = None
    for dh in range(3):
        for dw in range(3):
            off = dh * wp + dw
            part = jnp.dot(src_ref[pl.ds(off, m_rows), :], w_ref[dh * 3 + dw],
                           preferred_element_type=jnp.float32)
            acc = part if acc is None else acc + part
    return acc


def _edsr_fused_kernel(x_hbm, w1_ref, w2_ref, m_ref, res_ref, out_ref,
                       x_vmem, y1_vmem, dma_sem, *, H, TH, Wp, M1, M2, SLAB):
    n = pl.program_id(0)
    i = pl.program_id(1)

    # DMA the halo'd, row-flattened input slab for this (image, H-tile) into VMEM.
    row0 = (n * (H + 4) + i * TH) * Wp
    copy = pltpu.make_async_copy(x_hbm.at[pl.ds(row0, SLAB)], x_vmem, dma_sem)
    copy.start()
    copy.wait()

    # conv1 (gate mask folded into w1) -> ReLU -> zero the y1 halo rows/cols
    # that fall outside the image (reproduces conv2's zero padding of y1).
    a1 = _conv3x3_flat(x_vmem, w1_ref, M1, Wp)
    y1_vmem[...] = (jnp.maximum(a1, 0.0) * m_ref[0]).astype(y1_vmem.dtype)

    # conv2 (gate mask and res_scale folded into w2) + residual add.
    a2 = _conv3x3_flat(y1_vmem, w2_ref, M2, Wp)
    out_ref[0] = (a2 + res_ref[0]).astype(out_ref.dtype)


def _fused_block_call(xp_flat, w1m, w2m, y1_mask, res_flat, *, N, H, W, TH,
                      Cp, C1p, M1, M2, SLAB):
    Wp = W + 4
    n_h = H // TH
    assert n_h == 1 or M2 % 8 == 0, "tile_h * (W + 4) must be a multiple of 8"

    kernel = partial(_edsr_fused_kernel, H=H, TH=TH, Wp=Wp,
                     M1=M1, M2=M2, SLAB=SLAB)
    return pl.pallas_call(
        kernel,
        out_shape=jax.ShapeDtypeStruct((N, H * Wp, Cp), jnp.float32),
        grid=(N, n_h),
        in_specs=[
            pl.BlockSpec(memory_space=pl.ANY),                    # padded x, flat rows (HBM)
            pl.BlockSpec((9, Cp, C1p), lambda n, i: (0, 0, 0)),   # w1 taps (VMEM resident)
            pl.BlockSpec((9, C1p, Cp), lambda n, i: (0, 0, 0)),   # w2 taps (VMEM resident)
            pl.BlockSpec((1, M1, 1), lambda n, i: (i, 0, 0)),     # y1 halo validity mask
            pl.BlockSpec((1, M2, Cp), lambda n, i: (n, i, 0)),    # residual tile (f32)
        ],
        out_specs=pl.BlockSpec((1, M2, Cp), lambda n, i: (n, i, 0)),
        scratch_shapes=[
            pltpu.VMEM((SLAB, Cp), jnp.bfloat16),                 # halo'd input slab
            pltpu.VMEM((M1, C1p), jnp.bfloat16),                  # y1 tile (+halo)
            pltpu.SemaphoreType.DMA,
        ],
        compiler_params=pltpu.CompilerParams(
            dimension_semantics=("parallel", "parallel")),
    )(xp_flat, w1m, w2m, y1_mask, res_flat)


# ------------------------------ JAX glue -------------------------------------

def _round_up(v, m):
    return (v + m - 1) // m * m


def _pick_tile_h(H, W):
    for th in (32, 16, 8, 4, 2, 1):
        if H % th == 0 and (th * (W + 4)) % 8 == 0:
            return th
    return H


def _gate(logits, candidates, cout, tau):
    """Differentiable channel-count gate (gumbel-softmax w/o noise)."""
    p = jax.nn.softmax(logits / tau)                                  # (K,)
    ch = jnp.arange(cout)
    keep = (ch[None, :] < candidates[:, None]).astype(jnp.float32)    # (K, Cout)
    rmask = (p[:, None] * keep).sum(0)                                # (Cout,)
    return p, rmask


def _y1_halo_mask(H, W, TH, n_h, M1, Wp):
    """(n_h, M1, 1) f32: 1 where a y1 (conv1-output) row/col lies inside the
    image, 0 where conv2 must see zero padding instead (static, numpy)."""
    flat = np.arange(M1)
    a = flat // Wp                       # y1 tile row (0 .. TH+1, plus slack)
    b = flat % Wp                        # y1 tile col (0 maps to image col -1)
    col_ok = (b >= 1) & (b <= W)
    grow = np.arange(n_h)[:, None] * TH - 1 + a[None, :]
    row_ok = (grow >= 0) & (grow < H)
    mask = (row_ok & col_ok[None, :]).astype(np.float32)
    return jnp.asarray(mask[:, :, None])


def edsr_block_gated(x, params, tau=1.0, noise=False, reuse_prob=None,
                     res_scale=1.0, tile_h=None):
    """Forward pass mirroring EDSRBlockGated.forward.

    Returns (res, rmask_2, prob, prob_list, flops_list) like the PyTorch module.
    """
    del noise  # TODO(synk): gumbel-noise path of dnas.Conv2d not implemented (noise=False only).
    N, C, H, W = x.shape
    w1, w2 = params["w1"], params["w2"]
    C1 = w1.shape[0]

    # gating probabilities / masks / expected flops (tiny scalar math -> plain JAX)
    p1, rmask1 = _gate(params["g1"], params["cand1"], C1, tau)
    p2, rmask2 = _gate(params["g2"], params["cand2"], C, tau)
    exp_c1 = jnp.sum(p1 * params["cand1"].astype(jnp.float32))
    exp_c2 = jnp.sum(p2 * params["cand2"].astype(jnp.float32))
    conv1_flops = H * W * 9.0 * C * exp_c1
    conv2_flops = H * W * 9.0 * exp_c1 * exp_c2

    # ---- layout prep: NHWC, lane-dense channel padding, 2-pixel spatial halo ----
    Cp = _round_up(C, _LANE)
    C1p = _round_up(C1, _LANE)
    Wp = W + 4
    TH = tile_h if tile_h is not None else _pick_tile_h(H, W)
    assert H % TH == 0
    n_h = H // TH
    M2 = TH * Wp                          # conv2 (output) rows per tile, flat
    M1 = (TH + 2) * Wp + _ROW_PAD         # conv1 (y1 + halo) rows per tile, flat
    SLAB = (TH + 4) * Wp + 2 * _ROW_PAD   # x rows DMA'd per tile, flat

    x_nhwc = jnp.transpose(x, (0, 2, 3, 1))                                   # (N,H,W,C) f32
    xp = jnp.pad(x_nhwc, ((0, 0), (2, 2), (2, 2), (0, Cp - C)))
    xp_flat = xp.astype(jnp.bfloat16).reshape(N * (H + 4) * Wp, Cp)
    xp_flat = jnp.pad(xp_flat, ((0, SLAB - (TH + 4) * Wp), (0, 0)))           # tail slack rows

    res_flat = jnp.pad(x_nhwc, ((0, 0), (0, 0), (0, 4), (0, Cp - C)))
    res_flat = res_flat.reshape(N, H * Wp, Cp)                                # f32 residual stream

    # Fold gate masks (and res_scale) into the weight matrices: exact since a
    # per-output-channel scale commutes with conv and (for rmask >= 0) with ReLU.
    w1m = jnp.transpose(w1, (2, 3, 1, 0)).reshape(9, C, C1) * rmask1[None, None, :]
    w1m = jnp.pad(w1m, ((0, 0), (0, Cp - C), (0, C1p - C1))).astype(jnp.bfloat16)
    w2m = jnp.transpose(w2, (2, 3, 1, 0)).reshape(9, C1, C) * (rmask2 * res_scale)[None, None, :]
    w2m = jnp.pad(w2m, ((0, 0), (0, C1p - C1), (0, Cp - C))).astype(jnp.bfloat16)

    y1_mask = _y1_halo_mask(H, W, TH, n_h, M1, Wp)                            # (n_h, M1, 1)

    out_flat = _fused_block_call(xp_flat, w1m, w2m, y1_mask, res_flat,
                                 N=N, H=H, W=W, TH=TH, Cp=Cp, C1p=C1p,
                                 M1=M1, M2=M2, SLAB=SLAB)
    res = out_flat.reshape(N, H, Wp, Cp)[:, :, :W, :C]
    res = jnp.transpose(res, (0, 3, 1, 2))                                    # back to NCHW

    prob = reuse_prob
    prob_list = [p1, prob]
    flops_list = [conv1_flops, conv2_flops]
    return res, rmask2, prob, prob_list, flops_list


def _reference_forward(x, params, tau=1.0, res_scale=1.0):
    """Pure-JAX (lax.conv, f32) reference of the same module math."""
    N, C, H, W = x.shape
    C1 = params["w1"].shape[0]
    _, rmask1 = _gate(params["g1"], params["cand1"], C1, tau)
    _, rmask2 = _gate(params["g2"], params["cand2"], C, tau)
    dn = ("NCHW", "OIHW", "NCHW")
    y = jax.lax.conv_general_dilated(x, params["w1"], (1, 1), "SAME",
                                     dimension_numbers=dn)
    y = jnp.maximum(y * rmask1[None, :, None, None], 0.0)
    z = jax.lax.conv_general_dilated(y, params["w2"], (1, 1), "SAME",
                                     dimension_numbers=dn)
    z = z * rmask2[None, :, None, None]
    return z * res_scale + x


def init_params(key, in_plane, out_planes):
    """Deterministic parameter init matching the module's shapes."""
    assert len(out_planes) == 2 and out_planes[-1] == in_plane
    c_mid = out_planes[0]
    k1, k2, k3, k4 = jax.random.split(key, 4)
    fan1 = in_plane * 9
    fan2 = c_mid * 9
    w1 = jax.random.normal(k1, (c_mid, in_plane, 3, 3), jnp.float32) * math.sqrt(2.0 / fan1)
    w2 = jax.random.normal(k2, (in_plane, c_mid, 3, 3), jnp.float32) * math.sqrt(2.0 / fan2)
    cand1 = jnp.array([max(1, c_mid // 4), max(1, c_mid // 2),
                       max(1, 3 * c_mid // 4), c_mid], jnp.int32)
    cand2 = jnp.array([max(1, in_plane // 4), max(1, in_plane // 2),
                       max(1, 3 * in_plane // 4), in_plane], jnp.int32)
    g1 = 0.1 * jax.random.normal(k3, (4,), jnp.float32)
    g2 = 0.1 * jax.random.normal(k4, (4,), jnp.float32)
    return {"w1": w1, "w2": w2, "g1": g1, "g2": g2, "cand1": cand1, "cand2": cand2}


if __name__ == "__main__":
    key = jax.random.PRNGKey(0)
    kp, kx = jax.random.split(key)

    in_plane = 4
    out_planes = [8, 4]            # out_planes[-1] == in_plane
    N, H, W = 2, 16, 16

    params = init_params(kp, in_plane, out_planes)
    x = jax.random.normal(kx, (N, in_plane, H, W), jnp.float32)

    fwd = jax.jit(partial(edsr_block_gated, tau=1.0, noise=False,
                          reuse_prob=None, res_scale=1.0, tile_h=8))
    res, rmask2, prob, prob_list, flops_list = fwd(x, params)
    jax.block_until_ready(res)

    assert res.shape == (N, in_plane, H, W)
    assert rmask2.shape == (in_plane,)

    # Correctness vs a plain-JAX reference (tolerance covers bf16 conv inputs).
    ref = _reference_forward(x, params, tau=1.0, res_scale=1.0)
    err = float(jnp.max(jnp.abs(res - ref)))
    assert err < 0.12, f"max abs error {err}"

    print("KERNEL_OK")
</pallas_src>

<mosaic_0001>
module attributes {stable_mosaic.version = 11 : i64} {
  func.func @_edsr_fused_kernel(%arg0: i32, %arg1: i32, %arg2: memref<816x128xbf16, #tpu.memory_space<any>>, %arg3: memref<9x128x128xbf16, #tpu.memory_space<vmem>>, %arg4: memref<9x128x128xbf16, #tpu.memory_space<vmem>>, %arg5: memref<1x208x1xf32, #tpu.memory_space<vmem>>, %arg6: memref<1x160x128xf32, #tpu.memory_space<vmem>>, %arg7: memref<1x160x128xf32, #tpu.memory_space<vmem>>, %arg8: memref<256x128xbf16, #tpu.memory_space<vmem>>, %arg9: memref<208x128xbf16, #tpu.memory_space<vmem>>, %arg10: memref<!tpu.dma_semaphore, #tpu.memory_space<semaphore_mem>>) attributes {dimension_semantics = [#tpu.dimension_semantics<parallel>, #tpu.dimension_semantics<parallel>], iteration_bounds = array<i64: 2, 2>, scalar_prefetch = 0 : i64, scratch_operands = 3 : i64, tpu.core_type = #tpu.core_type<tc>, window_params = [{}, {pipeline_mode = #tpu.pipeline_mode<synchronous>, transform_indices = @transform_1, window_bounds = array<i64: 9, 128, 128>}, {pipeline_mode = #tpu.pipeline_mode<synchronous>, transform_indices = @transform_2, window_bounds = array<i64: 9, 128, 128>}, {transform_indices = @transform_3, window_bounds = array<i64: 1, 208, 1>}, {transform_indices = @transform_4, window_bounds = array<i64: 1, 160, 128>}, {transform_indices = @transform_5, window_bounds = array<i64: 1, 160, 128>}]} {
    %c20_i32 = arith.constant 20 : i32
    %0 = arith.muli %arg0, %c20_i32 : i32
    %c8_i32 = arith.constant 8 : i32
    %1 = arith.muli %arg1, %c8_i32 : i32
    %2 = arith.addi %0, %1 : i32
    %c20_i32_0 = arith.constant 20 : i32
    %3 = arith.muli %2, %c20_i32_0 : i32
    %c0_i32 = arith.constant 0 : i32
    %4 = tpu.memref_slice %arg2[%3, %c0_i32] : memref<816x128xbf16, #tpu.memory_space<any>> -> memref<256x128xbf16, #tpu.memory_space<any>>
    tpu.enqueue_dma source(%4 : memref<256x128xbf16, #tpu.memory_space<any>>) target(%arg8 : memref<256x128xbf16, #tpu.memory_space<vmem>>) target_semaphore(%arg10 : memref<!tpu.dma_semaphore, #tpu.memory_space<semaphore_mem>>)
    %c0_i32_1 = arith.constant 0 : i32
    %5 = tpu.memref_slice %arg2[%3, %c0_i32_1] : memref<816x128xbf16, #tpu.memory_space<any>> -> memref<256x128xbf16, #tpu.memory_space<any>>
    tpu.wait_dma2 semaphore(%arg10 : memref<!tpu.dma_semaphore, #tpu.memory_space<semaphore_mem>>) src(%5 : memref<256x128xbf16, #tpu.memory_space<any>>) dst(%arg8 : memref<256x128xbf16, #tpu.memory_space<vmem>>)
    %c0 = arith.constant 0 : index
    %c0_2 = arith.constant 0 : index
    %6 = vector.load %arg8[%c0, %c0_2] : memref<256x128xbf16, #tpu.memory_space<vmem>>, vector<208x128xbf16>
    %c0_3 = arith.constant 0 : index
    %c0_4 = arith.constant 0 : index
    %c0_5 = arith.constant 0 : index
    %7 = vector.load %arg3[%c0_3, %c0_4, %c0_5] : memref<9x128x128xbf16, #tpu.memory_space<vmem>>, vector<1x128x128xbf16>
    %8 = vector.shape_cast %7 : vector<1x128x128xbf16> to vector<128x128xbf16>
    %cst = arith.constant dense<0.000000e+00> : vector<208x128xf32>
    %9 = tpu.matmul %6, %8, %cst {dimension_numbers = #tpu.dot_dimension_numbers<[1], [0], [0], [1], [0, 0, 1, 1], [], []>} : vector<208x128xbf16>, vector<128x128xbf16>, vector<208x128xf32> -> vector<208x128xf32>
    %c1 = arith.constant 1 : index
    %c0_6 = arith.constant 0 : index
    %10 = vector.load %arg8[%c1, %c0_6] : memref<256x128xbf16, #tpu.memory_space<vmem>>, vector<208x128xbf16>
    %c1_7 = arith.constant 1 : index
    %c0_8 = arith.constant 0 : index
    %c0_9 = arith.constant 0 : index
    %11 = vector.load %arg3[%c1_7, %c0_8, %c0_9] : memref<9x128x128xbf16, #tpu.memory_space<vmem>>, vector<1x128x128xbf16>
    %12 = vector.shape_cast %11 : vector<1x128x128xbf16> to vector<128x128xbf16>
    %cst_10 = arith.constant dense<0.000000e+00> : vector<208x128xf32>
    %13 = tpu.matmul %10, %12, %cst_10 {dimension_numbers = #tpu.dot_dimension_numbers<[1], [0], [0], [1], [0, 0, 1, 1], [], []>} : vector<208x128xbf16>, vector<128x128xbf16>, vector<208x128xf32> -> vector<208x128xf32>
    %14 = arith.addf %9, %13 : vector<208x128xf32>
    %c2 = arith.constant 2 : index
    %c0_11 = arith.constant 0 : index
    %15 = vector.load %arg8[%c2, %c0_11] : memref<256x128xbf16, #tpu.memory_space<vmem>>, vector<208x128xbf16>
    %c2_12 = arith.constant 2 : index
    %c0_13 = arith.constant 0 : index
    %c0_14 = arith.constant 0 : index
    %16 = vector.load %arg3[%c2_12, %c0_13, %c0_14] : memref<9x128x128xbf16, #tpu.memory_space<vmem>>, vector<1x128x128xbf16>
    %17 = vector.shape_cast %16 : vector<1x128x128xbf16> to vector<128x128xbf16>
    %cst_15 = arith.constant dense<0.000000e+00> : vector<208x128xf32>
    %18 = tpu.matmul %15, %17, %cst_15 {dimension_numbers = #tpu.dot_dimension_numbers<[1], [0], [0], [1], [0, 0, 1, 1], [], []>} : vector<208x128xbf16>, vector<128x128xbf16>, vector<208x128xf32> -> vector<208x128xf32>
    %19 = arith.addf %14, %18 : vector<208x128xf32>
    %c20 = arith.constant 20 : index
    %c0_16 = arith.constant 0 : index
    %20 = vector.load %arg8[%c20, %c0_16] : memref<256x128xbf16, #tpu.memory_space<vmem>>, vector<208x128xbf16>
    %c3 = arith.constant 3 : index
    %c0_17 = arith.constant 0 : index
    %c0_18 = arith.constant 0 : index
    %21 = vector.load %arg3[%c3, %c0_17, %c0_18] : memref<9x128x128xbf16, #tpu.memory_space<vmem>>, vector<1x128x128xbf16>
    %22 = vector.shape_cast %21 : vector<1x128x128xbf16> to vector<128x128xbf16>
    %cst_19 = arith.constant dense<0.000000e+00> : vector<208x128xf32>
    %23 = tpu.matmul %20, %22, %cst_19 {dimension_numbers = #tpu.dot_dimension_numbers<[1], [0], [0], [1], [0, 0, 1, 1], [], []>} : vector<208x128xbf16>, vector<128x128xbf16>, vector<208x128xf32> -> vector<208x128xf32>
    %24 = arith.addf %19, %23 : vector<208x128xf32>
    %c21 = arith.constant 21 : index
    %c0_20 = arith.constant 0 : index
    %25 = vector.load %arg8[%c21, %c0_20] : memref<256x128xbf16, #tpu.memory_space<vmem>>, vector<208x128xbf16>
    %c4 = arith.constant 4 : index
    %c0_21 = arith.constant 0 : index
    %c0_22 = arith.constant 0 : index
    %26 = vector.load %arg3[%c4, %c0_21, %c0_22] : memref<9x128x128xbf16, #tpu.memory_space<vmem>>, vector<1x128x128xbf16>
    %27 = vector.shape_cast %26 : vector<1x128x128xbf16> to vector<128x128xbf16>
    %cst_23 = arith.constant dense<0.000000e+00> : vector<208x128xf32>
    %28 = tpu.matmul %25, %27, %cst_23 {dimension_numbers = #tpu.dot_dimension_numbers<[1], [0], [0], [1], [0, 0, 1, 1], [], []>} : vector<208x128xbf16>, vector<128x128xbf16>, vector<208x128xf32> -> vector<208x128xf32>
    %29 = arith.addf %24, %28 : vector<208x128xf32>
    %c22 = arith.constant 22 : index
    %c0_24 = arith.constant 0 : index
    %30 = vector.load %arg8[%c22, %c0_24] : memref<256x128xbf16, #tpu.memory_space<vmem>>, vector<208x128xbf16>
    %c5 = arith.constant 5 : index
    %c0_25 = arith.constant 0 : index
    %c0_26 = arith.constant 0 : index
    %31 = vector.load %arg3[%c5, %c0_25, %c0_26] : memref<9x128x128xbf16, #tpu.memory_space<vmem>>, vector<1x128x128xbf16>
    %32 = vector.shape_cast %31 : vector<1x128x128xbf16> to vector<128x128xbf16>
    %cst_27 = arith.constant dense<0.000000e+00> : vector<208x128xf32>
    %33 = tpu.matmul %30, %32, %cst_27 {dimension_numbers = #tpu.dot_dimension_numbers<[1], [0], [0], [1], [0, 0, 1, 1], [], []>} : vector<208x128xbf16>, vector<128x128xbf16>, vector<208x128xf32> -> vector<208x128xf32>
    %34 = arith.addf %29, %33 : vector<208x128xf32>
    %c40 = arith.constant 40 : index
    %c0_28 = arith.constant 0 : index
    %35 = vector.load %arg8[%c40, %c0_28] : memref<256x128xbf16, #tpu.memory_space<vmem>>, vector<208x128xbf16>
    %c6 = arith.constant 6 : index
    %c0_29 = arith.constant 0 : index
    %c0_30 = arith.constant 0 : index
    %36 = vector.load %arg3[%c6, %c0_29, %c0_30] : memref<9x128x128xbf16, #tpu.memory_space<vmem>>, vector<1x128x128xbf16>
    %37 = vector.shape_cast %36 : vector<1x128x128xbf16> to vector<128x128xbf16>
    %cst_31 = arith.constant dense<0.000000e+00> : vector<208x128xf32>
    %38 = tpu.matmul %35, %37, %cst_31 {dimension_numbers = #tpu.dot_dimension_numbers<[1], [0], [0], [1], [0, 0, 1, 1], [], []>} : vector<208x128xbf16>, vector<128x128xbf16>, vector<208x128xf32> -> vector<208x128xf32>
    %39 = arith.addf %34, %38 : vector<208x128xf32>
    %c41 = arith.constant 41 : index
    %c0_32 = arith.constant 0 : index
    %40 = vector.load %arg8[%c41, %c0_32] : memref<256x128xbf16, #tpu.memory_space<vmem>>, vector<208x128xbf16>
    %c7 = arith.constant 7 : index
    %c0_33 = arith.constant 0 : index
    %c0_34 = arith.constant 0 : index
    %41 = vector.load %arg3[%c7, %c0_33, %c0_34] : memref<9x128x128xbf16, #tpu.memory_space<vmem>>, vector<1x128x128xbf16>
    %42 = vector.shape_cast %41 : vector<1x128x128xbf16> to vector<128x128xbf16>
    %cst_35 = arith.constant dense<0.000000e+00> : vector<208x128xf32>
    %43 = tpu.matmul %40, %42, %cst_35 {dimension_numbers = #tpu.dot_dimension_numbers<[1], [0], [0], [1], [0, 0, 1, 1], [], []>} : vector<208x128xbf16>, vector<128x128xbf16>, vector<208x128xf32> -> vector<208x128xf32>
    %44 = arith.addf %39, %43 : vector<208x128xf32>
    %c42 = arith.constant 42 : index
    %c0_36 = arith.constant 0 : index
    %45 = vector.load %arg8[%c42, %c0_36] : memref<256x128xbf16, #tpu.memory_space<vmem>>, vector<208x128xbf16>
    %c8 = arith.constant 8 : index
    %c0_37 = arith.constant 0 : index
    %c0_38 = arith.constant 0 : index
    %46 = vector.load %arg3[%c8, %c0_37, %c0_38] : memref<9x128x128xbf16, #tpu.memory_space<vmem>>, vector<1x128x128xbf16>
    %47 = vector.shape_cast %46 : vector<1x128x128xbf16> to vector<128x128xbf16>
    %cst_39 = arith.constant dense<0.000000e+00> : vector<208x128xf32>
    %48 = tpu.matmul %45, %47, %cst_39 {dimension_numbers = #tpu.dot_dimension_numbers<[1], [0], [0], [1], [0, 0, 1, 1], [], []>} : vector<208x128xbf16>, vector<128x128xbf16>, vector<208x128xf32> -> vector<208x128xf32>
    %49 = arith.addf %44, %48 : vector<208x128xf32>
    %cst_40 = arith.constant 0.000000e+00 : f32
    %50 = vector.broadcast %cst_40 : f32 to vector<208x128xf32>
    %51 = arith.maximumf %49, %50 : vector<208x128xf32>
    %c0_41 = arith.constant 0 : index
    %c0_42 = arith.constant 0 : index
    %c0_43 = arith.constant 0 : index
    %52 = vector.load %arg5[%c0_41, %c0_42, %c0_43] : memref<1x208x1xf32, #tpu.memory_space<vmem>>, vector<1x208x1xf32>
    %53 = vector.shape_cast %52 : vector<1x208x1xf32> to vector<208x1xf32>
    %54 = vector.broadcast %53 : vector<208x1xf32> to vector<208x128xf32>
    %55 = arith.mulf %51, %54 : vector<208x128xf32>
    %56 = arith.truncf %55 : vector<208x128xf32> to vector<208x128xbf16>
    %c0_44 = arith.constant 0 : index
    %c0_45 = arith.constant 0 : index
    %57 = vector.load %arg9[%c0_44, %c0_45] : memref<208x128xbf16, #tpu.memory_space<vmem>>, vector<208x128xbf16>
    tpu.vector_store %arg9[%c0_44, %c0_45], %56 {strides = array<i32>} : memref<208x128xbf16, #tpu.memory_space<vmem>>, vector<208x128xbf16>,
    %c0_46 = arith.constant 0 : index
    %c0_47 = arith.constant 0 : index
    %58 = vector.load %arg9[%c0_46, %c0_47] : memref<208x128xbf16, #tpu.memory_space<vmem>>, vector<160x128xbf16>
    %c0_48 = arith.constant 0 : index
    %c0_49 = arith.constant 0 : index
    %c0_50 = arith.constant 0 : index
    %59 = vector.load %arg4[%c0_48, %c0_49, %c0_50] : memref<9x128x128xbf16, #tpu.memory_space<vmem>>, vector<1x128x128xbf16>
    %60 = vector.shape_cast %59 : vector<1x128x128xbf16> to vector<128x128xbf16>
    %cst_51 = arith.constant dense<0.000000e+00> : vector<160x128xf32>
    %61 = tpu.matmul %58, %60, %cst_51 {dimension_numbers = #tpu.dot_dimension_numbers<[1], [0], [0], [1], [0, 0, 1, 1], [], []>} : vector<160x128xbf16>, vector<128x128xbf16>, vector<160x128xf32> -> vector<160x128xf32>
    %c1_52 = arith.constant 1 : index
    %c0_53 = arith.constant 0 : index
    %62 = vector.load %arg9[%c1_52, %c0_53] : memref<208x128xbf16, #tpu.memory_space<vmem>>, vector<160x128xbf16>
    %c1_54 = arith.constant 1 : index
    %c0_55 = arith.constant 0 : index
    %c0_56 = arith.constant 0 : index
    %63 = vector.load %arg4[%c1_54, %c0_55, %c0_56] : memref<9x128x128xbf16, #tpu.memory_space<vmem>>, vector<1x128x128xbf16>
    %64 = vector.shape_cast %63 : vector<1x128x128xbf16> to vector<128x128xbf16>
    %cst_57 = arith.constant dense<0.000000e+00> : vector<160x128xf32>
    %65 = tpu.matmul %62, %64, %cst_57 {dimension_numbers = #tpu.dot_dimension_numbers<[1], [0], [0], [1], [0, 0, 1, 1], [], []>} : vector<160x128xbf16>, vector<128x128xbf16>, vector<160x128xf32> -> vector<160x128xf32>
    %66 = arith.addf %61, %65 : vector<160x128xf32>
    %c2_58 = arith.constant 2 : index
    %c0_59 = arith.constant 0 : index
    %67 = vector.load %arg9[%c2_58, %c0_59] : memref<208x128xbf16, #tpu.memory_space<vmem>>, vector<160x128xbf16>
    %c2_60 = arith.constant 2 : index
    %c0_61 = arith.constant 0 : index
    %c0_62 = arith.constant 0 : index
    %68 = vector.load %arg4[%c2_60, %c0_61, %c0_62] : memref<9x128x128xbf16, #tpu.memory_space<vmem>>, vector<1x128x128xbf16>
    %69 = vector.shape_cast %68 : vector<1x128x128xbf16> to vector<128x128xbf16>
    %cst_63 = arith.constant dense<0.000000e+00> : vector<160x128xf32>
    %70 = tpu.matmul %67, %69, %cst_63 {dimension_numbers = #tpu.dot_dimension_numbers<[1], [0], [0], [1], [0, 0, 1, 1], [], []>} : vector<160x128xbf16>, vector<128x128xbf16>, vector<160x128xf32> -> vector<160x128xf32>
    %71 = arith.addf %66, %70 : vector<160x128xf32>
    %c20_64 = arith.constant 20 : index
    %c0_65 = arith.constant 0 : index
    %72 = vector.load %arg9[%c20_64, %c0_65] : memref<208x128xbf16, #tpu.memory_space<vmem>>, vector<160x128xbf16>
    %c3_66 = arith.constant 3 : index
    %c0_67 = arith.constant 0 : index
    %c0_68 = arith.constant 0 : index
    %73 = vector.load %arg4[%c3_66, %c0_67, %c0_68] : memref<9x128x128xbf16, #tpu.memory_space<vmem>>, vector<1x128x128xbf16>
    %74 = vector.shape_cast %73 : vector<1x128x128xbf16> to vector<128x128xbf16>
    %cst_69 = arith.constant dense<0.000000e+00> : vector<160x128xf32>
    %75 = tpu.matmul %72, %74, %cst_69 {dimension_numbers = #tpu.dot_dimension_numbers<[1], [0], [0], [1], [0, 0, 1, 1], [], []>} : vector<160x128xbf16>, vector<128x128xbf16>, vector<160x128xf32> -> vector<160x128xf32>
    %76 = arith.addf %71, %75 : vector<160x128xf32>
    %c21_70 = arith.constant 21 : index
    %c0_71 = arith.constant 0 : index
    %77 = vector.load %arg9[%c21_70, %c0_71] : memref<208x128xbf16, #tpu.memory_space<vmem>>, vector<160x128xbf16>
    %c4_72 = arith.constant 4 : index
    %c0_73 = arith.constant 0 : index
    %c0_74 = arith.constant 0 : index
    %78 = vector.load %arg4[%c4_72, %c0_73, %c0_74] : memref<9x128x128xbf16, #tpu.memory_space<vmem>>, vector<1x128x128xbf16>
    %79 = vector.shape_cast %78 : vector<1x128x128xbf16> to vector<128x128xbf16>
    %cst_75 = arith.constant dense<0.000000e+00> : vector<160x128xf32>
    %80 = tpu.matmul %77, %79, %cst_75 {dimension_numbers = #tpu.dot_dimension_numbers<[1], [0], [0], [1], [0, 0, 1, 1], [], []>} : vector<160x128xbf16>, vector<128x128xbf16>, vector<160x128xf32> -> vector<160x128xf32>
    %81 = arith.addf %76, %80 : vector<160x128xf32>
    %c22_76 = arith.constant 22 : index
    %c0_77 = arith.constant 0 : index
    %82 = vector.load %arg9[%c22_76, %c0_77] : memref<208x128xbf16, #tpu.memory_space<vmem>>, vector<160x128xbf16>
    %c5_78 = arith.constant 5 : index
    %c0_79 = arith.constant 0 : index
    %c0_80 = arith.constant 0 : index
    %83 = vector.load %arg4[%c5_78, %c0_79, %c0_80] : memref<9x128x128xbf16, #tpu.memory_space<vmem>>, vector<1x128x128xbf16>
    %84 = vector.shape_cast %83 : vector<1x128x128xbf16> to vector<128x128xbf16>
    %cst_81 = arith.constant dense<0.000000e+00> : vector<160x128xf32>
    %85 = tpu.matmul %82, %84, %cst_81 {dimension_numbers = #tpu.dot_dimension_numbers<[1], [0], [0], [1], [0, 0, 1, 1], [], []>} : vector<160x128xbf16>, vector<128x128xbf16>, vector<160x128xf32> -> vector<160x128xf32>
    %86 = arith.addf %81, %85 : vector<160x128xf32>
    %c40_82 = arith.constant 40 : index
    %c0_83 = arith.constant 0 : index
    %87 = vector.load %arg9[%c40_82, %c0_83] : memref<208x128xbf16, #tpu.memory_space<vmem>>, vector<160x128xbf16>
    %c6_84 = arith.constant 6 : index
    %c0_85 = arith.constant 0 : index
    %c0_86 = arith.constant 0 : index
    %88 = vector.load %arg4[%c6_84, %c0_85, %c0_86] : memref<9x128x128xbf16, #tpu.memory_space<vmem>>, vector<1x128x128xbf16>
    %89 = vector.shape_cast %88 : vector<1x128x128xbf16> to vector<128x128xbf16>
    %cst_87 = arith.constant dense<0.000000e+00> : vector<160x128xf32>
    %90 = tpu.matmul %87, %89, %cst_87 {dimension_numbers = #tpu.dot_dimension_numbers<[1], [0], [0], [1], [0, 0, 1, 1], [], []>} : vector<160x128xbf16>, vector<128x128xbf16>, vector<160x128xf32> -> vector<160x128xf32>
    %91 = arith.addf %86, %90 : vector<160x128xf32>
    %c41_88 = arith.constant 41 : index
    %c0_89 = arith.constant 0 : index
    %92 = vector.load %arg9[%c41_88, %c0_89] : memref<208x128xbf16, #tpu.memory_space<vmem>>, vector<160x128xbf16>
    %c7_90 = arith.constant 7 : index
    %c0_91 = arith.constant 0 : index
    %c0_92 = arith.constant 0 : index
    %93 = vector.load %arg4[%c7_90, %c0_91, %c0_92] : memref<9x128x128xbf16, #tpu.memory_space<vmem>>, vector<1x128x128xbf16>
    %94 = vector.shape_cast %93 : vector<1x128x128xbf16> to vector<128x128xbf16>
    %cst_93 = arith.constant dense<0.000000e+00> : vector<160x128xf32>
    %95 = tpu.matmul %92, %94, %cst_93 {dimension_numbers = #tpu.dot_dimension_numbers<[1], [0], [0], [1], [0, 0, 1, 1], [], []>} : vector<160x128xbf16>, vector<128x128xbf16>, vector<160x128xf32> -> vector<160x128xf32>
    %96 = arith.addf %91, %95 : vector<160x128xf32>
    %c42_94 = arith.constant 42 : index
    %c0_95 = arith.constant 0 : index
    %97 = vector.load %arg9[%c42_94, %c0_95] : memref<208x128xbf16, #tpu.memory_space<vmem>>, vector<160x128xbf16>
    %c8_96 = arith.constant 8 : index
    %c0_97 = arith.constant 0 : index
    %c0_98 = arith.constant 0 : index
    %98 = vector.load %arg4[%c8_96, %c0_97, %c0_98] : memref<9x128x128xbf16, #tpu.memory_space<vmem>>, vector<1x128x128xbf16>
    %99 = vector.shape_cast %98 : vector<1x128x128xbf16> to vector<128x128xbf16>
    %cst_99 = arith.constant dense<0.000000e+00> : vector<160x128xf32>
    %100 = tpu.matmul %97, %99, %cst_99 {dimension_numbers = #tpu.dot_dimension_numbers<[1], [0], [0], [1], [0, 0, 1, 1], [], []>} : vector<160x128xbf16>, vector<128x128xbf16>, vector<160x128xf32> -> vector<160x128xf32>
    %101 = arith.addf %96, %100 : vector<160x128xf32>
    %c0_100 = arith.constant 0 : index
    %c0_101 = arith.constant 0 : index
    %c0_102 = arith.constant 0 : index
    %102 = vector.load %arg6[%c0_100, %c0_101, %c0_102] : memref<1x160x128xf32, #tpu.memory_space<vmem>>, vector<1x160x128xf32>
    %103 = vector.shape_cast %102 : vector<1x160x128xf32> to vector<160x128xf32>
    %104 = arith.addf %101, %103 : vector<160x128xf32>
    %c0_103 = arith.constant 0 : index
    %c0_104 = arith.constant 0 : index
    %c0_105 = arith.constant 0 : index
    %105 = vector.load %arg7[%c0_103, %c0_104, %c0_105] : memref<1x160x128xf32, #tpu.memory_space<vmem>>, vector<1x160x128xf32>
    %106 = vector.shape_cast %105 : vector<1x160x128xf32> to vector<160x128xf32>
    %107 = vector.shape_cast %104 : vector<160x128xf32> to vector<1x160x128xf32>
    tpu.vector_store %arg7[%c0_103, %c0_104, %c0_105], %107 {strides = array<i32>} : memref<1x160x128xf32, #tpu.memory_space<vmem>>, vector<1x160x128xf32>,
    return
  }
  func.func @transform_1(%arg0: i32, %arg1: i32) -> (i32, i32, i32) {
    %c0_i32 = arith.constant 0 : i32
    %c0_i32_0 = arith.constant 0 : i32
    %c0_i32_1 = arith.constant 0 : i32
    %c0_i32_2 = arith.constant 0 : i32
    return %c0_i32, %c0_i32_0, %c0_i32_1 : i32, i32, i32
  }
  func.func @transform_2(%arg0: i32, %arg1: i32) -> (i32, i32, i32) {
    %c0_i32 = arith.constant 0 : i32
    %c0_i32_0 = arith.constant 0 : i32
    %c0_i32_1 = arith.constant 0 : i32
    %c0_i32_2 = arith.constant 0 : i32
    return %c0_i32, %c0_i32_0, %c0_i32_1 : i32, i32, i32
  }
  func.func @transform_3(%arg0: i32, %arg1: i32) -> (i32, i32, i32) {
    %c0_i32 = arith.constant 0 : i32
    %c0_i32_0 = arith.constant 0 : i32
    %c0_i32_1 = arith.constant 0 : i32
    return %arg1, %c0_i32, %c0_i32_0 : i32, i32, i32
  }
  func.func @transform_4(%arg0: i32, %arg1: i32) -> (i32, i32, i32) {
    %c0_i32 = arith.constant 0 : i32
    %c0_i32_0 = arith.constant 0 : i32
    return %arg0, %arg1, %c0_i32 : i32, i32, i32
  }
  func.func @transform_5(%arg0: i32, %arg1: i32) -> (i32, i32, i32) {
    %c0_i32 = arith.constant 0 : i32
    %c0_i32_0 = arith.constant 0 : i32
    return %arg0, %arg1, %c0_i32 : i32, i32, i32
  }
}

</mosaic_0001>

<bundles_post_ra>
// kernel: edsr_block_gated.1
= control target key start
LH: loop header
LB: loop body
LE: loop exit
PB: predicated region body
PF: predicated region fallthrough
CT: control target
= control target key end

     0   :  { %s8258_s18 = smov 0   ;;  %s8260_s19 = smov 0   ;;  %s10023_s0 = inlined_call_operand.vmem [shape: bf16[816,128], index: 0, kind: input, shape index: {}]   ;;  %s10024_s1 = inlined_call_operand.vmem [shape: bf16[9,128,128], index: 1, kind: input, shape index: {}]   ;;  %s10025_s2 = inlined_call_operand.vmem [shape: bf16[9,128,128], index: 2, kind: input, shape index: {}]   ;;  %s10026_s3 = inlined_call_operand.vmem [shape: f32[2,208,1], index: 3, kind: input, shape index: {}]   ;;  %s10027_s4 = inlined_call_operand.vmem [shape: f32[2,320,128], index: 4, kind: input, shape index: {}]   ;;  %s10028_s5 = inlined_call_operand.vmem [shape: f32[2,320,128], index: 5, kind: output, shape index: {}]  }
   0x1   :  { %s8262_s20 = smov 0   ;;  %s8264_s21 = smov 0  }
   0x2   :  { %s8266_s22 = smov 0  }
   0x3 LB: > { %s24_s23 = sadd.s32 1, %s8215_s20  ;;  %s27_s24 = sadd.s32 1, %s8219_s21  ;;  %s8223_s22 = sphi %s8266_s22, %s15_s22   ;;  %s8219_s21 = sphi %s8264_s21, %s10059_s21   ;;  %s8215_s20 = sphi %s8262_s20, %s10058_s20   ;;  %s8211_s19 = sphi %s8260_s19, %s10057_s19   ;;  %s8207_s18 = sphi %s8258_s18, %s10056_s18  }
   0x4   : > { %p25_p0 = scmp.ge.s32.totalorder %s24_s23, 2  ;;  %p5737_p1 = scmp.ge.s32.totalorder %s8223_s22, 1 }
   0x5   : > { %p194_p2 = scmp.lt.s32.totalorder %s8223_s22, 5 }
   0x6   : > { %s10061_s23 = smov (%p25_p0, %s24_s23), 0  ;;  %s10063_s24 = smov (!%p25_p0, %s27_s24), %s8219_s21 }
   0x7   : > { %p195_p3 = pnand %p5737_p1, %p194_p2  ;;  %p29_p4 = scmp.ge.s32.totalorder %s10063_s24, 2 }
   0x9   : > { %s10065_s24 = smov (%p29_p4, %s10063_s24), 0  ;;  %198 = sbr.rel (%p195_p3) target bundleno = 1510 (0x5e6), region = 36 }
  0x10   : > { %p233_p5 = scmp.lt.s32.totalorder %s8207_s18, 1  ;;  %s238_s25 = smul.u32 20, %s8207_s18 }
  0x11   : > { %p239_p6 = scmp.lt.s32.totalorder %s8211_s19, 1  ;;  %s259_s26 = smul.u32 20, %s8211_s19 }
  0x12   : > { %s234_s27 = scalar_select %p233_p5, %s8207_s18, 1 }
  0x13   : > { %s10067_s19 = smov (!%p239_p6, %s8211_s19), 1  ;;  %p241_p7 = scmp.lt.s32.totalorder %s238_s25, 39 }
  0x14   : > { %s7979_s28 = smul.u32 208, %s234_s27  ;;  %s5741_s30 = sshll.u32 %s8207_s18, 3 }
  0x15   : > { %s7980_s29 = smul.u32 40, %s10067_s19  ;;  %s261_s9 = sadd.s32 %s5741_s30, %s259_s26 }
  0x16   : > { %s8291_s8 = scalar_lea.vmem %s10026_s3, %s7979_s28  ;;  %s10069_s25 = smov (!%p241_p7, %s238_s25), 39 }
  0x17   : > { %s262_s10 = smul.u32 20, %s261_s9  ;;  %s244_s11 = sadd.s32 %s7980_s29, %s10069_s25 }
  0x18   : > { %s5739_s12 = sshll.u32 %s244_s11, 3 }
  0x19   : > { %s263_s13 = sshra.s32 %s262_s10, 3  ;;  %s8296_s16 = scalar_lea.vmem %s10027_s4, %s5739_s12 }
  0x1a   : > { %s8301_s18 = scalar_lea.vmem %s10028_s5, %s5739_s12  ;;  %s5742_s19 = sshll.u32 %s263_s13, 2 }
  0x1b   : > { %s8306_s26 = scalar_lea.vmem %s10023_s0, %s5742_s19 }
  0x1c   : > { %v299_v0 = vld [vmem:[%s8306_s26] sm:$0xff]  ;;  %v301_v1 = vld [vmem:[%s8306_s26 + $0x8] sm:$0xff]  ;;  %v303_v2 = vld [vmem:[%s8306_s26 + $0x10] sm:$0xff] }
  0x1d   : > { %300 = vst [vmem:[#allocation2] sm:$0xff] %v299_v0  ;;  %302 = vst [vmem:[#allocation2 + $0x8] sm:$0xff] %v301_v1  ;;  %v305_v3 = vld [vmem:[%s8306_s26 + $0x18] sm:$0xff]  ;;  %v307_v4 = vld [vmem:[%s8306_s26 + $0x20] sm:$0xff] }
  0x1e   : > { %304 = vst [vmem:[#allocation2 + $0x10] sm:$0xff] %v303_v2  ;;  %v309_v5 = vld [vmem:[%s8306_s26 + $0x28] sm:$0xff]  ;;  %306 = vst [vmem:[#allocation2 + $0x18] sm:$0xff] %v305_v3  ;;  %v311_v6 = vld [vmem:[%s8306_s26 + $0x30] sm:$0xff] }
  0x1f   : > { %308 = vst [vmem:[#allocation2 + $0x20] sm:$0xff] %v307_v4  ;;  %310 = vst [vmem:[#allocation2 + $0x28] sm:$0xff] %v309_v5  ;;  %v313_v7 = vld [vmem:[%s8306_s26 + $0x38] sm:$0xff]  ;;  %v315_v8 = vld [vmem:[%s8306_s26 + $0x40] sm:$0xff] }
  0x20   : > { %312 = vst [vmem:[#allocation2 + $0x30] sm:$0xff] %v311_v6  ;;  %314 = vst [vmem:[#allocation2 + $0x38] sm:$0xff] %v313_v7  ;;  %v317_v9 = vld [vmem:[%s8306_s26 + $0x48] sm:$0xff]  ;;  %v319_v10 = vld [vmem:[%s8306_s26 + $0x50] sm:$0xff] }
  0x21   : > { %316 = vst [vmem:[#allocation2 + $0x40] sm:$0xff] %v315_v8  ;;  %v321_v11 = vld [vmem:[%s8306_s26 + $0x58] sm:$0xff]  ;;  %318 = vst [vmem:[#allocation2 + $0x48] sm:$0xff] %v317_v9  ;;  %v323_v12 = vld [vmem:[%s8306_s26 + $0x60] sm:$0xff] }
  0x22   : > { %320 = vst [vmem:[#allocation2 + $0x50] sm:$0xff] %v319_v10  ;;  %322 = vst [vmem:[#allocation2 + $0x58] sm:$0xff] %v321_v11  ;;  %v325_v13 = vld [vmem:[%s8306_s26 + $0x68] sm:$0xff]  ;;  %v327_v14 = vld [vmem:[%s8306_s26 + $0x70] sm:$0xff] }
  0x23   : > { %324 = vst [vmem:[#allocation2 + $0x60] sm:$0xff] %v323_v12  ;;  %326 = vst [vmem:[#allocation2 + $0x68] sm:$0xff] %v325_v13  ;;  %v329_v15 = vld [vmem:[%s8306_s26 + $0x78] sm:$0xff] }
  0x24   : > { %328 = vst [vmem:[#allocation2 + $0x70] sm:$0xff] %v327_v14  ;;  %330 = vst [vmem:[#allocation2 + $0x78] sm:$0xff] %v329_v15 }
  0x25   : > { %338 = vsyncadd [#allocation4], 2048 }
  0x26   : > { %8203 = dma.done.wait [#allocation4], 2048 }
  0x27   : > { %8204 = vsyncadd [#allocation4], 4294965248  ;;  %v8225_v16 = vmov 0.0   ;;  %vm8226_vm0 = vmmov 0   ;;  %v8026_v17 = vld [vmem:[%s10024_s1 + $0x80] sm:$0xff]   ;;  %v8027_v18 = vld [vmem:[%s10024_s1 + $0x88] sm:$0xff]  }
  0x28   : > { %6633 = vmatprep.subr.bf16.mxu0 %v8225_v16  ;;  %6649 = vmatprep.mubr.msk.bf16.mxu0 %vm8226_vm0, %v8225_v16  ;;  %v8028_v19 = vld [vmem:[%s10024_s1 + $0x90] sm:$0xff]   ;;  %v8029_v20 = vld [vmem:[%s10024_s1 + $0x98] sm:$0xff]   ;;  %v8030_v21 = vld [vmem:[%s10024_s1 + $0xa0] sm:$0xff]   ;;  %vm914_vm1 = vcmask 1046528   ;;  %vm1211_vm2 = vcmask 1045504   ;;  %vm1851_vm5 = vcmask 1044480  }
  0x29   : > { %6497 = vmatprep.subr.bf16.mxu1 %v8225_v16  ;;  %6513 = vmatprep.mubr.msk.bf16.mxu1 %vm8226_vm0, %v8225_v16  ;;  %v8031_v22 = vld [vmem:[%s10024_s1 + $0xa8] sm:$0xff]   ;;  %v8032_v23 = vld [vmem:[%s10024_s1 + $0xb0] sm:$0xff]   ;;  %v882_v25 = vld [vmem:[#allocation2] sm:$0xfe]  ;;  %vm390_vm3 = vsmask.f32 7424 }
  0x2a   : > { %6634 = vmatpush3.bf16.msra.mxu0 %v8026_v17  ;;  %v8356_v24 = vld [vmem:[#allocation2 + $0x8] sm:$0xff]  ;;  %v8033_v26 = vld [vmem:[%s10024_s1 + $0xb8] sm:$0xff]   ;;  %v915_v27 = vrot.slane %v882_v25, 1  ;;  %v8034_v29 = vld [vmem:[%s10024_s1 + $0xc0] sm:$0xff]   ;;  %vm1481_vm4 = vsmask.f32 5376 }
  0x2b   : > { %6635 = vmatprep.subr.bf16.mxu0 %v8225_v16  ;;  %v916_v28 = vrot.slane %v8356_v24, 1  ;;  %v8367_v30 = vld [vmem:[#allocation2 + $0x10] sm:$0xff]  ;;  %v8035_v33 = vld [vmem:[%s10024_s1 + $0xc8] sm:$0xff]   ;;  %v8381_v35 = vld [vmem:[#allocation2 + $0x18] sm:$0xff]  ;;  %vm2148_vm6 = vcmask 1043456   ;;  %vm2788_vm7 = vcmask 1042432  }
  0x2c   : > { %v918_v32 = vrot.slane %v8367_v30, 1  ;;  %v8036_v34 = vld [vmem:[%s10024_s1 + $0xd0] sm:$0xff]   ;;  %v920_v37 = vrot.slane %v8381_v35, 1  ;;  %v8037_v38 = vld [vmem:[%s10024_s1 + $0xd8] sm:$0xff]   ;;  %v8038_v39 = vld [vmem:[%s10024_s1 + $0xe0] sm:$0xff]   ;;  %v1213_v12 = vrot.slane %v8367_v30, 2 }
  0x2d   : > { %v917_v31 = vsel %vm914_vm1, %v915_v27, %v916_v28  ;;  %v8395_v40 = vld [vmem:[#allocation2 + $0x20] sm:$0xff]  ;;  %v8039_v43 = vld [vmem:[%s10024_s1 + $0xe8] sm:$0xff]   ;;  %v8040_v44 = vld [vmem:[%s10024_s1 + $0xf0] sm:$0xff]   ;;  %v1215_v15 = vrot.slane %v8381_v35, 2  ;;  %vm2418_vm8 = vsmask.f32 3328 }
  0x2e   : > { %6636 = vmatpush3.bf16.msra.mxu0 %v8027_v18  ;;  %v919_v36 = vsel %vm914_vm1, %v916_v28, %v918_v32  ;;  %v921_v41 = vsel %vm914_vm1, %v918_v32, %v920_v37  ;;  %v922_v42 = vrot.slane %v8395_v40, 1  ;;  %v8409_v45 = vld [vmem:[#allocation2 + $0x28] sm:$0xff]  ;;  %v8041_v48 = vld [vmem:[%s10024_s1 + $0xf8] sm:$0xff]   ;;  %v8420_v49 = vld [vmem:[#allocation2 + $0x30] sm:$0xff] }
  0x2f   : > { %6637 = vmatprep.subr.bf16.mxu0 %v8225_v16  ;;  %v924_v47 = vrot.slane %v8409_v45, 1  ;;  %v926_v51 = vrot.slane %v8420_v49, 1  ;;  %v8427_v52 = vld [vmem:[#allocation2 + $0x38] sm:$0xff]  ;;  %v8433_v55 = vld [vmem:[#allocation2 + $0x40] sm:$0xff]  ;;  %v8439_v58 = vld [vmem:[#allocation2 + $0x48] sm:$0xff]  ;;  %v1216_v18 = vsel %vm1211_vm2, %v1213_v12, %v1215_v15  ;;  %v1219_v25 = vrot.slane %v8409_v45, 2 }
  0x30   : > { %v923_v46 = vsel %vm914_vm1, %v920_v37, %v922_v42  ;;  %v928_v54 = vrot.slane %v8427_v52, 1  ;;  %v930_v57 = vrot.slane %v8433_v55, 1  ;;  %v932_v60 = vrot.slane %v8439_v58, 1  ;;  %v8445_v61 = vld [vmem:[#allocation2 + $0x50] sm:$0xff]  ;;  %v8451_v0 = vld [vmem:[#allocation2 + $0x58] sm:$0xff]  ;;  %v8457_v3 = vld [vmem:[#allocation2 + $0x60] sm:$0xff] }
  0x31   : > { %v925_v50 = vsel %vm914_vm1, %v922_v42, %v924_v47  ;;  %v927_v53 = vsel %vm914_vm1, %v924_v47, %v926_v51  ;;  %v934_v63 = vrot.slane %v8445_v61, 1  ;;  %v936_v2 = vrot.slane %v8451_v0, 1  ;;  %v8464_v7 = vld [vmem:[#allocation2 + $0x68] sm:$0x1]  ;;  %v8470_v10 = vld [vmem:[#allocation2 + $0x8] sm:$0xfc] }
  0x32   : > { %6638 = vmatpush3.bf16.msra.mxu0 %v8028_v19  ;;  %v929_v56 = vsel %vm914_vm1, %v926_v51, %v928_v54  ;;  %v931_v59 = vsel %vm914_vm1, %v928_v54, %v930_v57  ;;  %v933_v62 = vsel %vm914_vm1, %v930_v57, %v932_v60  ;;  %v938_v5 = vrot.slane %v8457_v3, 1  ;;  %v8042_v14 = vld [vmem:[%s10024_s1 + $0x100] sm:$0xff]   ;;  %v8043_v17 = vld [vmem:[%s10024_s1 + $0x108] sm:$0xff]   ;;  %v8044_v19 = vld [vmem:[%s10024_s1 + $0x110] sm:$0xff]  }
  0x33   : > { %6639 = vmatprep.subr.bf16.mxu0 %v8225_v16  ;;  %v935_v1 = vsel %vm914_vm1, %v932_v60, %v934_v63  ;;  %v937_v4 = vsel %vm914_vm1, %v934_v63, %v936_v2  ;;  %v940_v8 = vrot.slane %v8464_v7, 1  ;;  %v1212_v11 = vrot.slane %v8470_v10, 2  ;;  %v8048_v28 = vld [vmem:[%s10024_s1 + $0x130] sm:$0xff]   ;;  %v8055_v32 = vld [vmem:[%s10024_s1 + $0x40] sm:$0xff]  }
  0x34   : > { %v939_v6 = vsel %vm914_vm1, %v936_v2, %v938_v5  ;;  %6498 = vmatpush3.bf16.msra.mxu1 %v8055_v32  ;;  %v8058_v37 = vld [vmem:[%s10024_s1 + $0x50] sm:$0xff]   ;;  %v8060_v42 = vld [vmem:[%s10024_s1 + $0x60] sm:$0xff]   ;;  %v399_v57 = vshll.u32 %v8356_v24, 16  ;;  %v1494_v2 = vshll.u32 %v8367_v30, 16  ;;  %v1486_v32 = vshll.u32 %v8470_v10, 16 }
  0x35   : > { %v941_v9 = vsel %vm914_vm1, %v938_v5, %v940_v8  ;;  %v1214_v13 = vsel %vm1211_vm2, %v1212_v11, %v1213_v12  ;;  %6499 = vmatprep.subr.bf16.mxu1 %v8225_v16  ;;  %v8063_v47 = vld [vmem:[%s10024_s1 + $0x70] sm:$0xff]   ;;  %v1231_v5 = vrot.slane %v8451_v0, 2  ;;  %v1491_v12 = vshrl.u32 %v8367_v30, 16 }
  0x36   : > { %6640 = vmatpush3.bf16.msra.mxu0 %v8029_v20  ;;  %v1217_v20 = vrot.slane %v8395_v40, 2  ;;  %v409_v8 = vrot.slane %v1494_v2, 1  ;;  %v1500_v30 = vshrl.u32 %v8381_v35, 16 }
  0x37   : > { %6641 = vmatprep.subr.bf16.mxu0 %v8225_v16 }
  0x38   : > { %v1220_v27 = vsel %vm1211_vm2, %v1217_v20, %v1219_v25 }
  0x3a   : > { %6642 = vmatpush3.bf16.msra.mxu0 %v8030_v21  ;;  %v8045_v21 = vld [vmem:[%s10024_s1 + $0x118] sm:$0xff]  }
  0x3b   : > { %6643 = vmatprep.subr.bf16.mxu0 %v8225_v16 }
  0x3e   : > { %6644 = vmatpush3.bf16.msra.mxu0 %v8031_v22  ;;  %v1218_v22 = vsel %vm1211_vm2, %v1215_v15, %v1217_v20  ;;  %v1512_v20 = vshll.u32 %v8395_v40, 16 }
  0x3f   : > { %6645 = vmatprep.subr.bf16.mxu0 %v8225_v16 }
  0x42   : > { %6646 = vmatpush3.bf16.msra.mxu0 %v8032_v23  ;;  %v8046_v23 = vld [vmem:[%s10024_s1 + $0x120] sm:$0xff]  }
  0x43   : > { %6647 = vmatprep.subr.bf16.mxu0 %v8225_v16 }
  0x46   : > { %6648 = vmatpush3.bf16.msra.mxu0 %v8033_v26  ;;  %v8047_v26 = vld [vmem:[%s10024_s1 + $0x128] sm:$0xff]  }
  0x47   : > { %6701 = vmatprep.subr.bf16.mxu0 %v8225_v16 }
  0x49   : > { %6650 = vmatmul.mubr.bf16.vlgmr.msra.gmra.mrb[0].mxu0 %v917_v31  ;;  %v8049_v31 = vld [vmem:[%s10024_s1 + $0x138] sm:$0xff]  }
  0x4a   : > { %6702 = vmatpush3.bf16.msra.mxu0 %v8034_v29  ;;  %6653 = vmatprep.mubr.msk.bf16.mxu0 %vm8226_vm0, %v8225_v16  ;;  %v1221_v29 = vrot.slane %v8420_v49, 2 }
  0x4b   : > { %6703 = vmatprep.subr.bf16.mxu0 %v8225_v16 }
  0x4e   : > { %6704 = vmatpush3.bf16.msra.mxu0 %v8035_v33  ;;  %v1222_v33 = vsel %vm1211_vm2, %v1219_v25, %v1221_v29 }
  0x4f   : > { %6705 = vmatprep.subr.bf16.mxu0 %v8225_v16 }
  0x51   : > { %6654 = vmatmul.mubr.bf16.gmra.mrb[4].mxu0 %v919_v36  ;;  %v1223_v36 = vrot.slane %v8427_v52, 2 }
  0x52   : > { %6657 = vmatprep.mubr.msk.bf16.mxu0 %vm8226_vm0, %v8225_v16  ;;  %6706 = vmatpush3.bf16.msra.mxu0 %v8036_v34  ;;  %v8057_v34 = vld [vmem:[%s10024_s1 + $0x48] sm:$0xff]  }
  0x53   : > { %6707 = vmatprep.subr.bf16.mxu0 %v8225_v16  ;;  %6500 = vmatpush3.bf16.msra.mxu1 %v8057_v34 }
  0x54   : > { %6501 = vmatprep.subr.bf16.mxu1 %v8225_v16 }
  0x56   : > { %6708 = vmatpush3.bf16.msra.mxu0 %v8037_v38  ;;  %v1224_v38 = vsel %vm1211_vm2, %v1221_v29, %v1223_v36  ;;  %v1521_v29 = vshll.u32 %v8409_v45, 16 }
  0x57   : > { %6709 = vmatprep.subr.bf16.mxu0 %v8225_v16  ;;  %6502 = vmatpush3.bf16.msra.mxu1 %v8058_v37 }
  0x58   : > { %6503 = vmatprep.subr.bf16.mxu1 %v8225_v16  ;;  %v433_v34 = vrot.slane %v1521_v29, 1 }
  0x59   : > { %6658 = vmatmul.mubr.bf16.gmra.mrb[8].mxu0 %v921_v41  ;;  %v1225_v41 = vrot.slane %v8433_v55, 2 }
  0x5a   : > { %6661 = vmatprep.mubr.msk.bf16.mxu0 %vm8226_vm0, %v8225_v16  ;;  %6710 = vmatpush3.bf16.msra.mxu0 %v8038_v39  ;;  %v8059_v39 = vld [vmem:[%s10024_s1 + $0x58] sm:$0xff]  }
  0x5b   : > { %6711 = vmatprep.subr.bf16.mxu0 %v8225_v16  ;;  %6504 = vmatpush3.bf16.msra.mxu1 %v8059_v39  ;;  %v1488_v39 = vrot.slane %v1486_v32, 3  ;;  %v1554_v32 = vshrl.u32 %v8439_v58, 16 }
  0x5c   : > { %6505 = vmatprep.subr.bf16.mxu1 %v8225_v16 }
  0x5e   : > { %6712 = vmatpush3.bf16.msra.mxu0 %v8039_v43  ;;  %v1226_v43 = vsel %vm1211_vm2, %v1223_v36, %v1225_v41 }
  0x5f   : > { %6713 = vmatprep.subr.bf16.mxu0 %v8225_v16  ;;  %6506 = vmatpush3.bf16.msra.mxu1 %v8060_v42  ;;  %v1496_v42 = vrot.slane %v1494_v2, 3 }
  0x60   : > { %6507 = vmatprep.subr.bf16.mxu1 %v8225_v16 }
  0x61   : > { %6662 = vmatmul.mubr.bf16.gmra.mrb[12].mxu0 %v923_v46  ;;  %v1227_v46 = vrot.slane %v8439_v58, 2 }
  0x62   : > { %6665 = vmatprep.mubr.msk.bf16.mxu0 %vm8226_vm0, %v8225_v16  ;;  %6714 = vmatpush3.bf16.msra.mxu0 %v8040_v44  ;;  %v8062_v44 = vld [vmem:[%s10024_s1 + $0x68] sm:$0xff]  }
  0x63   : > { %6715 = vmatprep.subr.bf16.mxu0 %v8225_v16  ;;  %6508 = vmatpush3.bf16.msra.mxu1 %v8062_v44 }
  0x64   : > { %6509 = vmatprep.subr.bf16.mxu1 %v8225_v16 }
  0x66   : > { %6716 = vmatpush3.bf16.msra.mxu0 %v8041_v48  ;;  %v1228_v48 = vsel %vm1211_vm2, %v1225_v41, %v1227_v46  ;;  %v1493_v41 = vrot.slane %v1491_v12, 2 }
  0x67   : > { %6769 = vmatprep.subr.bf16.mxu0 %v8225_v16  ;;  %6510 = vmatpush3.bf16.msra.mxu1 %v8063_v47 }
  0x68   : > { %6511 = vmatprep.subr.bf16.mxu1 %v8225_v16  ;;  %v1497_v44 = vor.u32 %v1496_v42, %v1493_v41 }
  0x69   : > { %6666 = vmatmul.mubr.bf16.gmra.mrb[16].mxu0 %v925_v50  ;;  %v8564_v50 = vld [vmem:[#allocation2] sm:$0xff] }
  0x6a   : > { %6669 = vmatprep.mubr.msk.bf16.mxu0 %vm8226_vm0, %v8225_v16  ;;  %v394_v51 = vshll.u32 %v8564_v50, 16  ;;  %v392_v54 = vshrl.u32 %v8564_v50, 16 }
  0x71   : > { %6670 = vmatmul.mubr.bf16.gmra.mrb[20].mxu0 %v927_v53  ;;  %v8064_v53 = vld [vmem:[%s10024_s1 + $0x78] sm:$0xff]  }
  0x72   : > { %6673 = vmatprep.mubr.msk.bf16.mxu0 %vm8226_vm0, %v8225_v16  ;;  %6512 = vmatpush3.bf16.msra.mxu1 %v8064_v53  ;;  %v1502_v53 = vrot.slane %v1500_v30, 2 }
  0x73   : > { %6565 = vmatprep.subr.bf16.mxu1 %v8225_v16 }
  0x79   : > { %6674 = vmatmul.mubr.bf16.gmra.mrb[24].mxu0 %v929_v56  ;;  %v396_v56 = vrot.slane %v394_v51, 1 }
  0x7a   : > { %6677 = vmatprep.mubr.msk.bf16.mxu0 %vm8226_vm0, %v8225_v16 }
  0x7b   : > { %v397_v60 = vor.u32 %v396_v56, %v392_v54  ;;  %v1527_v56 = vshrl.u32 %v8420_v49, 16 }
  0x81   : > { %6678 = vmatmul.mubr.bf16.gmra.mrb[28].mxu0 %v931_v59  ;;  %v1229_v59 = vrot.slane %v8445_v61, 2 }
  0x82   : > { %6681 = vmatprep.mubr.msk.bf16.mxu0 %vm8226_vm0, %v8225_v16 }
  0x83   : > { %v1232_v11 = vsel %vm1211_vm2, %v1229_v59, %v1231_v5 }
  0x89   : > { %6682 = vmatmul.mubr.bf16.gmra.mrb[32].mxu0 %v933_v62  ;;  %v401_v62 = vrot.slane %v399_v57, 1  ;;  %v1539_v57 = vshll.u32 %v8427_v52, 16 }
  0x8a   : > { %6685 = vmatprep.mubr.msk.bf16.mxu0 %vm8226_vm0, %v8225_v16 }
  0x8b   : > { %v402_v63 = vsel %vm390_vm3, %v397_v60, %v401_v62  ;;  %v8051_v60 = vld [vmem:[%s10024_s1 + $0x148] sm:$0xff]  }
  0x8c   : > { %6514 = vmatmul.mubr.bf16.vlgmr.msra.gmra.mrb[0].mxu1 %v402_v63  ;;  %v449_v63 = vrot.slane %v1539_v57, 1 }
  0x8d   : > { %6517 = vmatprep.mubr.msk.bf16.mxu1 %vm8226_vm0, %v8225_v16 }
  0x91   : > { %6686 = vmatmul.mubr.bf16.gmra.mrb[36].mxu0 %v935_v1  ;;  %v1230_v1 = vsel %vm1211_vm2, %v1227_v46, %v1229_v59 }
  0x92   : > { %6689 = vmatprep.mubr.msk.bf16.mxu0 %vm8226_vm0, %v8225_v16 }
  0x99   : > { %6690 = vmatmul.mubr.bf16.gmra.mrb[40].mxu0 %v937_v4  ;;  %v403_v4 = vshrl.u32 %v8356_v24, 16  ;;  %v1503_v24 = vshll.u32 %v8381_v35, 16 }
  0x9a   : > { %6693 = vmatprep.mubr.msk.bf16.mxu0 %vm8226_vm0, %v8225_v16 }
  0x9b   : > { %v417_v15 = vrot.slane %v1503_v24, 1  ;;  %v1505_v54 = vrot.slane %v1503_v24, 3 }
  0x9d   : > { %v1506_v59 = vor.u32 %v1505_v54, %v1502_v53 }
  0x9f   : > { %v1507_v2 = vsel %vm1481_vm4, %v1497_v44, %v1506_v59 }
  0xa1   : > { %6694 = vmatmul.mubr.bf16.gmra.mrb[44].mxu0 %v939_v6  ;;  %v405_v6 = vor.u32 %v403_v4, %v401_v62 }
  0xa2   : > { %6697 = vmatprep.mubr.msk.bf16.mxu0 %vm8226_vm0, %v8225_v16 }
  0xa9   : > { %6698 = vmatmul.mubr.bf16.gmra.mrb[48].mxu0 %v941_v9  ;;  %v410_v9 = vsel %vm390_vm3, %v405_v6, %v409_v8  ;;  %v8052_v6 = vld [vmem:[%s10024_s1 + $0x150] sm:$0xff]  }
  0xaa   : > { %6717 = vmatprep.mubr.msk.bf16.mxu0 %vm8226_vm0, %v8225_v16  ;;  %6518 = vmatmul.mubr.bf16.gmra.mrb[4].mxu1 %v410_v9  ;;  %v1548_v9 = vshll.u32 %v8433_v55, 16 }
  0xab   : > { %6521 = vmatprep.mubr.msk.bf16.mxu1 %vm8226_vm0, %v8225_v16 }
  0xac   : > { %v1550_v54 = vrot.slane %v1548_v9, 3 }
  0xb1   : > { %6718 = vmatmul.mubr.bf16.vlgmr.msra.gmra.mrb[0].mxu0 %v1214_v13  ;;  %v1233_v13 = vrot.slane %v8457_v3, 2 }
  0xb2   : > { %6770 = vmatpush3.bf16.msra.mxu0 %v8042_v14  ;;  %6721 = vmatprep.mubr.msk.bf16.mxu0 %vm8226_vm0, %v8225_v16  ;;  %v413_v14 = vor.u32 %v1491_v12, %v409_v8  ;;  %v1536_v8 = vshrl.u32 %v8427_v52, 16  ;;  %v8053_v12 = vld [vmem:[%s10024_s1 + $0x158] sm:$0xff]   ;;  %v8073_v52 = vld [vmem:[%s10024_s1 + $0x8] sm:$0xff]  }
  0xb3   : > { %6771 = vmatprep.subr.bf16.mxu0 %v8225_v16 }
  0xb4   : > { %v453_v24 = vor.u32 %v1536_v8, %v449_v63  ;;  %v1538_v42 = vrot.slane %v1536_v8, 2  ;;  %v8078_v8 = vld [vmem:[%s10024_s1 + $0x28] sm:$0xff]  }
  0xb6   : > { %6772 = vmatpush3.bf16.msra.mxu0 %v8043_v17  ;;  %v418_v17 = vsel %vm390_vm3, %v413_v14, %v417_v15 }
  0xb7   : > { %6773 = vmatprep.subr.bf16.mxu0 %v8225_v16  ;;  %6522 = vmatmul.mubr.bf16.gmra.mrb[8].mxu1 %v418_v17 }
  0xb8   : > { %6525 = vmatprep.mubr.msk.bf16.mxu1 %vm8226_vm0, %v8225_v16 }
  0xb9   : > { %6722 = vmatmul.mubr.bf16.gmra.mrb[4].mxu0 %v1216_v18  ;;  %v1234_v18 = vsel %vm1211_vm2, %v1231_v5, %v1233_v13  ;;  %v1514_v5 = vrot.slane %v1512_v20, 3 }
  0xba   : > { %6725 = vmatprep.mubr.msk.bf16.mxu0 %vm8226_vm0, %v8225_v16  ;;  %6774 = vmatpush3.bf16.msra.mxu0 %v8044_v19  ;;  %v8597_v19 = vld [vmem:[#allocation2 + $0x68] sm:$0xff] }
  0xbb   : > { %6775 = vmatprep.subr.bf16.mxu0 %v8225_v16 }
  0xbe   : > { %6776 = vmatpush3.bf16.msra.mxu0 %v8045_v21  ;;  %v1235_v21 = vrot.slane %v8597_v19, 2 }
  0xbf   : > { %6777 = vmatprep.subr.bf16.mxu0 %v8225_v16 }
  0xc1   : > { %6726 = vmatmul.mubr.bf16.gmra.mrb[8].mxu0 %v1218_v22  ;;  %v421_v22 = vor.u32 %v1500_v30, %v417_v15  ;;  %v8054_v30 = vld [vmem:[%s10024_s1 + $0x160] sm:$0xff]  }
  0xc2   : > { %6729 = vmatprep.mubr.msk.bf16.mxu0 %vm8226_vm0, %v8225_v16  ;;  %6778 = vmatpush3.bf16.msra.mxu0 %v8046_v23  ;;  %v425_v23 = vrot.slane %v1512_v20, 1  ;;  %v1545_v20 = vshrl.u32 %v8433_v55, 16 }
  0xc3   : > { %6779 = vmatprep.subr.bf16.mxu0 %v8225_v16 }
  0xc4   : > { %v426_v25 = vsel %vm390_vm3, %v421_v22, %v425_v23  ;;  %v1547_v53 = vrot.slane %v1545_v20, 2 }
  0xc5   : > { %6526 = vmatmul.mubr.bf16.gmra.mrb[12].mxu1 %v426_v25 }
  0xc6   : > { %6780 = vmatpush3.bf16.msra.mxu0 %v8047_v26  ;;  %v1236_v26 = vsel %vm1211_vm2, %v1233_v13, %v1235_v21  ;;  %6529 = vmatprep.mubr.msk.bf16.mxu1 %vm8226_vm0, %v8225_v16  ;;  %v457_v13 = vrot.slane %v1548_v9, 1  ;;  %v1551_v55 = vor.u32 %v1550_v54, %v1547_v53  ;;  %v495_v9 = vshll.u32 %v8464_v7, 16  ;;  %v8067_v54 = vld [vmem:[%s10024_s1 + $0x188] sm:$0xff]  }
  0xc7   : > { %6781 = vmatprep.subr.bf16.mxu0 %v8225_v16 }
  0xc8   : > { %v458_v14 = vsel %vm390_vm3, %v453_v24, %v457_v13  ;;  %v461_v25 = vor.u32 %v1545_v20, %v457_v13  ;;  %v497_v24 = vrot.slane %v495_v9, 1 }
  0xc9   : > { %6730 = vmatmul.mubr.bf16.gmra.mrb[12].mxu0 %v1220_v27  ;;  %v1179_v27 = vld [vmem:[#allocation2 + $0x70] sm:$0x3] }
  0xca   : > { %6733 = vmatprep.mubr.msk.bf16.mxu0 %vm8226_vm0, %v8225_v16  ;;  %6782 = vmatpush3.bf16.msra.mxu0 %v8048_v28  ;;  %v1237_v35 = vrot.slane %v1179_v27, 2  ;;  %v1509_v28 = vshrl.u32 %v8395_v40, 16  ;;  %v1518_v40 = vshrl.u32 %v8409_v45, 16  ;;  %v8050_v45 = vld [vmem:[%s10024_s1 + $0x140] sm:$0xff]  }
  0xcb   : > { %6783 = vmatprep.subr.bf16.mxu0 %v8225_v16 }
  0xcc   : > { %v1238_v36 = vsel %vm1211_vm2, %v1235_v21, %v1237_v35  ;;  %v437_v46 = vor.u32 %v1518_v40, %v433_v34  ;;  %v1511_v4 = vrot.slane %v1509_v28, 2  ;;  %v1520_v17 = vrot.slane %v1518_v40, 2 }
  0xcd   : > { %v1557_v21 = vshll.u32 %v8439_v58, 16  ;;  %v1541_v40 = vrot.slane %v1539_v57, 3  ;;  %v1584_v57 = vshll.u32 %v8457_v3, 16 }
  0xce   : > { %6784 = vmatpush3.bf16.msra.mxu0 %v8049_v31  ;;  %v1483_v31 = vshrl.u32 %v8470_v10, 16 }
  0xcf   : > { %6837 = vmatprep.subr.bf16.mxu0 %v8225_v16 }
  0xd1   : > { %6734 = vmatmul.mubr.bf16.gmra.mrb[16].mxu0 %v1222_v33  ;;  %v429_v33 = vor.u32 %v1509_v28, %v425_v23  ;;  %v8056_v23 = vld [vmem:[%s10024_s1 + $0x168] sm:$0xff]   ;;  %v1529_v28 = vrot.slane %v1527_v56, 2 }
  0xd2   : > { %6737 = vmatprep.mubr.msk.bf16.mxu0 %vm8226_vm0, %v8225_v16 }
  0xd3   : > { %v434_v37 = vsel %vm390_vm3, %v429_v33, %v433_v34  ;;  %v1566_v33 = vshll.u32 %v8445_v61, 16  ;;  %v8065_v34 = vld [vmem:[%s10024_s1 + $0x178] sm:$0xff]  }
  0xd4   : > { %6530 = vmatmul.mubr.bf16.gmra.mrb[16].mxu1 %v434_v37 }
  0xd5   : > { %6533 = vmatprep.mubr.msk.bf16.mxu1 %vm8226_vm0, %v8225_v16  ;;  %v473_v37 = vrot.slane %v1566_v33, 1  ;;  %v1568_v7 = vrot.slane %v1566_v33, 3 }
  0xd9   : > { %6738 = vmatmul.mubr.bf16.gmra.mrb[20].mxu0 %v1224_v38  ;;  %v1485_v38 = vrot.slane %v1483_v31, 2  ;;  %v8061_v31 = vld [vmem:[%s10024_s1 + $0x170] sm:$0xff]  }
  0xda   : > { %6741 = vmatprep.mubr.msk.bf16.mxu0 %vm8226_vm0, %v8225_v16 }
  0xdb   : > { %v1489_v10 = vor.u32 %v1488_v39, %v1485_v38  ;;  %v8071_v39 = vld [vmem:[%s10024_s1] sm:$0xff]  }
  0xdc   : > { %6566 = vmatpush3.bf16.msra.mxu1 %v8071_v39 }
  0xdd   : > { %v1498_v51 = vsel %vm1481_vm4, %v1489_v10, %v1497_v44  ;;  %6567 = vmatprep.subr.bf16.mxu1 %v8225_v16  ;;  %v1575_v10 = vshll.u32 %v8451_v0, 16  ;;  %v1542_v44 = vor.u32 %v1541_v40, %v1538_v42  ;;  %v8172_v40 = vld [vmem:[#allocation2 + $0x18] sm:$0xff] }
  0xde   : > { %v1855_v53 = vrot.slane %v8172_v40, 3 }
  0xe0   : > { %6568 = vmatpush3.bf16.msra.mxu1 %v8073_v52  ;;  %v8173_v52 = vld [vmem:[#allocation2 + $0x20] sm:$0xff] }
  0xe1   : > { %6742 = vmatmul.mubr.bf16.gmra.mrb[24].mxu0 %v1226_v43  ;;  %v1530_v43 = vshll.u32 %v8420_v49, 16  ;;  %6569 = vmatprep.subr.bf16.mxu1 %v8225_v16 }
  0xe2   : > { %6745 = vmatprep.mubr.msk.bf16.mxu0 %vm8226_vm0, %v8225_v16 }
  0xe3   : > { %v441_v47 = vrot.slane %v1530_v43, 1 }
  0xe5   : > { %v445_v62 = vor.u32 %v1527_v56, %v441_v47  ;;  %v1572_v56 = vshrl.u32 %v8451_v0, 16 }
  0xe9   : > { %6746 = vmatmul.mubr.bf16.gmra.mrb[28].mxu0 %v1228_v48  ;;  %v442_v48 = vsel %vm390_vm3, %v437_v46, %v441_v47  ;;  %v481_v47 = vrot.slane %v1575_v10, 1 }
  0xea   : > { %6749 = vmatprep.mubr.msk.bf16.mxu0 %vm8226_vm0, %v8225_v16  ;;  %6534 = vmatmul.mubr.bf16.gmra.mrb[20].mxu1 %v442_v48 }
  0xeb   : > { %6537 = vmatprep.mubr.msk.bf16.mxu1 %vm8226_vm0, %v8225_v16 }
  0xf1   : > { %6750 = vmatmul.mubr.bf16.gmra.mrb[32].mxu0 %v1230_v1  ;;  %v450_v1 = vsel %vm390_vm3, %v445_v62, %v449_v63  ;;  %v489_v62 = vrot.slane %v1584_v57, 1 }
  0xf2   : > { %6753 = vmatprep.mubr.msk.bf16.mxu0 %vm8226_vm0, %v8225_v16  ;;  %6538 = vmatmul.mubr.bf16.gmra.mrb[24].mxu1 %v450_v1  ;;  %v8076_v1 = vld [vmem:[%s10024_s1 + $0x20] sm:$0xff]  }
  0xf3   : > { %6541 = vmatprep.mubr.msk.bf16.mxu1 %vm8226_vm0, %v8225_v16 }
  0xf9   : > { %6754 = vmatmul.mubr.bf16.gmra.mrb[36].mxu0 %v1232_v11  ;;  %v1515_v11 = vor.u32 %v1514_v5, %v1511_v4  ;;  %v1556_v4 = vrot.slane %v1554_v32, 2  ;;  %v1559_v5 = vrot.slane %v1557_v21, 3 }
  0xfa   : > { %6757 = vmatprep.mubr.msk.bf16.mxu0 %vm8226_vm0, %v8225_v16  ;;  %6542 = vmatmul.mubr.bf16.gmra.mrb[28].mxu1 %v458_v14  ;;  %v8079_v14 = vld [vmem:[%s10024_s1 + $0x30] sm:$0xff]  }
  0xfb   : > { %v1516_v15 = vsel %vm1481_vm4, %v1506_v59, %v1515_v11  ;;  %6545 = vmatprep.mubr.msk.bf16.mxu1 %vm8226_vm0, %v8225_v16  ;;  %v8075_v59 = vld [vmem:[%s10024_s1 + $0x18] sm:$0xff]  }
 0x101   : > { %6758 = vmatmul.mubr.bf16.gmra.mrb[40].mxu0 %v1234_v18  ;;  %v1523_v18 = vrot.slane %v1521_v29, 3  ;;  %v1532_v29 = vrot.slane %v1530_v43, 3  ;;  %v1563_v43 = vshrl.u32 %v8445_v61, 16 }
 0x102   : > { %6761 = vmatprep.mubr.msk.bf16.mxu0 %vm8226_vm0, %v8225_v16 }
 0x103   : > { %v1524_v22 = vor.u32 %v1523_v18, %v1520_v17  ;;  %v1533_v49 = vor.u32 %v1532_v29, %v1529_v28  ;;  %v477_v46 = vor.u32 %v1563_v43, %v473_v37  ;;  %v1565_v17 = vrot.slane %v1563_v43, 2  ;;  %v8080_v18 = vld [vmem:[%s10024_s1 + $0x38] sm:$0xff]  }
 0x104   : > { %v1590_v28 = vshrl.u32 %v8597_v19, 16  ;;  %v1593_v29 = vshll.u32 %v8597_v19, 16 }
 0x105   : > { %v1525_v35 = vsel %vm1481_vm4, %v1515_v11, %v1524_v22  ;;  %v1534_v41 = vsel %vm1481_vm4, %v1524_v22, %v1533_v49  ;;  %v482_v48 = vsel %vm390_vm3, %v477_v46, %v481_v47  ;;  %v1560_v11 = vor.u32 %v1559_v5, %v1556_v4  ;;  %v8072_v4 = vld [vmem:[%s10024_s1 + $0x1a8] sm:$0xff]  }
 0x106   : > { %v1577_v22 = vrot.slane %v1575_v10, 3  ;;  %v1595_v33 = vrot.slane %v1593_v29, 3  ;;  %v8940_v29 = vld [vmem:[#allocation2 + $0x10] sm:$0xf0] }
 0x109   : > { %6762 = vmatmul.mubr.bf16.gmra.mrb[44].mxu0 %v1236_v26  ;;  %v465_v26 = vrot.slane %v1557_v21, 1  ;;  %v1574_v21 = vrot.slane %v1572_v56, 2 }
 0x10a   : > { %6765 = vmatprep.mubr.msk.bf16.mxu0 %vm8226_vm0, %v8225_v16 }
 0x10b   : > { %v466_v27 = vsel %vm390_vm3, %v461_v25, %v465_v26 }
 0x10c   : > { %6546 = vmatmul.mubr.bf16.gmra.mrb[32].mxu1 %v466_v27  ;;  %v1586_v27 = vrot.slane %v1584_v57, 3  ;;  %v8068_v57 = vld [vmem:[%s10024_s1 + $0x190] sm:$0xff]  }
 0x10d   : > { %6549 = vmatprep.mubr.msk.bf16.mxu1 %vm8226_vm0, %v8225_v16 }
 0x111   : > { %6766 = vmatmul.mubr.bf16.gmra.mrb[48].mxu0 %v1238_v36  ;;  %v469_v36 = vor.u32 %v1554_v32, %v465_v26  ;;  %v1592_v32 = vrot.slane %v1590_v28, 2 }
 0x112   : > { %6785 = vmatprep.mubr.msk.bf16.mxu0 %vm8226_vm0, %v8225_v16 }
 0x113   : > { %v474_v38 = vsel %vm390_vm3, %v469_v36, %v473_v37  ;;  %v1596_v36 = vor.u32 %v1595_v33, %v1592_v32  ;;  %v8949_v32 = vld [vmem:[%s10024_s1 + $0x230] sm:$0xff]   ;;  %v2149_v33 = vrot.slane %v8940_v29, 4 }
 0x114   : > { %6550 = vmatmul.mubr.bf16.gmra.mrb[36].mxu1 %v474_v38 }
 0x115   : > { %6553 = vmatprep.mubr.msk.bf16.mxu1 %vm8226_vm0, %v8225_v16 }
 0x119   : > { %6786 = vmatmul.mubr.bf16.vlgmr.msra.gmra.mrb[0].mxu0 %v1498_v51  ;;  %v8074_v51 = vld [vmem:[%s10024_s1 + $0x10] sm:$0xff]  }
 0x11a   : > { %6838 = vmatpush3.bf16.msra.mxu0 %v8050_v45  ;;  %6789 = vmatprep.mubr.msk.bf16.mxu0 %vm8226_vm0, %v8225_v16  ;;  %v1543_v45 = vsel %vm1481_vm4, %v1533_v49, %v1542_v44  ;;  %v8171_v49 = vld [vmem:[#allocation2 + $0x10] sm:$0xff] }
 0x11b   : > { %6839 = vmatprep.subr.bf16.mxu0 %v8225_v16  ;;  %6570 = vmatpush3.bf16.msra.mxu1 %v8074_v51  ;;  %v8066_v51 = vld [vmem:[%s10024_s1 + $0x180] sm:$0xff]  }
 0x11c   : > { %6554 = vmatmul.mubr.bf16.gmra.mrb[40].mxu1 %v482_v48  ;;  %6571 = vmatprep.subr.bf16.mxu1 %v8225_v16 }
 0x11d   : > { %6557 = vmatprep.mubr.msk.bf16.mxu1 %vm8226_vm0, %v8225_v16 }
 0x11e   : > { %6840 = vmatpush3.bf16.msra.mxu0 %v8051_v60  ;;  %v485_v60 = vor.u32 %v1572_v56, %v481_v47  ;;  %v1853_v47 = vrot.slane %v8171_v49, 3 }
 0x11f   : > { %6841 = vmatprep.subr.bf16.mxu0 %v8225_v16  ;;  %6572 = vmatpush3.bf16.msra.mxu1 %v8075_v59  ;;  %v8175_v59 = vld [vmem:[#allocation2 + $0x30] sm:$0xff] }
 0x120   : > { %6573 = vmatprep.subr.bf16.mxu1 %v8225_v16  ;;  %v490_v63 = vsel %vm390_vm3, %v485_v60, %v489_v62  ;;  %v1856_v56 = vsel %vm1851_vm5, %v1853_v47, %v1855_v53  ;;  %v8069_v60 = vld [vmem:[%s10024_s1 + $0x198] sm:$0xff]   ;;  %v1861_v9 = vrot.slane %v8175_v59, 3 }
 0x121   : > { %6790 = vmatmul.mubr.bf16.gmra.mrb[4].mxu0 %v1507_v2  ;;  %v1552_v2 = vsel %vm1481_vm4, %v1542_v44, %v1551_v55  ;;  %v1831_v44 = vld [vmem:[#allocation2 + $0x8] sm:$0xf8] }
 0x122   : > { %6793 = vmatprep.mubr.msk.bf16.mxu0 %vm8226_vm0, %v8225_v16  ;;  %6842 = vmatpush3.bf16.msra.mxu0 %v8052_v6  ;;  %v1581_v6 = vshrl.u32 %v8457_v3, 16  ;;  %v1852_v46 = vrot.slane %v1831_v44, 3 }
 0x123   : > { %6843 = vmatprep.subr.bf16.mxu0 %v8225_v16  ;;  %6574 = vmatpush3.bf16.msra.mxu1 %v8076_v1  ;;  %v8176_v1 = vld [vmem:[#allocation2 + $0x38] sm:$0xff] }
 0x124   : > { %6558 = vmatmul.mubr.bf16.gmra.mrb[44].mxu1 %v490_v63  ;;  %6575 = vmatprep.subr.bf16.mxu1 %v8225_v16  ;;  %v1583_v26 = vrot.slane %v1581_v6, 2  ;;  %v1854_v48 = vsel %vm1851_vm5, %v1852_v46, %v1853_v47  ;;  %v8070_v63 = vld [vmem:[%s10024_s1 + $0x1a0] sm:$0xff]   ;;  %v8084_v46 = vld [vmem:[%s10024_s1 + $0x1d0] sm:$0xff]   ;;  %v8992_v47 = vld [vmem:[#allocation2 + $0x38] sm:$0xff] }
 0x125   : > { %6561 = vmatprep.mubr.msk.bf16.mxu1 %vm8226_vm0, %v8225_v16 }
 0x126   : > { %6844 = vmatpush3.bf16.msra.mxu0 %v8053_v12  ;;  %v493_v12 = vor.u32 %v1581_v6, %v489_v62  ;;  %v8077_v6 = vld [vmem:[%s10024_s1 + $0x1b0] sm:$0xff]  }
 0x127   : > { %6845 = vmatprep.subr.bf16.mxu0 %v8225_v16  ;;  %6576 = vmatpush3.bf16.msra.mxu1 %v8078_v8  ;;  %v8177_v8 = vld [vmem:[#allocation2 + $0x40] sm:$0xff] }
 0x128   : > { %6577 = vmatprep.subr.bf16.mxu1 %v8225_v16  ;;  %v498_v13 = vsel %vm390_vm3, %v493_v12, %v497_v24  ;;  %v1863_v24 = vrot.slane %v8176_v1, 3 }
 0x129   : > { %6794 = vmatmul.mubr.bf16.gmra.mrb[8].mxu0 %v1516_v15  ;;  %v1561_v15 = vsel %vm1481_vm4, %v1551_v55, %v1560_v11  ;;  %v1857_v55 = vrot.slane %v8173_v52, 3 }
 0x12a   : > { %6797 = vmatprep.mubr.msk.bf16.mxu0 %vm8226_vm0, %v8225_v16  ;;  %6846 = vmatpush3.bf16.msra.mxu0 %v8054_v30  ;;  %v1569_v30 = vor.u32 %v1568_v7, %v1565_v17 }
 0x12b   : > { %6847 = vmatprep.subr.bf16.mxu0 %v8225_v16  ;;  %6578 = vmatpush3.bf16.msra.mxu1 %v8079_v14  ;;  %v1858_v62 = vsel %vm1851_vm5, %v1855_v53, %v1857_v55 }
 0x12c   : > { %6562 = vmatmul.mubr.bf16.gmra.mrb[48].mxu1 %v498_v13  ;;  %6579 = vmatprep.subr.bf16.mxu1 %v8225_v16  ;;  %v1570_v20 = vsel %vm1481_vm4, %v1560_v11, %v1569_v30  ;;  %v8081_v11 = vld [vmem:[%s10024_s1 + $0x1b8] sm:$0xff]   ;;  %v1864_v13 = vsel %vm1851_vm5, %v1861_v9, %v1863_v24 }
 0x12d   : > { %6581 = vmatprep.mubr.msk.bf16.mxu1 %vm8226_vm0, %v8225_v16 }
 0x12e   : > { %6848 = vmatpush3.bf16.msra.mxu0 %v8056_v23  ;;  %v1578_v23 = vor.u32 %v1577_v22, %v1574_v21  ;;  %v8891_v22 = vld [vmem:[%s10024_s1 + $0x200] sm:$0xff]  }
 0x12f   : > { %6849 = vmatprep.subr.bf16.mxu0 %v8225_v16  ;;  %6580 = vmatpush3.bf16.msra.mxu1 %v8080_v18  ;;  %v1869_v18 = vrot.slane %v8445_v61, 3 }
 0x130   : > { %7433 = vmatprep.subr.bf16.mxu1 %v8225_v16  ;;  %v1579_v25 = vsel %vm1481_vm4, %v1569_v30, %v1578_v23 }
 0x131   : > { %6798 = vmatmul.mubr.bf16.gmra.mrb[12].mxu0 %v1525_v35  ;;  %v8170_v35 = vld [vmem:[#allocation2 + $0x8] sm:$0xff] }
 0x132   : > { %6801 = vmatprep.mubr.msk.bf16.mxu0 %vm8226_vm0, %v8225_v16  ;;  %6850 = vmatpush3.bf16.msra.mxu0 %v8061_v31 }
 0x133   : > { %6851 = vmatprep.subr.bf16.mxu0 %v8225_v16 }
 0x134   : > { %6582 = vmatmul.mubr.bf16.vlgmr.msra.gmra.mrb[0].mxu1 %v8564_v50  ;;  %v1587_v50 = vor.u32 %v1586_v27, %v1583_v26  ;;  %v8918_v26 = vld [vmem:[%s10024_s1 + $0x218] sm:$0xff]  }
 0x135   : > { %6585 = vmatprep.mubr.msk.bf16.mxu1 %vm8226_vm0, %v8225_v16  ;;  %7441 = vmatpush3.bf16.msra.mxu1 %v8891_v22 }
 0x136   : > { %6852 = vmatpush3.bf16.msra.mxu0 %v8065_v34  ;;  %v1588_v31 = vsel %vm1481_vm4, %v1578_v23, %v1587_v50  ;;  %v8788_v34 = vld [vmem:[#allocation2 + $0x70] sm:$0x7]  ;;  %v1597_v39 = vsel %vm1481_vm4, %v1587_v50, %v1596_v36  ;;  %v8900_v23 = vld [vmem:[%s10024_s1 + $0x208] sm:$0xff]   ;;  %7434 = vmatprep.subr.bf16.mxu1 %v8225_v16 }
 0x137   : > { %6905 = vmatprep.subr.bf16.mxu0 %v8225_v16  ;;  %v1599_v37 = vshrl.u32 %v8788_v34, 16  ;;  %v1602_v38 = vshll.u32 %v8788_v34, 16  ;;  %v8936_v50 = vld [vmem:[%s10024_s1 + $0x228] sm:$0xff]  }
 0x139   : > { %6802 = vmatmul.mubr.bf16.gmra.mrb[16].mxu0 %v1534_v41  ;;  %v1601_v41 = vrot.slane %v1599_v37, 2  ;;  %v1604_v42 = vrot.slane %v1602_v38, 3  ;;  %7442 = vmatpush3.bf16.msra.mxu1 %v8900_v23  ;;  %v8082_v37 = vld [vmem:[%s10024_s1 + $0x1c0] sm:$0xff]  }
 0x13a   : > { %6805 = vmatprep.mubr.msk.bf16.mxu0 %vm8226_vm0, %v8225_v16  ;;  %7435 = vmatprep.subr.bf16.mxu1 %v8225_v16  ;;  %v8966_v38 = vld [vmem:[#allocation2 + $0x20] sm:$0xff] }
 0x13b   : > { %v1605_v43 = vor.u32 %v1604_v42, %v1601_v41  ;;  %v8970_v41 = vld [vmem:[#allocation2 + $0x30] sm:$0xff] }
 0x13c   : > { %6586 = vmatmul.mubr.bf16.gmra.mrb[4].mxu1 %v8170_v35  ;;  %v1877_v35 = vrot.slane %v8788_v34, 3  ;;  %v8959_v34 = vld [vmem:[%s10024_s1 + $0x238] sm:$0xff]  }
 0x13d   : > { %6589 = vmatprep.mubr.msk.bf16.mxu1 %vm8226_vm0, %v8225_v16  ;;  %v1606_v10 = vsel %vm1481_vm4, %v1596_v36, %v1605_v43  ;;  %v2152_v43 = vrot.slane %v8966_v38, 4 }
 0x141   : > { %6806 = vmatmul.mubr.bf16.gmra.mrb[20].mxu0 %v1543_v45  ;;  %v8174_v45 = vld [vmem:[#allocation2 + $0x28] sm:$0xff] }
 0x142   : > { %6809 = vmatprep.mubr.msk.bf16.mxu0 %vm8226_vm0, %v8225_v16 }
 0x144   : > { %6590 = vmatmul.mubr.bf16.gmra.mrb[8].mxu1 %v8171_v49 }
 0x145   : > { %6593 = vmatprep.mubr.msk.bf16.mxu1 %vm8226_vm0, %v8225_v16 }
 0x149   : > { %6810 = vmatmul.mubr.bf16.gmra.mrb[24].mxu0 %v1552_v2  ;;  %v1859_v2 = vrot.slane %v8174_v45, 3 }
 0x14a   : > { %6813 = vmatprep.mubr.msk.bf16.mxu0 %vm8226_vm0, %v8225_v16 }
 0x14b   : > { %v1860_v5 = vsel %vm1851_vm5, %v1857_v55, %v1859_v2  ;;  %v1862_v12 = vsel %vm1851_vm5, %v1859_v2, %v1861_v9  ;;  %v2156_v55 = vrot.slane %v8970_v41, 4  ;;  %v9027_v2 = vld [vmem:[#allocation2 + $0x48] sm:$0xff] }
 0x14c   : > { %6594 = vmatmul.mubr.bf16.gmra.mrb[12].mxu1 %v8172_v40  ;;  %v2796_v40 = vrot.slane %v8970_v41, 5 }
 0x14d   : > { %6597 = vmatprep.mubr.msk.bf16.mxu1 %vm8226_vm0, %v8225_v16 }
 0x151   : > { %6814 = vmatmul.mubr.bf16.gmra.mrb[28].mxu0 %v1561_v15  ;;  %v8178_v15 = vld [vmem:[#allocation2 + $0x48] sm:$0xff] }
 0x152   : > { %6817 = vmatprep.mubr.msk.bf16.mxu0 %vm8226_vm0, %v8225_v16  ;;  %v1867_v17 = vrot.slane %v8178_v15, 3 }
 0x154   : > { %6598 = vmatmul.mubr.bf16.gmra.mrb[16].mxu1 %v8173_v52  ;;  %v1870_v30 = vsel %vm1851_vm5, %v1867_v17, %v1869_v18 }
 0x155   : > { %6601 = vmatprep.mubr.msk.bf16.mxu1 %vm8226_vm0, %v8225_v16 }
 0x159   : > { %6818 = vmatmul.mubr.bf16.gmra.mrb[32].mxu0 %v1570_v20  ;;  %v1871_v20 = vrot.slane %v8451_v0, 3 }
 0x15a   : > { %6821 = vmatprep.mubr.msk.bf16.mxu0 %vm8226_vm0, %v8225_v16 }
 0x15b   : > { %v1872_v21 = vsel %vm1851_vm5, %v1869_v18, %v1871_v20 }
 0x15c   : > { %6602 = vmatmul.mubr.bf16.gmra.mrb[20].mxu1 %v8174_v45  ;;  %v8085_v45 = vld [vmem:[%s10024_s1 + $0x1d8] sm:$0xff]  }
 0x15d   : > { %6605 = vmatprep.mubr.msk.bf16.mxu1 %vm8226_vm0, %v8225_v16 }
 0x161   : > { %6822 = vmatmul.mubr.bf16.gmra.mrb[36].mxu0 %v1579_v25  ;;  %v8912_v25 = vld [vmem:[%s10024_s1 + $0x210] sm:$0xff]  }
 0x162   : > { %6825 = vmatprep.mubr.msk.bf16.mxu0 %vm8226_vm0, %v8225_v16  ;;  %7443 = vmatpush3.bf16.msra.mxu1 %v8912_v25 }
 0x163   : > { %7436 = vmatprep.subr.bf16.mxu1 %v8225_v16 }
 0x164   : > { %6606 = vmatmul.mubr.bf16.gmra.mrb[24].mxu1 %v8175_v59 }
 0x165   : > { %6609 = vmatprep.mubr.msk.bf16.mxu1 %vm8226_vm0, %v8225_v16 }
 0x166   : > { %7444 = vmatpush3.bf16.msra.mxu1 %v8918_v26 }
 0x167   : > { %7437 = vmatprep.subr.bf16.mxu1 %v8225_v16 }
 0x169   : > { %6826 = vmatmul.mubr.bf16.gmra.mrb[40].mxu0 %v1588_v31  ;;  %v8942_v31 = vld [vmem:[#allocation2 + $0x18] sm:$0xff] }
 0x16a   : > { %6829 = vmatprep.mubr.msk.bf16.mxu0 %vm8226_vm0, %v8225_v16  ;;  %v2150_v49 = vrot.slane %v8942_v31, 4 }
 0x16c   : > { %6610 = vmatmul.mubr.bf16.gmra.mrb[28].mxu1 %v8176_v1  ;;  %v2151_v36 = vsel %vm2148_vm6, %v2149_v33, %v2150_v49  ;;  %v2153_v44 = vsel %vm2148_vm6, %v2150_v49, %v2152_v43  ;;  %v8088_v1 = vld [vmem:[%s10024_s1 + $0x1f0] sm:$0xff]  }
 0x16d   : > { %6613 = vmatprep.mubr.msk.bf16.mxu1 %vm8226_vm0, %v8225_v16  ;;  %v9083_v49 = vld [vmem:[#allocation2 + $0x70] sm:$0xff] }
 0x171   : > { %6830 = vmatmul.mubr.bf16.gmra.mrb[44].mxu0 %v1597_v39  ;;  %v8968_v39 = vld [vmem:[#allocation2 + $0x28] sm:$0xff] }
 0x172   : > { %6833 = vmatprep.mubr.msk.bf16.mxu0 %vm8226_vm0, %v8225_v16  ;;  %v2794_v42 = vrot.slane %v8968_v39, 5 }
 0x174   : > { %6614 = vmatmul.mubr.bf16.gmra.mrb[32].mxu1 %v8177_v8  ;;  %v2797_v52 = vsel %vm2788_vm7, %v2794_v42, %v2796_v40 }
 0x175   : > { %6617 = vmatprep.mubr.msk.bf16.mxu1 %vm8226_vm0, %v8225_v16 }
 0x179   : > { %6834 = vmatmul.mubr.bf16.gmra.mrb[48].mxu0 %v1606_v10  ;;  %v8083_v10 = vld [vmem:[%s10024_s1 + $0x1c8] sm:$0xff]  }
 0x17a   : > { %6853 = vmatprep.mubr.msk.bf16.mxu0 %vm8226_vm0, %v8225_v16 }
 0x17c   : > { %6618 = vmatmul.mubr.bf16.gmra.mrb[36].mxu1 %v8439_v58  ;;  %v1865_v58 = vrot.slane %v8177_v8, 3 }
 0x17d   : > { %6621 = vmatprep.mubr.msk.bf16.mxu1 %vm8226_vm0, %v8225_v16 }
 0x17e   : > { %v1866_v14 = vsel %vm1851_vm5, %v1863_v24, %v1865_v58  ;;  %v1868_v7 = vsel %vm1851_vm5, %v1865_v58, %v1867_v17  ;;  %v2162_v17 = vrot.slane %v9027_v2, 4 }
 0x181   : > { %6854 = vmatmul.mubr.bf16.vlgmr.msra.gmra.mrb[0].mxu0 %v1854_v48  ;;  %v2798_v48 = vrot.slane %v8992_v47, 5 }
 0x182   : > { %6906 = vmatpush3.bf16.msra.mxu0 %v8066_v51  ;;  %6857 = vmatprep.mubr.msk.bf16.mxu0 %vm8226_vm0, %v8225_v16  ;;  %v2154_v51 = vrot.slane %v8968_v39, 4 }
 0x183   : > { %6907 = vmatprep.subr.bf16.mxu0 %v8225_v16  ;;  %v2799_v53 = vsel %vm2788_vm7, %v2796_v40, %v2798_v48 }
 0x184   : > { %6622 = vmatmul.mubr.bf16.gmra.mrb[40].mxu1 %v8445_v61  ;;  %v1873_v61 = vrot.slane %v8457_v3, 3 }
 0x185   : > { %6625 = vmatprep.mubr.msk.bf16.mxu1 %vm8226_vm0, %v8225_v16 }
 0x186   : > { %6908 = vmatpush3.bf16.msra.mxu0 %v8067_v54  ;;  %v2155_v54 = vsel %vm2148_vm6, %v2152_v43, %v2154_v51 }
 0x187   : > { %6909 = vmatprep.subr.bf16.mxu0 %v8225_v16 }
 0x189   : > { %6858 = vmatmul.mubr.bf16.gmra.mrb[4].mxu0 %v1856_v56  ;;  %v8086_v56 = vld [vmem:[%s10024_s1 + $0x1e0] sm:$0xff]  }
 0x18a   : > { %6861 = vmatprep.mubr.msk.bf16.mxu0 %vm8226_vm0, %v8225_v16  ;;  %6910 = vmatpush3.bf16.msra.mxu0 %v8068_v57  ;;  %v9009_v57 = vld [vmem:[#allocation2 + $0x40] sm:$0xff] }
 0x18b   : > { %6911 = vmatprep.subr.bf16.mxu0 %v8225_v16  ;;  %v2800_v59 = vrot.slane %v9009_v57, 5  ;;  %v2160_v24 = vrot.slane %v9009_v57, 4 }
 0x18c   : > { %6626 = vmatmul.mubr.bf16.gmra.mrb[44].mxu1 %v8451_v0  ;;  %v1874_v0 = vsel %vm1851_vm5, %v1871_v20, %v1873_v61 }
 0x18d   : > { %6629 = vmatprep.mubr.msk.bf16.mxu1 %vm8226_vm0, %v8225_v16  ;;  %v2163_v18 = vsel %vm2148_vm6, %v2160_v24, %v2162_v17 }
 0x18e   : > { %6912 = vmatpush3.bf16.msra.mxu0 %v8069_v60  ;;  %v8087_v60 = vld [vmem:[%s10024_s1 + $0x1e8] sm:$0xff]  }
 0x18f   : > { %6913 = vmatprep.subr.bf16.mxu0 %v8225_v16 }
 0x191   : > { %6862 = vmatmul.mubr.bf16.gmra.mrb[8].mxu0 %v1858_v62  ;;  %v2801_v62 = vsel %vm2788_vm7, %v2798_v48, %v2800_v59  ;;  %v9097_v48 = vld [vmem:[#allocation2 + $0x78] sm:$0x1f] }
 0x192   : > { %6865 = vmatprep.mubr.msk.bf16.mxu0 %vm8226_vm0, %v8225_v16  ;;  %6914 = vmatpush3.bf16.msra.mxu0 %v8070_v63  ;;  %v2157_v63 = vsel %vm2148_vm6, %v2154_v51, %v2156_v55  ;;  %v2814_v51 = vrot.slane %v9097_v48, 5 }
 0x193   : > { %6915 = vmatprep.subr.bf16.mxu0 %v8225_v16 }
 0x194   : > { %6630 = vmatmul.mubr.bf16.gmra.mrb[48].mxu1 %v8457_v3  ;;  %v1875_v3 = vrot.slane %v8597_v19, 3  ;;  %v8927_v19 = vld [vmem:[%s10024_s1 + $0x220] sm:$0xff]  }
 0x195   : > { %7069 = vmatprep.mubr.msk.bf16.mxu1 %vm8226_vm0, %v8225_v16  ;;  %7445 = vmatpush3.bf16.msra.mxu1 %v8927_v19 }
 0x196   : > { %6916 = vmatpush3.bf16.msra.mxu0 %v8072_v4  ;;  %v1876_v27 = vsel %vm1851_vm5, %v1873_v61, %v1875_v3  ;;  %7438 = vmatprep.subr.bf16.mxu1 %v8225_v16  ;;  %v1878_v28 = vsel %vm1851_vm5, %v1875_v3, %v1877_v35  ;;  %v2802_v4 = vrot.slane %v9027_v2, 5  ;;  %v9073_v3 = vld [vmem:[#allocation2 + $0x68] sm:$0xff] }
 0x197   : > { %6917 = vmatprep.subr.bf16.mxu0 %v8225_v16 }
 0x198   : > { %v2803_v8 = vsel %vm2788_vm7, %v2800_v59, %v2802_v4  ;;  %v8227_v59 = vmov 0  }
 0x199   : > { %6866 = vmatmul.mubr.bf16.gmra.mrb[12].mxu0 %v1860_v5  ;;  %7446 = vmatpush3.bf16.msra.mxu1 %v8936_v50  ;;  %v2158_v5 = vrot.slane %v8992_v47, 4 }
 0x19a   : > { %6869 = vmatprep.mubr.msk.bf16.mxu0 %vm8226_vm0, %v8225_v16  ;;  %6918 = vmatpush3.bf16.msra.mxu0 %v8077_v6  ;;  %v8089_v6 = vld [vmem:[%s10024_s1 + $0x1f8] sm:$0xff]  }
 0x19b   : > { %6919 = vmatprep.subr.bf16.mxu0 %v8225_v16  ;;  %7439 = vmatprep.subr.bf16.mxu1 %v8225_v16  ;;  %v2159_v9 = vsel %vm2148_vm6, %v2156_v55, %v2158_v5  ;;  %v2161_v58 = vsel %vm2148_vm6, %v2158_v5, %v2160_v24  ;;  %v3068_v55 = vld [vmem:[%s8291_s8 + $0x10] sm:$0xff]  ;;  %v3069_v5 = vld [vmem:[%s8291_s8 + $0x18] sm:$0xff] }
 0x19c   : > { %8024 = vset.pattern.permute.xlu0 %v8227_v59  ;;  %8025 = vset.pattern.permute.xlu1 %v8227_v59  ;;  %v2437_v59 = vshrl.u32 %v8966_v38, 16 }
 0x19d   : > { %7447 = vmatpush3.bf16.msra.mxu1 %v8949_v32  ;;  %3104 = vperm.xlu1 %8025, %v3068_v55   ;;  %v2440_v55 = vshll.u32 %v8966_v38, 16 }
 0x19e   : > { %6920 = vmatpush3.bf16.msra.mxu0 %v8081_v11  ;;  %7440 = vmatprep.subr.bf16.mxu1 %v8225_v16  ;;  %v9042_v11 = vld [vmem:[#allocation2 + $0x50] sm:$0xff] }
 0x19f   : > { %6973 = vmatprep.subr.bf16.mxu0 %v8225_v16 }
 0x1a1   : > { %6870 = vmatmul.mubr.bf16.gmra.mrb[16].mxu0 %v1862_v12  ;;  %7448 = vmatpush3.bf16.msra.mxu1 %v8959_v34  ;;  %v2804_v12 = vrot.slane %v9042_v11, 5 }
 0x1a2   : > { %6873 = vmatprep.mubr.msk.bf16.mxu0 %vm8226_vm0, %v8225_v16  ;;  %3109 = vperm.xlu1 %8025, %v3069_v5  }
 0x1a4   : > { %7070 = vmatmul.mubr.bf16.vlgmr.msra.gmra.mrb[52].mxu1 %v2797_v52 }
 0x1a5   : > { %7073 = vmatprep.mubr.msk.bf16.mxu1 %vm8226_vm0, %v8225_v16 }
 0x1a9   : > { %6874 = vmatmul.mubr.bf16.gmra.mrb[20].mxu0 %v1864_v13  ;;  %v2805_v13 = vsel %vm2788_vm7, %v2802_v4, %v2804_v12  ;;  %v3067_v4 = vld [vmem:[%s8291_s8 + $0x8] sm:$0xff] }
 0x1aa   : > { %6877 = vmatprep.mubr.msk.bf16.mxu0 %vm8226_vm0, %v8225_v16 }
 0x1ac   : > { %7074 = vmatmul.mubr.bf16.gmra.mrb[56].mxu1 %v2799_v53 }
 0x1ad   : > { %7077 = vmatprep.mubr.msk.bf16.mxu1 %vm8226_vm0, %v8225_v16 }
 0x1b1   : > { %6878 = vmatmul.mubr.bf16.gmra.mrb[24].mxu0 %v1866_v14  ;;  %v9053_v14 = vld [vmem:[#allocation2 + $0x58] sm:$0xff] }
 0x1b2   : > { %6881 = vmatprep.mubr.msk.bf16.mxu0 %vm8226_vm0, %v8225_v16  ;;  %v2806_v15 = vrot.slane %v9053_v14, 5  ;;  %v2166_v35 = vrot.slane %v9053_v14, 4 }
 0x1b4   : > { %7078 = vmatmul.mubr.bf16.gmra.mrb[60].mxu1 %v2801_v62 }
 0x1b5   : > { %7081 = vmatprep.mubr.msk.bf16.mxu1 %vm8226_vm0, %v8225_v16 }
 0x1b9   : > { %6882 = vmatmul.mubr.bf16.gmra.mrb[28].mxu0 %v1868_v7  ;;  %v2807_v7 = vsel %vm2788_vm7, %v2804_v12, %v2806_v15  ;;  %v3070_v12 = vld [vmem:[%s8291_s8 + $0x20] sm:$0xff] }
 0x1ba   : > { %6885 = vmatprep.mubr.msk.bf16.mxu0 %vm8226_vm0, %v8225_v16 }
 0x1bc   : > { %7082 = vmatmul.mubr.bf16.gmra.mrb[64].mxu1 %v2803_v8  ;;  %v2172_v8 = vrot.slane %v9083_v49, 4 }
 0x1bd   : > { %7085 = vmatprep.mubr.msk.bf16.mxu1 %vm8226_vm0, %v8225_v16 }
 0x1c1   : > { %6886 = vmatmul.mubr.bf16.gmra.mrb[32].mxu0 %v1870_v30  ;;  %v9063_v30 = vld [vmem:[#allocation2 + $0x60] sm:$0xff] }
 0x1c2   : > { %6889 = vmatprep.mubr.msk.bf16.mxu0 %vm8226_vm0, %v8225_v16  ;;  %v2808_v20 = vrot.slane %v9063_v30, 5  ;;  %v2168_v40 = vrot.slane %v9063_v30, 4 }
 0x1c4   : > { %7086 = vmatmul.mubr.bf16.gmra.mrb[68].mxu1 %v2805_v13  ;;  %v2809_v61 = vsel %vm2788_vm7, %v2806_v15, %v2808_v20  ;;  %v3071_v13 = vld [vmem:[%s8291_s8 + $0x28] sm:$0xff] }
 0x1c5   : > { %7089 = vmatprep.mubr.msk.bf16.mxu1 %vm8226_vm0, %v8225_v16  ;;  %3119 = vperm.xlu1 %8025, %v3071_v13   ;;  %v3078_v13 = vld [vmem:[%s8291_s8 + $0x60] sm:$0xff] }
 0x1c9   : > { %6890 = vmatmul.mubr.bf16.gmra.mrb[36].mxu0 %v1872_v21  ;;  %v2164_v21 = vrot.slane %v9042_v11, 4 }
 0x1ca   : > { %6893 = vmatprep.mubr.msk.bf16.mxu0 %vm8226_vm0, %v8225_v16 }
 0x1cb   : > { %v2167_v33 = vsel %vm2148_vm6, %v2164_v21, %v2166_v35 }
 0x1cc   : > { %7090 = vmatmul.mubr.bf16.gmra.mrb[72].mxu1 %v2807_v7 }
 0x1cd   : > { %7093 = vmatprep.mubr.msk.bf16.mxu1 %vm8226_vm0, %v8225_v16 }
 0x1d1   : > { %6894 = vmatmul.mubr.bf16.gmra.mrb[40].mxu0 %v1874_v0  ;;  %v2165_v0 = vsel %vm2148_vm6, %v2162_v17, %v2164_v21  ;;  %v2116_v17 = vld [vmem:[#allocation2 + $0x78] sm:$0xf] }
 0x1d2   : > { %6897 = vmatprep.mubr.msk.bf16.mxu0 %vm8226_vm0, %v8225_v16  ;;  %v2174_v7 = vrot.slane %v2116_v17, 4 }
 0x1d4   : > { %7094 = vmatmul.mubr.bf16.gmra.mrb[76].mxu1 %v2809_v61  ;;  %v2420_v61 = vshrl.u32 %v8940_v29, 16 }
 0x1d5   : > { %7097 = vmatprep.mubr.msk.bf16.mxu1 %vm8226_vm0, %v8225_v16 }
 0x1d9   : > { %6898 = vmatmul.mubr.bf16.gmra.mrb[44].mxu0 %v1876_v27  ;;  %v2810_v27 = vrot.slane %v9073_v3, 5 }
 0x1da   : > { %6901 = vmatprep.mubr.msk.bf16.mxu0 %vm8226_vm0, %v8225_v16 }
 0x1e1   : > { %6902 = vmatmul.mubr.bf16.gmra.mrb[48].mxu0 %v1878_v28  ;;  %v2811_v28 = vsel %vm2788_vm7, %v2808_v20, %v2810_v27  ;;  %v3073_v20 = vld [vmem:[%s8291_s8 + $0x38] sm:$0xff] }
 0x1e2   : > { %6921 = vmatprep.mubr.msk.bf16.mxu0 %vm8226_vm0, %v8225_v16  ;;  %7098 = vmatmul.mubr.bf16.gmra.mrb[80].mxu1 %v2811_v28 }
 0x1e3   : > { %7101 = vmatprep.mubr.msk.bf16.mxu1 %vm8226_vm0, %v8225_v16  ;;  %3129 = vperm.xlu1 %8025, %v3073_v20  }
 0x1e9   : > { %6922 = vmatmul.mubr.bf16.vlgmr.msra.gmra.mrb[0].mxu0 %v2151_v36  ;;  %v2812_v36 = vrot.slane %v9083_v49, 5 }
 0x1ea   : > { %6974 = vmatpush3.bf16.msra.mxu0 %v8082_v37  ;;  %6925 = vmatprep.mubr.msk.bf16.mxu0 %vm8226_vm0, %v8225_v16 }
 0x1eb   : > { %6975 = vmatprep.subr.bf16.mxu0 %v8225_v16  ;;  %v2813_v43 = vsel %vm2788_vm7, %v2810_v27, %v2812_v36  ;;  %v2428_v27 = vshrl.u32 %v8942_v31, 16 }
 0x1ec   : > { %7102 = vmatmul.mubr.bf16.gmra.mrb[84].mxu1 %v2813_v43  ;;  %v2422_v43 = vrot.slane %v2420_v61, 4 }
 0x1ed   : > { %7105 = vmatprep.mubr.msk.bf16.mxu1 %vm8226_vm0, %v8225_v16 }
 0x1ee   : > { %6976 = vmatpush3.bf16.msra.mxu0 %v8083_v10 }
 0x1ef   : > { %6977 = vmatprep.subr.bf16.mxu0 %v8225_v16 }
 0x1f1   : > { %6926 = vmatmul.mubr.bf16.gmra.mrb[4].mxu0 %v2153_v44 }
 0x1f2   : > { %6929 = vmatprep.mubr.msk.bf16.mxu0 %vm8226_vm0, %v8225_v16  ;;  %6978 = vmatpush3.bf16.msra.mxu0 %v8084_v46  ;;  %v2169_v46 = vsel %vm2148_vm6, %v2166_v35, %v2168_v40  ;;  %v2431_v35 = vshll.u32 %v8942_v31, 16 }
 0x1f3   : > { %6979 = vmatprep.subr.bf16.mxu0 %v8225_v16 }
 0x1f6   : > { %6980 = vmatpush3.bf16.msra.mxu0 %v8085_v45  ;;  %v3066_v45 = vld [vmem:[%s8291_s8] sm:$0xff] }
 0x1f7   : > { %6981 = vmatprep.subr.bf16.mxu0 %v8225_v16  ;;  %3094 = vperm.xlu0 %8024, %v3066_v45  }
 0x1f9   : > { %6930 = vmatmul.mubr.bf16.gmra.mrb[8].mxu0 %v2155_v54  ;;  %v2170_v54 = vrot.slane %v9073_v3, 4 }
 0x1fa   : > { %6933 = vmatprep.mubr.msk.bf16.mxu0 %vm8226_vm0, %v8225_v16  ;;  %6982 = vmatpush3.bf16.msra.mxu0 %v8086_v56  ;;  %v2815_v56 = vsel %vm2788_vm7, %v2812_v36, %v2814_v51  ;;  %v3075_v51 = vld [vmem:[%s8291_s8 + $0x48] sm:$0xff] }
 0x1fb   : > { %6983 = vmatprep.subr.bf16.mxu0 %v8225_v16  ;;  %7106 = vmatmul.mubr.bf16.gmra.mrb[88].mxu1 %v2815_v56  ;;  %v2173_v15 = vsel %vm2148_vm6, %v2170_v54, %v2172_v8 }
 0x1fc   : > { %3099 = vperm.xlu0 %8024, %v3067_v4   ;;  %3139 = vperm.xlu1 %8025, %v3075_v51   ;;  %v3077_v4 = vld [vmem:[%s8291_s8 + $0x58] sm:$0xff] }
 0x1fe   : > { %6984 = vmatpush3.bf16.msra.mxu0 %v8087_v60 }
 0x1ff   : > { %6985 = vmatprep.subr.bf16.mxu0 %v8225_v16 }
 0x200   : > { %3114 = vperm.xlu0 %8024, %v3070_v12   ;;  %v2442_v12 = vrot.slane %v2440_v55, 5  ;;  %3149 = vperm.xlu1 %8025, %v3077_v4   ;;  %v3087_v4 = vld [vmem:[%s8291_s8 + $0xa8] sm:$0xff] }
 0x201   : > { %6934 = vmatmul.mubr.bf16.gmra.mrb[12].mxu0 %v2157_v63 }
 0x202   : > { %6937 = vmatprep.mubr.msk.bf16.mxu0 %vm8226_vm0, %v8225_v16  ;;  %6986 = vmatpush3.bf16.msra.mxu0 %v8088_v1  ;;  %v2171_v1 = vsel %vm2148_vm6, %v2168_v40, %v2170_v54  ;;  %v2175_v40 = vsel %vm2148_vm6, %v2172_v8, %v2174_v7  ;;  %v2446_v7 = vshrl.u32 %v8968_v39, 16 }
 0x203   : > { %6987 = vmatprep.subr.bf16.mxu0 %v8225_v16 }
 0x206   : > { %6988 = vmatpush3.bf16.msra.mxu0 %v8089_v6 }
 0x207   : > { %7041 = vmatprep.subr.bf16.mxu0 %v8225_v16  ;;  %v9086_v37 = vpop.f32.mrb[0].mxu1 }
 0x208   : > { %v6583_v10 = vpop.f32.mrb[1].mxu1 }
 0x209   : > { %6938 = vmatmul.mubr.bf16.gmra.mrb[16].mxu0 %v2159_v9  ;;  %v9092_v52 = vpop.f32.mrb[2].mxu1 }
 0x20a   : > { %6941 = vmatprep.mubr.msk.bf16.mxu0 %vm8226_vm0, %v8225_v16  ;;  %v6584_v44 = vpop.f32.mrb[3].mxu1 }
 0x20b   : > { %v2430_v44 = vrot.slane %v2428_v27, 4  ;;  %v3080_v27 = vld [vmem:[%s8291_s8 + $0x70] sm:$0xff] }
 0x20f   : > { %v9101_v53 = vpop.f32.mrb[4].mxu1 }
 0x210   : > { %v6587_v60 = vpop.f32.mrb[5].mxu1 }
 0x211   : > { %6942 = vmatmul.mubr.bf16.gmra.mrb[20].mxu0 %v2161_v58  ;;  %v9108_v62 = vpop.f32.mrb[6].mxu1 }
 0x212   : > { %6945 = vmatprep.mubr.msk.bf16.mxu0 %vm8226_vm0, %v8225_v16  ;;  %v6588_v63 = vpop.f32.mrb[7].mxu1 }
 0x213   : > { %v3076_v63 = vld [vmem:[%s8291_s8 + $0x50] sm:$0xff] }
 0x217   : > { %v9113_v6 = vpop.f32.mrb[8].mxu1 }
 0x218   : > { %10037 = vst [vmem:[#allocation7_spill] sm:$0xff] %v9113_v6  ;;  %v6591_v9 = vpop.f32.mrb[9].mxu1 }
 0x219   : > { %6946 = vmatmul.mubr.bf16.gmra.mrb[24].mxu0 %v2163_v18  ;;  %v9119_v24 = vpop.f32.mrb[10].mxu1  ;;  %v3072_v18 = vld [vmem:[%s8291_s8 + $0x30] sm:$0xff]  ;;  %v2439_v9 = vrot.slane %v2437_v59, 4  ;;  %v3085_v59 = vld [vmem:[%s8291_s8 + $0x98] sm:$0xff] }
 0x21a   : > { %6949 = vmatprep.mubr.msk.bf16.mxu0 %vm8226_vm0, %v8225_v16  ;;  %10038 = vst [vmem:[#allocation8_spill] sm:$0xff] %v9119_v24  ;;  %v6592_v58 = vpop.f32.mrb[11].mxu1  ;;  %3124 = vperm.xlu0 %8024, %v3072_v18   ;;  %v2449_v18 = vshll.u32 %v8968_v39, 16 }
 0x21b   : > { %v2443_v17 = vor.u32 %v2442_v12, %v2439_v9  ;;  %v2467_v9 = vshll.u32 %v8992_v47, 16 }
 0x21f   : > { %v9125_v21 = vpop.f32.mrb[12].mxu1 }
 0x220   : > { %v6595_v28 = vpop.f32.mrb[13].mxu1 }
 0x221   : > { %6950 = vmatmul.mubr.bf16.gmra.mrb[28].mxu0 %v2165_v0  ;;  %v2423_v0 = vshll.u32 %v8940_v29, 16  ;;  %v3074_v29 = vld [vmem:[%s8291_s8 + $0x40] sm:$0xff]  ;;  %v2448_v28 = vrot.slane %v2446_v7, 4 }
 0x222   : > { %6953 = vmatprep.mubr.msk.bf16.mxu0 %vm8226_vm0, %v8225_v16  ;;  %3134 = vperm.xlu0 %8024, %v3074_v29  }
 0x223   : > { %v2425_v10 = vrot.slane %v2423_v0, 5 }
 0x225   : > { %v2426_v54 = vor.u32 %v2425_v10, %v2422_v43  ;;  %v3083_v10 = vld [vmem:[%s8291_s8 + $0x88] sm:$0xff] }
 0x226   : > { %3144 = vperm.xlu0 %8024, %v3076_v63  }
 0x229   : > { %6954 = vmatmul.mubr.bf16.gmra.mrb[32].mxu0 %v2167_v33  ;;  %v9133_v33 = vpop.f32.mrb[14].mxu1 }
 0x22a   : > { %6957 = vmatprep.mubr.msk.bf16.mxu0 %vm8226_vm0, %v8225_v16  ;;  %v6596_v36 = vpop.f32.mrb[15].mxu1  ;;  %3154 = vperm.xlu0 %8024, %v3078_v13  }
 0x22b   : > { %v9138_v45 = vpop.f32.mrb[16].mxu1  ;;  %v2451_v36 = vrot.slane %v2449_v18, 5 }
 0x22c   : > { %v6599_v60 = vpop.f32.mrb[17].mxu1 }
 0x22e   : > { %3164 = vperm.xlu0 %8024, %v3080_v27  }
 0x231   : > { %6958 = vmatmul.mubr.bf16.gmra.mrb[36].mxu0 %v2169_v46  ;;  %v2433_v46 = vrot.slane %v2431_v35, 5 }
 0x232   : > { %6961 = vmatprep.mubr.msk.bf16.mxu0 %vm8226_vm0, %v8225_v16 }
 0x233   : > { %v2434_v56 = vor.u32 %v2433_v46, %v2430_v44  ;;  %v2452_v44 = vor.u32 %v2451_v36, %v2448_v28  ;;  %v2455_v46 = vshrl.u32 %v8970_v41, 16 }
 0x235   : > { %v2435_v8 = vsel %vm2418_vm8, %v2426_v54, %v2434_v56  ;;  %v2444_v35 = vsel %vm2418_vm8, %v2434_v56, %v2443_v17  ;;  %v3084_v56 = vld [vmem:[%s8291_s8 + $0x90] sm:$0xff]  ;;  %v2453_v55 = vsel %vm2418_vm8, %v2443_v17, %v2452_v44  ;;  %v2457_v60 = vrot.slane %v2455_v46, 4  ;;  %v3089_v17 = vld [vmem:[%s8291_s8 + $0xb8] sm:$0xff] }
 0x239   : > { %6962 = vmatmul.mubr.bf16.gmra.mrb[40].mxu0 %v2171_v1  ;;  %v9145_v1 = vpop.f32.mrb[18].mxu1 }
 0x23a   : > { %6965 = vmatprep.mubr.msk.bf16.mxu0 %vm8226_vm0, %v8225_v16  ;;  %v6600_v5 = vpop.f32.mrb[19].mxu1 }
 0x23b   : > { %v9150_v58 = vpop.f32.mrb[20].mxu1 }
 0x23c   : > { %v6603_v20 = vpop.f32.mrb[21].mxu1 }
 0x23d   : > { %v9159_v61 = vpop.f32.mrb[22].mxu1  ;;  %v2469_v20 = vrot.slane %v2467_v9, 5 }
 0x23e   : > { %v6604_v0 = vpop.f32.mrb[23].mxu1 }
 0x23f   : > { %v9167_v43 = vpop.f32.mrb[24].mxu1  ;;  %v3091_v0 = vld [vmem:[%s8291_s8 + $0xc8] sm:$0xff] }
 0x240   : > { %v6607_v29 = vpop.f32.mrb[25].mxu1 }
 0x241   : > { %6966 = vmatmul.mubr.bf16.gmra.mrb[44].mxu0 %v2173_v15  ;;  %v3079_v15 = vld [vmem:[%s8291_s8 + $0x68] sm:$0xff]  ;;  %v9176_v51 = vpop.f32.mrb[26].mxu1 }
 0x242   : > { %6969 = vmatprep.mubr.msk.bf16.mxu0 %vm8226_vm0, %v8225_v16  ;;  %3159 = vperm.xlu1 %8025, %v3079_v15   ;;  %v6608_v54 = vpop.f32.mrb[27].mxu1  ;;  %v3088_v15 = vld [vmem:[%s8291_s8 + $0xb0] sm:$0xff] }
 0x249   : > { %6970 = vmatmul.mubr.bf16.gmra.mrb[48].mxu0 %v2175_v40  ;;  %v3082_v40 = vld [vmem:[%s8291_s8 + $0x80] sm:$0xff] }
 0x24a   : > { %6989 = vmatprep.mubr.msk.bf16.mxu0 %vm8226_vm0, %v8225_v16  ;;  %3174 = vperm.xlu0 %8024, %v3082_v40  }
 0x24e   : > { %3184 = vperm.xlu0 %8024, %v3084_v56  }
 0x251   : > { %6990 = vmatmul.mubr.bf16.vlgmr.msra.gmra.mrb[0].mxu0 %v2435_v8  ;;  %v2464_v8 = vshrl.u32 %v8992_v47, 16 }
 0x252   : > { %7042 = vmatpush3.bf16.msra.mxu0 %v8891_v22  ;;  %6993 = vmatprep.mubr.msk.bf16.mxu0 %vm8226_vm0, %v8225_v16  ;;  %v3081_v22 = vld [vmem:[%s8291_s8 + $0x78] sm:$0xff] }
 0x253   : > { %7043 = vmatprep.subr.bf16.mxu0 %v8225_v16  ;;  %3169 = vperm.xlu1 %8025, %v3081_v22   ;;  %v2466_v18 = vrot.slane %v2464_v8, 4  ;;  %v2473_v22 = vshrl.u32 %v9009_v57, 16 }
 0x255   : > { %v2470_v27 = vor.u32 %v2469_v20, %v2466_v18  ;;  %v2503_v18 = vshll.u32 %v9053_v14, 16 }
 0x256   : > { %7044 = vmatpush3.bf16.msra.mxu0 %v8900_v23  ;;  %v2458_v23 = vshll.u32 %v8970_v41, 16  ;;  %v9184_v41 = vpop.f32.mrb[28].mxu1 }
 0x257   : > { %7045 = vmatprep.subr.bf16.mxu0 %v8225_v16  ;;  %3179 = vperm.xlu1 %8025, %v3083_v10   ;;  %v2475_v10 = vrot.slane %v2473_v22, 4  ;;  %v2505_v22 = vrot.slane %v2503_v18, 5 }
 0x258   : > { %v2460_v63 = vrot.slane %v2458_v23, 5  ;;  %v2485_v23 = vshll.u32 %v9027_v2, 16 }
 0x259   : > { %6994 = vmatmul.mubr.bf16.gmra.mrb[4].mxu0 %v2444_v35  ;;  %v2476_v35 = vshll.u32 %v9009_v57, 16  ;;  %v2482_v57 = vshrl.u32 %v9027_v2, 16 }
 0x25a   : > { %6997 = vmatprep.mubr.msk.bf16.mxu0 %vm8226_vm0, %v8225_v16  ;;  %7046 = vmatpush3.bf16.msra.mxu0 %v8912_v25  ;;  %v3086_v25 = vld [vmem:[%s8291_s8 + $0xa0] sm:$0xff]  ;;  %v2461_v5 = vor.u32 %v2460_v63, %v2457_v60  ;;  %v2487_v60 = vrot.slane %v2485_v23, 5 }
 0x25b   : > { %7047 = vmatprep.subr.bf16.mxu0 %v8225_v16  ;;  %3189 = vperm.xlu1 %8025, %v3085_v59  }
 0x25c   : > { %3194 = vperm.xlu0 %8024, %v3086_v25   ;;  %v2462_v7 = vsel %vm2418_vm8, %v2452_v44, %v2461_v5  ;;  %v2471_v40 = vsel %vm2418_vm8, %v2461_v5, %v2470_v27  ;;  %v2478_v44 = vrot.slane %v2476_v35, 5  ;;  %v2491_v25 = vshrl.u32 %v9042_v11, 16 }
 0x25e   : > { %7048 = vmatpush3.bf16.msra.mxu0 %v8918_v26  ;;  %v6611_v26 = vpop.f32.mrb[29].mxu1 }
 0x25f   : > { %7049 = vmatprep.subr.bf16.mxu0 %v8225_v16  ;;  %v9193_v12 = vpop.f32.mrb[30].mxu1  ;;  %3199 = vperm.xlu1 %8025, %v3087_v4   ;;  %v2494_v4 = vshll.u32 %v9042_v11, 16  ;;  %v2493_v26 = vrot.slane %v2491_v25, 4  ;;  %v2527_v25 = vshrl.u32 %v9083_v49, 16 }
 0x260   : > { %v6612_v13 = vpop.f32.mrb[31].mxu1  ;;  %3204 = vperm.xlu0 %8024, %v3088_v15  }
 0x261   : > { %6998 = vmatmul.mubr.bf16.gmra.mrb[8].mxu0 %v2453_v55  ;;  %v9201_v47 = vpop.f32.mrb[32].mxu1  ;;  %v2484_v55 = vrot.slane %v2482_v57, 4  ;;  %v2496_v13 = vrot.slane %v2494_v4, 5  ;;  %v2530_v4 = vshll.u32 %v9083_v49, 16 }
 0x262   : > { %7001 = vmatprep.mubr.msk.bf16.mxu0 %vm8226_vm0, %v8225_v16  ;;  %7050 = vmatpush3.bf16.msra.mxu0 %v8927_v19  ;;  %v3090_v19 = vld [vmem:[%s8291_s8 + $0xc0] sm:$0xff] }
 0x263   : > { %7051 = vmatprep.subr.bf16.mxu0 %v8225_v16  ;;  %3209 = vperm.xlu1 %8025, %v3089_v17   ;;  %v2488_v63 = vor.u32 %v2487_v60, %v2484_v55  ;;  %v2497_v17 = vor.u32 %v2496_v13, %v2493_v26  ;;  %v2536_v26 = vshrl.u32 %v9097_v48, 16  ;;  %v2539_v13 = vshll.u32 %v9097_v48, 16 }
 0x264   : > { %3214 = vperm.xlu0 %8024, %v3090_v19  }
 0x265   : > { %v2541_v18 = vrot.slane %v2539_v13, 5 }
 0x266   : > { %7052 = vmatpush3.bf16.msra.mxu0 %v8936_v50  ;;  %v6615_v50 = vpop.f32.mrb[33].mxu1 }
 0x267   : > { %7053 = vmatprep.subr.bf16.mxu0 %v8225_v16  ;;  %v9210_v28 = vpop.f32.mrb[34].mxu1  ;;  %3219 = vperm.xlu1 %8025, %v3091_v0   ;;  %v2498_v0 = vsel %vm2418_vm8, %v2488_v63, %v2497_v17 }
 0x268   : > { %v6616_v36 = vpop.f32.mrb[35].mxu1 }
 0x269   : > { %7002 = vmatmul.mubr.bf16.gmra.mrb[12].mxu0 %v2462_v7  ;;  %v9214_v46 = vpop.f32.mrb[36].mxu1  ;;  %v2500_v7 = vshrl.u32 %v9053_v14, 16  ;;  %v2509_v36 = vshrl.u32 %v9063_v30, 16 }
 0x26a   : > { %7005 = vmatprep.mubr.msk.bf16.mxu0 %vm8226_vm0, %v8225_v16  ;;  %7054 = vmatpush3.bf16.msra.mxu0 %v8949_v32  ;;  %v2479_v32 = vor.u32 %v2478_v44, %v2475_v10  ;;  %v6619_v29 = vpop.f32.mrb[37].mxu1 }
 0x26b   : > { %7055 = vmatprep.subr.bf16.mxu0 %v8225_v16  ;;  %v9220_v54 = vpop.f32.mrb[38].mxu1  ;;  %v2511_v57 = vrot.slane %v2509_v36, 4 }
 0x26c   : > { %v6620_v56 = vpop.f32.mrb[39].mxu1  ;;  %v2480_v59 = vsel %vm2418_vm8, %v2470_v27, %v2479_v32  ;;  %v2489_v9 = vsel %vm2418_vm8, %v2479_v32, %v2488_v63  ;;  %v2502_v27 = vrot.slane %v2500_v7, 4  ;;  %v2538_v7 = vrot.slane %v2536_v26, 4 }
 0x26d   : > { %v2518_v56 = vshrl.u32 %v9073_v3, 16 }
 0x26e   : > { %7056 = vmatpush3.bf16.msra.mxu0 %v8959_v34  ;;  %v9223_v34 = vpop.f32.mrb[40].mxu1  ;;  %v2506_v50 = vor.u32 %v2505_v22, %v2502_v27  ;;  %v2542_v49 = vor.u32 %v2541_v18, %v2538_v7  ;;  %v2790_v27 = vrot.slane %v8942_v31, 5  ;;  %v2792_v22 = vrot.slane %v8966_v38, 5  ;;  %v8099_v18 = vld [vmem:[%s10025_s2 + $0x48] sm:$0xff]  }
 0x26f   : > { %v6623_v2 = vpop.f32.mrb[41].mxu1 }
 0x270   : > { %v9229_v5 = vpop.f32.mrb[42].mxu1  ;;  %v2507_v32 = vsel %vm2418_vm8, %v2497_v17, %v2506_v50  ;;  %v2795_v31 = vsel %vm2788_vm7, %v2792_v22, %v2794_v42 }
 0x271   : > { %7006 = vmatmul.mubr.bf16.gmra.mrb[16].mxu0 %v2471_v40  ;;  %v6624_v8 = vpop.f32.mrb[43].mxu1  ;;  %v2512_v40 = vshll.u32 %v9063_v30, 16  ;;  %v2520_v30 = vrot.slane %v2518_v56, 4 }
 0x272   : > { %7009 = vmatprep.mubr.msk.bf16.mxu0 %vm8226_vm0, %v8225_v16  ;;  %v9232_v15 = vpop.f32.mrb[44].mxu1  ;;  %v2529_v8 = vrot.slane %v2527_v25, 4 }
 0x273   : > { %v6627_v11 = vpop.f32.mrb[45].mxu1  ;;  %v2514_v23 = vrot.slane %v2512_v40, 5 }
 0x274   : > { %v9238_v20 = vpop.f32.mrb[46].mxu1 }
 0x275   : > { %v6628_v19 = vpop.f32.mrb[47].mxu1  ;;  %v2515_v29 = vor.u32 %v2514_v23, %v2511_v57 }
 0x276   : > { %v9241_v35 = vpop.f32.mrb[48].mxu1  ;;  %v2768_v19 = vld [vmem:[#allocation2 + $0x10] sm:$0xe0] }
 0x277   : > { %v6631_v14 = vpop.f32.mrb[49].mxu1  ;;  %v2516_v55 = vsel %vm2418_vm8, %v2506_v50, %v2515_v29  ;;  %v2793_v50 = vsel %vm2788_vm7, %v2790_v27, %v2792_v22 }
 0x278   : > { %v9247_v10 = vpop.f32.mrb[50].mxu1 }
 0x279   : > { %7010 = vmatmul.mubr.bf16.gmra.mrb[20].mxu0 %v2480_v59  ;;  %v6632_v44 = vpop.f32.mrb[51].mxu1  ;;  %v2521_v59 = vshll.u32 %v9073_v3, 16 }
 0x27a   : > { %7013 = vmatprep.mubr.msk.bf16.mxu0 %vm8226_vm0, %v8225_v16  ;;  %v9276_v36 = vpop.f32.mrb[52].mxu1 }
 0x27b   : > { %v2523_v60 = vrot.slane %v2521_v59, 5  ;;  %v7071_v40 = vpop.f32.mrb[53].mxu1 }
 0x27c   : > { %v9278_v14 = vpop.f32.mrb[54].mxu1 }
 0x27d   : > { %v2524_v63 = vor.u32 %v2523_v60, %v2520_v30  ;;  %v7072_v44 = vpop.f32.mrb[55].mxu1 }
 0x27f   : > { %v2525_v2 = vsel %vm2418_vm8, %v2515_v29, %v2524_v63 }
 0x281   : > { %7014 = vmatmul.mubr.bf16.gmra.mrb[24].mxu0 %v2489_v9  ;;  %v2532_v9 = vrot.slane %v2530_v4, 5 }
 0x282   : > { %7017 = vmatprep.mubr.msk.bf16.mxu0 %vm8226_vm0, %v8225_v16 }
 0x283   : > { %v2533_v3 = vor.u32 %v2532_v9, %v2529_v8 }
 0x285   : > { %v2534_v17 = vsel %vm2418_vm8, %v2524_v63, %v2533_v3  ;;  %v2543_v11 = vsel %vm2418_vm8, %v2533_v3, %v2542_v49  ;;  %v8098_v3 = vld [vmem:[%s10025_s2 + $0x40] sm:$0xff]  }
 0x286   : > { %7109 = vmatprep.subr.bf16.mxu1 %v8098_v3 }
 0x287   : > { %7110 = vmatpush3.bf16.msra.mxu1 %v8098_v3  ;;  %v9351_v3 = vpop.permute.xlu0 %3094 }
 0x288   : > { %7111 = vmatprep.subr.bf16.mxu1 %v8099_v18 }
 0x289   : > { %7018 = vmatmul.mubr.bf16.gmra.mrb[28].mxu0 %v2498_v0  ;;  %v2789_v0 = vrot.slane %v2768_v19, 5 }
 0x28a   : > { %7021 = vmatprep.mubr.msk.bf16.mxu0 %vm8226_vm0, %v8225_v16 }
 0x28b   : > { %v2791_v48 = vsel %vm2788_vm7, %v2789_v0, %v2790_v27  ;;  %7112 = vmatpush3.bf16.msra.mxu1 %v8099_v18 }
 0x291   : > { %7022 = vmatmul.mubr.bf16.gmra.mrb[32].mxu0 %v2507_v32  ;;  %v9285_v32 = vpop.f32.mrb[56].mxu1 }
 0x292   : > { %7025 = vmatprep.mubr.msk.bf16.mxu0 %vm8226_vm0, %v8225_v16  ;;  %v7075_v57 = vpop.f32.mrb[57].mxu1 }
 0x293   : > { %v9287_v38 = vpop.f32.mrb[58].mxu1 }
 0x294   : > { %v7076_v23 = vpop.f32.mrb[59].mxu1 }
 0x295   : > { %v9289_v29 = vpop.f32.mrb[60].mxu1 }
 0x296   : > { %v7079_v56 = vpop.f32.mrb[61].mxu1 }
 0x297   : > { %v9291_v59 = vpop.f32.mrb[62].mxu1 }
 0x299   : > { %7026 = vmatmul.mubr.bf16.gmra.mrb[36].mxu0 %v2516_v55  ;;  %v7080_v55 = vpop.f32.mrb[63].mxu1 }
 0x29a   : > { %7029 = vmatprep.mubr.msk.bf16.mxu0 %vm8226_vm0, %v8225_v16  ;;  %v9293_v30 = vpop.f32.mrb[64].mxu1 }
 0x2a1   : > { %7030 = vmatmul.mubr.bf16.gmra.mrb[40].mxu0 %v2525_v2 }
 0x2a2   : > { %7033 = vmatprep.mubr.msk.bf16.mxu0 %vm8226_vm0, %v8225_v16 }
 0x2a9   : > { %7034 = vmatmul.mubr.bf16.gmra.mrb[44].mxu0 %v2534_v17 }
 0x2aa   : > { %7037 = vmatprep.mubr.msk.bf16.mxu0 %vm8226_vm0, %v8225_v16 }
 0x2b1   : > { %7038 = vmatmul.mubr.bf16.gmra.mrb[48].mxu0 %v2543_v11 }
 0x2b2   : > { %7057 = vmatprep.mubr.msk.bf16.mxu0 %vm8226_vm0, %v8225_v16 }
 0x2b9   : > { %7058 = vmatmul.mubr.bf16.vlgmr.msra.gmra.mrb[0].mxu0 %v2791_v48  ;;  %v8100_v48 = vld [vmem:[%s10025_s2 + $0x50] sm:$0xff]  }
 0x2ba   : > { %7061 = vmatprep.mubr.msk.bf16.mxu0 %vm8226_vm0, %v8225_v16  ;;  %7113 = vmatprep.subr.bf16.mxu1 %v8100_v48 }
 0x2bb   : > { %7114 = vmatpush3.bf16.msra.mxu1 %v8100_v48 }
 0x2c1   : > { %7062 = vmatmul.mubr.bf16.gmra.mrb[4].mxu0 %v2793_v50 }
 0x2c2   : > { %7065 = vmatprep.mubr.msk.bf16.mxu0 %vm8226_vm0, %v8225_v16  ;;  %v7083_v16 = vpop.f32.mrb[65].mxu1 }
 0x2c3   : > { %v9295_v60 = vpop.f32.mrb[66].mxu1  ;;  %v8102_v16 = vld [vmem:[%s10025_s2 + $0x60] sm:$0xff]  }
 0x2c4   : > { %v7084_v39 = vpop.f32.mrb[67].mxu1 }
 0x2c5   : > { %v9297_v42 = vpop.f32.mrb[68].mxu1  ;;  %v8103_v39 = vld [vmem:[%s10025_s2 + $0x68] sm:$0xff]  }
 0x2c6   : > { %v7087_v63 = vpop.f32.mrb[69].mxu1 }
 0x2c7   : > { %v9299_v25 = vpop.f32.mrb[70].mxu1  ;;  %v8104_v63 = vld [vmem:[%s10025_s2 + $0x70] sm:$0xff]  }
 0x2c8   : > { %v7088_v4 = vpop.f32.mrb[71].mxu1 }
 0x2c9   : > { %7066 = vmatmul.mubr.bf16.gmra.mrb[8].mxu0 %v2795_v31  ;;  %v9301_v2 = vpop.f32.mrb[72].mxu1  ;;  %v8101_v31 = vld [vmem:[%s10025_s2 + $0x58] sm:$0xff]  }
 0x2ca   : > { %v7091_v8 = vpop.f32.mrb[73].mxu1  ;;  %7115 = vmatprep.subr.bf16.mxu1 %v8101_v31  ;;  %v8105_v4 = vld [vmem:[%s10025_s2 + $0x78] sm:$0xff]  }
 0x2cb   : > { %v9303_v9 = vpop.f32.mrb[74].mxu1  ;;  %7116 = vmatpush3.bf16.msra.mxu1 %v8101_v31  ;;  %v9348_v8 = vld [vmem:[%s10025_s2] sm:$0xff]  }
 0x2cc   : > { %v7092_v26 = vpop.f32.mrb[75].mxu1  ;;  %7117 = vmatprep.subr.bf16.mxu1 %v8102_v16  ;;  %10039 = vst [vmem:[#allocation9_spill] sm:$0xff] %v9348_v8 }
 0x2cd   : > { %v9308_v13 = vpop.f32.mrb[76].mxu1  ;;  %v9353_v26 = vpop.permute.xlu1 %3104 }
 0x2ce   : > { %v7095_v17 = vpop.f32.mrb[77].mxu1 }
 0x2cf   : > { %v9310_v7 = vpop.f32.mrb[78].mxu1  ;;  %7118 = vmatpush3.bf16.msra.mxu1 %v8102_v16  ;;  %v9355_v17 = vpop.permute.xlu0 %3099 }
 0x2d0   : > { %v7096_v49 = vpop.f32.mrb[79].mxu1  ;;  %7119 = vmatprep.subr.bf16.mxu1 %v8103_v39 }
 0x2d1   : > { %v9315_v11 = vpop.f32.mrb[80].mxu1  ;;  %v9357_v18 = vpop.permute.xlu1 %3109 }
 0x2d2   : > { %v7099_v19 = vpop.f32.mrb[81].mxu1  ;;  %10040 = vst [vmem:[#allocation10_spill] sm:$0xff] %v9357_v18 }
 0x2d3   : > { %v9317_v0 = vpop.f32.mrb[82].mxu1  ;;  %7120 = vmatpush3.bf16.msra.mxu1 %v8103_v39  ;;  %v9359_v49 = vpop.permute.xlu0 %3114 }
 0x2d4   : > { %v7100_v27 = vpop.f32.mrb[83].mxu1  ;;  %7121 = vmatprep.subr.bf16.mxu1 %v8104_v63  ;;  %10041 = vst [vmem:[#allocation11_spill] sm:$0xff] %v9359_v49 }
 0x2d5   : > { %v9322_v22 = vpop.f32.mrb[84].mxu1  ;;  %v9361_v27 = vpop.permute.xlu1 %3119 }
 0x2d6   : > { %v7103_v50 = vpop.f32.mrb[85].mxu1  ;;  %10042 = vst [vmem:[#allocation12_spill] sm:$0xff] %v9361_v27 }
 0x2d7   : > { %v9324_v40 = vpop.f32.mrb[86].mxu1  ;;  %7122 = vmatpush3.bf16.msra.mxu1 %v8104_v63  ;;  %v3125_v63 = vpop.permute.xlu0 %3124 }
 0x2d8   : > { %v7104_v44 = vpop.f32.mrb[87].mxu1  ;;  %7123 = vmatprep.subr.bf16.mxu1 %v8105_v4 }
 0x2d9   : > { %v9329_v57 = vpop.f32.mrb[88].mxu1 }
 0x2da   : > { %v7107_v23 = vpop.f32.mrb[89].mxu1 }
 0x2db   : > { %v9331_v56 = vpop.f32.mrb[90].mxu1  ;;  %7124 = vmatpush3.bf16.msra.mxu1 %v8105_v4  ;;  %v3130_v4 = vpop.permute.xlu1 %3129 }
 0x2dc   : > { %v7108_v55 = vpop.f32.mrb[91].mxu1  ;;  %7145 = vmatprep.subr.bf16.mxu1 %v9348_v8 }
 0x33c   : > { %v2663_v19 = vpop.f32.mrb[12].mxu0 }
 0x33d   : > { %v7455_v48 = vadd.f32 %v2663_v19, %v9125_v21  ;;  %v7003_v50 = vpop.f32.mrb[13].mxu0 }
 0x33e   : > { %v2666_v44 = vpop.f32.mrb[14].mxu0 }
 0x33f   : > { %v7457_v31 = vadd.f32 %v2666_v44, %v9133_v33  ;;  %v7456_v23 = vadd.f32 %v7455_v48, %v9276_v36  ;;  %v7004_v55 = vpop.f32.mrb[15].mxu0 }
 0x341   : > { %v3046_v16 = vmax.f32 %v7456_v23, 0.0  ;;  %v7458_v39 = vadd.f32 %v7457_v31, %v9278_v14  ;;  %v3135_v31 = vpop.permute.xlu0 %3134 }
 0x343   : > { %v3047_v8 = vmax.f32 %v7458_v39, 0.0  ;;  %v3228_v49 = vmul.f32 %v3125_v63, %v3046_v16 }
 0x344   : > { %v2671_v24 = vpop.f32.mrb[16].mxu0 }
 0x345   : > { %v3229_v6 = vmul.f32 %v3130_v4, %v3047_v8  ;;  %v7459_v27 = vadd.f32 %v2671_v24, %v9138_v45  ;;  %v7007_v18 = vpop.f32.mrb[17].mxu0  ;;  %v3140_v24 = vpop.permute.xlu1 %3139 }
 0x346   : > { %v2674_v21 = vpop.f32.mrb[18].mxu0 }
 0x347   : > { %v9368_v19 = vpack.c.bf16 %v3229_v6, %v3228_v49  ;;  %v7461_v33 = vadd.f32 %v2674_v21, %v9145_v1  ;;  %v7460_v36 = vadd.f32 %v7459_v27, %v9285_v32  ;;  %v7008_v48 = vpop.f32.mrb[19].mxu0 }
 0x348   : > { %v3145_v48 = vpop.permute.xlu0 %3144 }
 0x349   : > { %3264 = vst [vmem:[#allocation3 + $0x18] sm:$0xff] %v9368_v19  ;;  %v3048_v14 = vmax.f32 %v7460_v36, 0.0  ;;  %v7462_v50 = vadd.f32 %v7461_v33, %v9287_v38  ;;  %v3342_v44 = vshll.u32 %v9368_v19, 16  ;;  %v3346_v8 = vshrl.u32 %v9368_v19, 16 }
 0x34b   : > { %v3049_v45 = vmax.f32 %v7462_v50, 0.0  ;;  %v4264_v6 = vrot.slane %v3346_v8, 2  ;;  %v4267_v1 = vrot.slane %v3342_v44, 3  ;;  %v3230_v32 = vmul.f32 %v3135_v31, %v3048_v14  ;;  %v3150_v14 = vpop.permute.xlu1 %3149 }
 0x34c   : > { %v2679_v18 = vpop.f32.mrb[20].mxu0 }
 0x34d   : > { %v3231_v49 = vmul.f32 %v3140_v24, %v3049_v45  ;;  %v7463_v27 = vadd.f32 %v2679_v18, %v9150_v58  ;;  %v7011_v23 = vpop.f32.mrb[21].mxu0  ;;  %v9381_v55 = vor.u32 %v4267_v1, %v4264_v6 }
 0x34e   : > { %v2682_v38 = vpop.f32.mrb[22].mxu0 }
 0x34f   : > { %v9383_v16 = vpack.c.bf16 %v3231_v49, %v3230_v32  ;;  %v7465_v39 = vadd.f32 %v2682_v38, %v9159_v61  ;;  %v7464_v63 = vadd.f32 %v7463_v27, %v9289_v29  ;;  %v7012_v4 = vpop.f32.mrb[23].mxu0 }
 0x351   : > { %3265 = vst [vmem:[#allocation3 + $0x20] sm:$0xff] %v9383_v16  ;;  %v3050_v21 = vmax.f32 %v7464_v63, 0.0  ;;  %v7466_v33 = vadd.f32 %v7465_v39, %v9291_v59  ;;  %v3350_v36 = vshll.u32 %v9383_v16, 16  ;;  %v3354_v58 = vshrl.u32 %v9383_v16, 16 }
 0x353   : > { %v3051_v50 = vmax.f32 %v7466_v33, 0.0  ;;  %v4273_v31 = vrot.slane %v3354_v58, 2  ;;  %v4276_v61 = vrot.slane %v3350_v36, 3  ;;  %v3232_v29 = vmul.f32 %v3145_v48, %v3050_v21  ;;  %v3155_v21 = vpop.permute.xlu0 %3154  ;;  %v3160_v33 = vpop.permute.xlu1 %3159 }
 0x354   : > { %v2687_v24 = vpop.f32.mrb[24].mxu0 }
 0x355   : > { %v3233_v45 = vmul.f32 %v3150_v14, %v3051_v50  ;;  %v7467_v6 = vadd.f32 %v2687_v24, %v9167_v43  ;;  %v7015_v18 = vpop.f32.mrb[25].mxu0  ;;  %v4277_v1 = vor.u32 %v4276_v61, %v4273_v31 }
 0x356   : > { %v2690_v59 = vpop.f32.mrb[26].mxu0 }
 0x357   : > { %v9396_v32 = vpack.c.bf16 %v3233_v45, %v3232_v29  ;;  %v7469_v49 = vadd.f32 %v2690_v59, %v9176_v51  ;;  %v7468_v27 = vadd.f32 %v7467_v6, %v9293_v30  ;;  %v7016_v23 = vpop.f32.mrb[27].mxu0  ;;  %v9402_v38 = vsel %vm1481_vm4, %v9381_v55, %v4277_v1 }
 0x359   : > { %3266 = vst [vmem:[#allocation3 + $0x28] sm:$0xff] %v9396_v32  ;;  %v3052_v39 = vmax.f32 %v7468_v27, 0.0  ;;  %v7470_v63 = vadd.f32 %v7469_v49, %v9295_v60  ;;  %v3358_v43 = vshll.u32 %v9396_v32, 16  ;;  %v3362_v4 = vshrl.u32 %v9396_v32, 16 }
 0x35b   : > { %v3053_v48 = vmax.f32 %v7470_v63, 0.0  ;;  %v4282_v51 = vrot.slane %v3362_v4, 2  ;;  %v4285_v14 = vrot.slane %v3358_v43, 3  ;;  %v3234_v50 = vmul.f32 %v3155_v21, %v3052_v39  ;;  %v9424_v63 = vld [vmem:[#allocation3 + $0x20] sm:$0xff]  ;;  %v3165_v21 = vpop.permute.xlu0 %3164 }
 0x35c   : > { %v2695_v30 = vpop.f32.mrb[28].mxu0 }
 0x35d   : > { %v3235_v31 = vmul.f32 %v3160_v33, %v3053_v48  ;;  %v7471_v24 = vadd.f32 %v2695_v30, %v9184_v41  ;;  %v7019_v61 = vpop.f32.mrb[29].mxu0  ;;  %v4286_v29 = vor.u32 %v4285_v14, %v4282_v51  ;;  %v3170_v33 = vpop.permute.xlu1 %3169  ;;  %v9428_v48 = vld [vmem:[#allocation3 + $0x18] sm:$0xff] }
 0x35e   : > { %v2698_v60 = vpop.f32.mrb[30].mxu0 }
 0x35f   : > { %v9413_v45 = vpack.c.bf16 %v3235_v31, %v3234_v50  ;;  %v7473_v6 = vadd.f32 %v2698_v60, %v9193_v12  ;;  %v7472_v18 = vadd.f32 %v7471_v24, %v9297_v42  ;;  %v7020_v59 = vpop.f32.mrb[31].mxu0  ;;  %v9418_v49 = vsel %vm1481_vm4, %v4277_v1, %v4286_v29 }
 0x360   : > { %v10031_v60 = vrot.slane %v9428_v48, 5 }
 0x361   : > { %3267 = vst [vmem:[#allocation3 + $0x30] sm:$0xff] %v9413_v45  ;;  %v3054_v27 = vmax.f32 %v7472_v18, 0.0  ;;  %v7474_v23 = vadd.f32 %v7473_v6, %v9299_v25  ;;  %v3366_v41 = vshll.u32 %v9413_v45, 16  ;;  %v10030_v39 = vshrl.u32 %v9413_v45, 16 }
 0x362   : > { %v5346_v25 = vrot.slane %v9424_v63, 5 }
 0x363   : > { %v3055_v12 = vmax.f32 %v7474_v23, 0.0  ;;  %v4291_v42 = vrot.slane %v10030_v39, 2  ;;  %v4294_v51 = vrot.slane %v3366_v41, 3  ;;  %v3236_v30 = vmul.f32 %v3165_v21, %v3054_v27 }
 0x364   : > { %v2703_v1 = vpop.f32.mrb[32].mxu0  ;;  %v9445_v27 = vsel %vm2788_vm7, %v10031_v60, %v5346_v25 }
 0x365   : > { %v3237_v14 = vmul.f32 %v3170_v33, %v3055_v12  ;;  %v7475_v50 = vadd.f32 %v2703_v1, %v9201_v47  ;;  %v7023_v31 = vpop.f32.mrb[33].mxu0  ;;  %v4295_v61 = vor.u32 %v4294_v51, %v4291_v42  ;;  %v3175_v12 = vpop.permute.xlu0 %3174 }
 0x366   : > { %v2706_v24 = vpop.f32.mrb[34].mxu0 }
 0x367   : > { %v9435_v6 = vpack.c.bf16 %v3237_v14, %v3236_v30  ;;  %v7477_v18 = vadd.f32 %v2706_v24, %v9210_v28  ;;  %v7476_v59 = vadd.f32 %v7475_v50, %v9301_v2  ;;  %v7024_v23 = vpop.f32.mrb[35].mxu0  ;;  %v9440_v39 = vsel %vm1481_vm4, %v4286_v29, %v4295_v61  ;;  %v3180_v2 = vpop.permute.xlu1 %3179 }
 0x369   : > { %3268 = vst [vmem:[#allocation3 + $0x38] sm:$0xff] %v9435_v6  ;;  %v3056_v47 = vmax.f32 %v7476_v59, 0.0  ;;  %v7478_v21 = vadd.f32 %v7477_v18, %v9303_v9  ;;  %v3374_v33 = vshll.u32 %v9435_v6, 16  ;;  %v10032_v28 = vshrl.u32 %v9435_v6, 16 }
 0x36b   : > { %v3057_v42 = vmax.f32 %v7478_v21, 0.0  ;;  %v4300_v29 = vrot.slane %v10032_v28, 2  ;;  %v4303_v51 = vrot.slane %v3374_v33, 3  ;;  %v3238_v30 = vmul.f32 %v3175_v12, %v3056_v47 }
 0x36c   : > { %v2711_v1 = vpop.f32.mrb[36].mxu0 }
 0x36d   : > { %v3239_v14 = vmul.f32 %v3180_v2, %v3057_v42  ;;  %v7479_v50 = vadd.f32 %v2711_v1, %v9214_v46  ;;  %v7027_v31 = vpop.f32.mrb[37].mxu0  ;;  %v4304_v24 = vor.u32 %v4303_v51, %v4300_v29  ;;  %v9467_v2 = vld [vmem:[#allocation3 + $0x28] sm:$0xff]  ;;  %v3185_v42 = vpop.permute.xlu0 %3184 }
 0x36e   : > { %v2714_v9 = vpop.f32.mrb[38].mxu0  ;;  %v3190_v29 = vpop.permute.xlu1 %3189  ;;  %v5348_v51 = vrot.slane %v9467_v2, 5 }
 0x36f   : > { %v9456_v18 = vpack.c.bf16 %v3239_v14, %v3238_v30  ;;  %v7481_v59 = vadd.f32 %v2714_v9, %v9220_v54  ;;  %v7480_v23 = vadd.f32 %v7479_v50, %v9308_v13  ;;  %v7028_v21 = vpop.f32.mrb[39].mxu0  ;;  %v9461_v60 = vsel %vm1481_vm4, %v4295_v61, %v4304_v24 }
 0x371   : > { %3269 = vst [vmem:[#allocation3 + $0x40] sm:$0xff] %v9456_v18  ;;  %v3058_v28 = vmax.f32 %v7480_v23, 0.0  ;;  %v7482_v47 = vadd.f32 %v7481_v59, %v9310_v7  ;;  %v10034_v46 = vshll.u32 %v9456_v18, 16  ;;  %v10033_v12 = vshrl.u32 %v9456_v18, 16 }
 0x373   : > { %v3059_v54 = vmax.f32 %v7482_v47, 0.0  ;;  %v4309_v13 = vrot.slane %v10033_v12, 2  ;;  %v4312_v61 = vrot.slane %v10034_v46, 3  ;;  %v3240_v30 = vmul.f32 %v3185_v42, %v3058_v28 }
 0x374   : > { %v2719_v1 = vpop.f32.mrb[40].mxu0  ;;  %v9483_v46 = vsel %vm2788_vm7, %v5346_v25, %v5348_v51 }
 0x375   : > { %v3241_v7 = vmul.f32 %v3190_v29, %v3059_v54  ;;  %v7483_v14 = vadd.f32 %v2719_v1, %v9223_v34  ;;  %v7031_v50 = vpop.f32.mrb[41].mxu0  ;;  %v4313_v9 = vor.u32 %v4312_v61, %v4309_v13  ;;  %v3195_v54 = vpop.permute.xlu0 %3194 }
 0x376   : > { %v2722_v31 = vpop.f32.mrb[42].mxu0 }
 0x377   : > { %v9475_v59 = vpack.c.bf16 %v3241_v7, %v3240_v30  ;;  %v7485_v23 = vadd.f32 %v2722_v31, %v9229_v5  ;;  %v7484_v21 = vadd.f32 %v7483_v14, %v9315_v11  ;;  %v7032_v47 = vpop.f32.mrb[43].mxu0  ;;  %v9480_v12 = vsel %vm1481_vm4, %v4304_v24, %v4313_v9  ;;  %v3200_v5 = vpop.permute.xlu1 %3199 }
 0x379   : > { %3270 = vst [vmem:[#allocation3 + $0x48] sm:$0xff] %v9475_v59  ;;  %v3060_v28 = vmax.f32 %v7484_v21, 0.0  ;;  %v7486_v34 = vadd.f32 %v7485_v23, %v9317_v0  ;;  %v3390_v42 = vshll.u32 %v9475_v59, 16  ;;  %v10036_v29 = vshrl.u32 %v9475_v59, 16 }
 0x37b   : > { %v3061_v13 = vmax.f32 %v7486_v34, 0.0  ;;  %v4318_v11 = vrot.slane %v10036_v29, 2  ;;  %v4321_v25 = vrot.slane %v3390_v42, 3  ;;  %v3242_v1 = vmul.f32 %v3195_v54, %v3060_v28  ;;  %v3205_v54 = vpop.permute.xlu0 %3204  ;;  %v10047_v29 = vld [vmem:[#allocation12_spill] sm:$0xff] }
 0x37c   : > { %v2727_v24 = vpop.f32.mrb[44].mxu0 }
 0x37d   : > { %v3243_v61 = vmul.f32 %v3200_v5, %v3061_v13  ;;  %v7487_v30 = vadd.f32 %v2727_v24, %v9232_v15  ;;  %v7035_v7 = vpop.f32.mrb[45].mxu0  ;;  %v4322_v14 = vor.u32 %v4321_v25, %v4318_v11  ;;  %v3210_v5 = vpop.permute.xlu1 %3209 }
 0x37e   : > { %v2730_v0 = vpop.f32.mrb[46].mxu0 }
 0x37f   : > { %v9494_v50 = vpack.c.bf16 %v3243_v61, %v3242_v1  ;;  %v7489_v31 = vadd.f32 %v2730_v0, %v9238_v20  ;;  %v7488_v23 = vadd.f32 %v7487_v30, %v9322_v22  ;;  %v7036_v21 = vpop.f32.mrb[47].mxu0  ;;  %v9499_v47 = vsel %vm1481_vm4, %v4313_v9, %v4322_v14  ;;  %v9505_v20 = vld [vmem:[#allocation3 + $0x30] sm:$0xff] }
 0x381   : > { %3271 = vst [vmem:[#allocation3 + $0x50] sm:$0xff] %v9494_v50  ;;  %v3062_v34 = vmax.f32 %v7488_v23, 0.0  ;;  %v7490_v28 = vadd.f32 %v7489_v31, %v9324_v40  ;;  %v4325_v15 = vshrl.u32 %v9494_v50, 16  ;;  %v4328_v13 = vshll.u32 %v9494_v50, 16 }
 0x382   : > { %v5350_v40 = vrot.slane %v9505_v20, 5 }
 0x383   : > { %v3063_v11 = vmax.f32 %v7490_v28, 0.0  ;;  %v4327_v24 = vrot.slane %v4325_v15, 2  ;;  %v4330_v25 = vrot.slane %v4328_v13, 3  ;;  %v3244_v1 = vmul.f32 %v3205_v54, %v3062_v34  ;;  %v3220_v13 = vpop.permute.xlu1 %3219 }
 0x384   : > { %v2735_v22 = vpop.f32.mrb[48].mxu0  ;;  %v9518_v34 = vsel %vm2788_vm7, %v5348_v51, %v5350_v40 }
 0x385   : > { %v3245_v9 = vmul.f32 %v3210_v5, %v3063_v11  ;;  %v7491_v61 = vadd.f32 %v2735_v22, %v9241_v35  ;;  %v7039_v30 = vpop.f32.mrb[49].mxu0  ;;  %v9508_v0 = vor.u32 %v4330_v25, %v4327_v24  ;;  %v3215_v5 = vpop.permute.xlu0 %3214  ;;  %v9521_v11 = vld [vmem:[#allocation3 + $0x38] sm:$0xff] }
 0x386   : > { %v2738_v7 = vpop.f32.mrb[50].mxu0 }
 0x387   : > { %v3259_v31 = vpack.c.bf16 %v3245_v9, %v3244_v1  ;;  %v7493_v23 = vadd.f32 %v2738_v7, %v9247_v10  ;;  %v7492_v21 = vadd.f32 %v7491_v61, %v9329_v57  ;;  %v7040_v28 = vpop.f32.mrb[51].mxu0  ;;  %v9515_v15 = vsel %vm1481_vm4, %v4322_v14, %v9508_v0  ;;  %v9523_v10 = vld [vmem:[#allocation3 + $0x40] sm:$0xff]  ;;  %v9525_v57 = vld [vmem:[#allocation3 + $0x48] sm:$0xff] }
 0x388   : > { %v9527_v22 = vld [vmem:[#allocation3 + $0x50] sm:$0xff]  ;;  %v5352_v61 = vrot.slane %v9521_v11, 5  ;;  %v5354_v30 = vrot.slane %v9523_v10, 5  ;;  %v5356_v7 = vrot.slane %v9525_v57, 5 }
 0x389   : > { %3272 = vst [vmem:[#allocation3 + $0x58] sm:$0xff] %v3259_v31  ;;  %v3064_v35 = vmax.f32 %v7492_v21, 0.0  ;;  %v7494_v54 = vadd.f32 %v7493_v23, %v9331_v56  ;;  %v5358_v31 = vrot.slane %v9527_v22, 5 }
 0x38b   : > { %v3065_v24 = vmax.f32 %v7494_v54, 0.0  ;;  %v3246_v25 = vmul.f32 %v3215_v5, %v3064_v35  ;;  %v9536_v35 = vsel %vm2788_vm7, %v5350_v40, %v5352_v61  ;;  %v9542_v5 = vsel %vm2788_vm7, %v5354_v30, %v5356_v7 }
 0x38c   : > { %v2911_v14 = vpop.f32.mrb[0].mxu0 }
 0x38d   : > { %v3247_v1 = vmul.f32 %v3220_v13, %v3065_v24  ;;  %v7449_v51 = vadd.f32 %v2911_v14, %v9086_v37  ;;  %v7059_v9 = vpop.f32.mrb[1].mxu0  ;;  %v9539_v37 = vsel %vm2788_vm7, %v5352_v61, %v5354_v30  ;;  %v9545_v13 = vsel %vm2788_vm7, %v5356_v7, %v5358_v31 }
 0x38e   : > { %v2914_v56 = vpop.f32.mrb[2].mxu0 }
 0x38f   : > { %v3260_v23 = vpack.c.bf16 %v3247_v1, %v3246_v25  ;;  %v3040_v21 = vmax.f32 %v7449_v51, 0.0  ;;  %v7450_v28 = vadd.f32 %v2914_v56, %v9092_v52  ;;  %v7060_v54 = vpop.f32.mrb[3].mxu0 }
 0x390   : > { %v9547_v14 = vld [vmem:[#allocation3 + $0x58] sm:$0xff] }
 0x391   : > { %3273 = vst [vmem:[#allocation3 + $0x60] sm:$0xff] %v3260_v23  ;;  %v3041_v24 = vmax.f32 %v7450_v28, 0.0  ;;  %v3222_v25 = vmul.f32 %v9351_v3, %v3040_v21  ;;  %v10035_v61 = vrot.slane %v9547_v14, 5  ;;  %v10043_v28 = vld [vmem:[#allocation10_spill] sm:$0xff] }
 0x393   : > { %v3223_v52 = vmul.f32 %v9355_v17, %v3041_v24  ;;  %v9560_v3 = vsel %vm2788_vm7, %v5358_v31, %v10035_v61  ;;  %v10045_v31 = vld [vmem:[#allocation8_spill] sm:$0xff] }
 0x394   : > { %v2919_v1 = vpop.f32.mrb[4].mxu0 }
 0x395   : > { %v9551_v40 = vpack.c.bf16 %v3223_v52, %v3222_v25  ;;  %v7451_v51 = vadd.f32 %v2919_v1, %v9101_v53  ;;  %v7063_v9 = vpop.f32.mrb[5].mxu0  ;;  %v10044_v52 = vld [vmem:[#allocation7_spill] sm:$0xff] }
 0x396   : > { %v2922_v56 = vpop.f32.mrb[6].mxu0 }
 0x397   : > { %3261 = vst [vmem:[#allocation3] sm:$0xff] %v9551_v40  ;;  %v3042_v30 = vmax.f32 %v7451_v51, 0.0  ;;  %v7452_v7 = vadd.f32 %v2922_v56, %v9108_v62  ;;  %v7064_v23 = vpop.f32.mrb[7].mxu0  ;;  %v3321_v21 = vshll.u32 %v9551_v40, 16  ;;  %v3319_v61 = vshrl.u32 %v9551_v40, 16 }
 0x399   : > { %v3043_v17 = vmax.f32 %v7452_v7, 0.0  ;;  %v3224_v53 = vmul.f32 %v9353_v26, %v3042_v30  ;;  %v3323_v62 = vrot.slane %v3321_v21, 1 }
 0x39b   : > { %v3225_v54 = vmul.f32 %v10043_v28, %v3043_v17  ;;  %v3324_v17 = vor.u32 %v3323_v62, %v3319_v61 }
 0x39c   : > { %v2927_v24 = vpop.f32.mrb[8].mxu0 }
 0x39d   : > { %v9565_v25 = vpack.c.bf16 %v3225_v54, %v3224_v53  ;;  %v7453_v1 = vadd.f32 %v2927_v24, %v10044_v52  ;;  %v7067_v51 = vpop.f32.mrb[9].mxu0  ;;  %v10046_v53 = vld [vmem:[#allocation11_spill] sm:$0xff] }
 0x39e   : > { %v2930_v9 = vpop.f32.mrb[10].mxu0 }
 0x39f   : > { %3262 = vst [vmem:[#allocation3 + $0x8] sm:$0xff] %v9565_v25  ;;  %v3044_v56 = vmax.f32 %v7453_v1, 0.0  ;;  %v7454_v23 = vadd.f32 %v2930_v9, %v10045_v31  ;;  %v7068_v7 = vpop.f32.mrb[11].mxu0  ;;  %v3326_v26 = vshll.u32 %v9565_v25, 16  ;;  %v3330_v1 = vshrl.u32 %v9565_v25, 16 }
 0x3a0   : > { %v3764_v61 = vrot.slane %v9565_v25, 1  ;;  %v8107_v7 = vld [vmem:[%s10025_s2 + $0x8] sm:$0xff]  }
 0x3a1   : > { %v3045_v30 = vmax.f32 %v7454_v23, 0.0  ;;  %v3328_v28 = vrot.slane %v3326_v26, 1  ;;  %v3226_v54 = vmul.f32 %v10046_v53, %v3044_v56  ;;  %v10048_v53 = vld [vmem:[#allocation9_spill] sm:$0xff] }
 0x3a3   : > { %v3227_v24 = vmul.f32 %v10047_v29, %v3045_v30  ;;  %v3329_v21 = vsel %vm390_vm3, %v3324_v17, %v3328_v28  ;;  %v3332_v56 = vor.u32 %v3330_v1, %v3328_v28  ;;  %v3344_v17 = vrot.slane %v3342_v44, 1  ;;  %v8108_v1 = vld [vmem:[%s10025_s2 + $0x10] sm:$0xff]  }
 0x3a4   : > { %7125 = vmatprep.mubr.bf16.mxu1 %v3329_v21  ;;  %v3352_v21 = vrot.slane %v3350_v36, 1  ;;  %v8109_v36 = vld [vmem:[%s10025_s2 + $0x18] sm:$0xff]  }
 0x3a5   : > { %v9575_v52 = vpack.c.bf16 %v3227_v24, %v3226_v54 }
 0x3a7   : > { %3263 = vst [vmem:[#allocation3 + $0x10] sm:$0xff] %v9575_v52  ;;  %v3334_v51 = vshll.u32 %v9575_v52, 16  ;;  %v3338_v9 = vshrl.u32 %v9575_v52, 16  ;;  %v3766_v62 = vrot.slane %v9575_v52, 1 }
 0x3a9   : > { %v3336_v31 = vrot.slane %v3334_v51, 1  ;;  %v9588_v29 = vsel %vm914_vm1, %v3764_v61, %v3766_v62  ;;  %v4255_v23 = vrot.slane %v3338_v9, 2  ;;  %v4258_v28 = vrot.slane %v3334_v51, 3 }
 0x3aa   : > { %v3360_v51 = vrot.slane %v3358_v43, 1  ;;  %v3368_v43 = vrot.slane %v3366_v41, 1 }
 0x3ab   : > { %v3337_v26 = vsel %vm390_vm3, %v3332_v56, %v3336_v31  ;;  %v3340_v30 = vor.u32 %v3338_v9, %v3336_v31  ;;  %v9598_v24 = vor.u32 %v4258_v28, %v4255_v23  ;;  %v3348_v9 = vor.u32 %v3346_v8, %v3344_v17  ;;  %v8110_v8 = vld [vmem:[%s10025_s2 + $0x20] sm:$0xff]  }
 0x3ac   : > { %7126 = vmatmul.mubr.bf16.vlgmr.msra.gmra.mrb[92].mxu1 %v3337_v26  ;;  %v3356_v56 = vor.u32 %v3354_v58, %v3352_v21  ;;  %v3376_v58 = vrot.slane %v3374_v33, 1  ;;  %v3364_v23 = vor.u32 %v3362_v4, %v3360_v51  ;;  %v10050_v33 = vshll.u32 %v9456_v18, 16  ;;  %v8112_v4 = vld [vmem:[%s10025_s2 + $0x30] sm:$0xff]  }
 0x3ad   : > { %7146 = vmatpush3.bf16.msra.mxu1 %v10048_v53  ;;  %v3345_v54 = vsel %vm390_vm3, %v3340_v30, %v3344_v17  ;;  %v9608_v44 = vsel %vm1481_vm4, %v9598_v24, %v9381_v55  ;;  %v3353_v31 = vsel %vm390_vm3, %v3348_v9, %v3352_v21  ;;  %v8111_v30 = vld [vmem:[%s10025_s2 + $0x28] sm:$0xff]   ;;  %v3392_v53 = vrot.slane %v3390_v42, 1 }
 0x3ae   : > { %7129 = vmatprep.mubr.bf16.mxu1 %v3345_v54  ;;  %7147 = vmatprep.subr.bf16.mxu1 %v8107_v7  ;;  %v3361_v55 = vsel %vm390_vm3, %v3356_v56, %v3360_v51  ;;  %v3369_v41 = vsel %vm390_vm3, %v3364_v23, %v3368_v43  ;;  %v3384_v28 = vrot.slane %v10050_v33, 1  ;;  %v9644_v54 = vld [vmem:[#allocation3 + $0x50] sm:$0x1]  ;;  %v10051_v21 = vshrl.u32 %v9435_v6, 16  ;;  %v8113_v56 = vld [vmem:[%s10025_s2 + $0x38] sm:$0xff]  }
 0x3af   : > { %v10052_v51 = vshrl.u32 %v9456_v18, 16  ;;  %v8121_v33 = vld [vmem:[%s10025_s2 + $0xb8] sm:$0xff]  }
 0x3b1   : > { %7148 = vmatpush3.bf16.msra.mxu1 %v8107_v7  ;;  %v10049_v7 = vshrl.u32 %v9413_v45, 16  ;;  %v3388_v9 = vor.u32 %v10052_v51, %v3384_v28  ;;  %v8123_v51 = vld [vmem:[%s10025_s2 + $0xc8] sm:$0xff]  }
 0x3b2   : > { %7149 = vmatprep.subr.bf16.mxu1 %v8108_v1 }
 0x3b3   : > { %v3372_v26 = vor.u32 %v10049_v7, %v3368_v43  ;;  %v3393_v42 = vsel %vm390_vm3, %v3388_v9, %v3392_v53  ;;  %v8115_v7 = vld [vmem:[%s10025_s2 + $0x88] sm:$0xff]  }
 0x3b4   : > { %7130 = vmatmul.mubr.bf16.gmra.mrb[96].mxu1 %v3353_v31  ;;  %v3398_v31 = vshll.u32 %v9644_v54, 16 }
 0x3b5   : > { %7133 = vmatprep.mubr.bf16.mxu1 %v3361_v55  ;;  %7150 = vmatpush3.bf16.msra.mxu1 %v8108_v1  ;;  %v3377_v17 = vsel %vm390_vm3, %v3372_v26, %v3376_v58  ;;  %v3380_v1 = vor.u32 %v10051_v21, %v3376_v58  ;;  %v8114_v55 = vld [vmem:[%s10025_s2 + $0x80] sm:$0xff]   ;;  %v8116_v26 = vld [vmem:[%s10025_s2 + $0x90] sm:$0xff]  }
 0x3b6   : > { %7151 = vmatprep.subr.bf16.mxu1 %v8109_v36  ;;  %v3400_v43 = vrot.slane %v3398_v31, 1  ;;  %v8126_v31 = vld [vmem:[%s10025_s2 + $0xe0] sm:$0xff]  }
 0x3b9   : > { %7152 = vmatpush3.bf16.msra.mxu1 %v8109_v36  ;;  %v3385_v36 = vsel %vm390_vm3, %v3380_v1, %v3384_v28  ;;  %v3734_v28 = vld [vmem:[#allocation3] sm:$0xfe]  ;;  %v3768_v1 = vrot.slane %v9368_v19, 1 }
 0x3ba   : > { %7153 = vmatprep.subr.bf16.mxu1 %v8110_v8 }
 0x3bb   : > { %v3769_v9 = vsel %vm914_vm1, %v3766_v62, %v3768_v1 }
 0x3bc   : > { %7134 = vmatmul.mubr.bf16.gmra.mrb[100].mxu1 %v3369_v41  ;;  %v8119_v41 = vld [vmem:[%s10025_s2 + $0xa8] sm:$0xff]  }
 0x3bd   : > { %7137 = vmatprep.mubr.bf16.mxu1 %v3377_v17  ;;  %7154 = vmatpush3.bf16.msra.mxu1 %v8110_v8  ;;  %v10053_v8 = vshrl.u32 %v9475_v59, 16  ;;  %v8120_v17 = vld [vmem:[%s10025_s2 + $0xb0] sm:$0xff]  }
 0x3be   : > { %7155 = vmatprep.subr.bf16.mxu1 %v8111_v30 }
 0x3bf   : > { %v3396_v58 = vor.u32 %v10053_v8, %v3392_v53  ;;  %v3763_v53 = vrot.slane %v3734_v28, 1  ;;  %v3782_v28 = vrot.slane %v9644_v54, 1 }
 0x3c1   : > { %7156 = vmatpush3.bf16.msra.mxu1 %v8111_v30  ;;  %v3401_v23 = vsel %vm390_vm3, %v3396_v58, %v3400_v43  ;;  %v8118_v30 = vld [vmem:[%s10025_s2 + $0xa0] sm:$0xff]   ;;  %v3765_v21 = vsel %vm914_vm1, %v3763_v53, %v3764_v61  ;;  %v3770_v61 = vrot.slane %v9383_v16, 1  ;;  %v8127_v43 = vld [vmem:[%s10025_s2 + $0xe8] sm:$0xff]   ;;  %v4015_v53 = vrot.slane %v9575_v52, 2 }
 0x3c2   : > { %7157 = vmatprep.subr.bf16.mxu1 %v8112_v4 }
 0x3c4   : > { %7138 = vmatmul.mubr.bf16.gmra.mrb[104].mxu1 %v3385_v36  ;;  %v3771_v36 = vsel %vm914_vm1, %v3768_v1, %v3770_v61 }
 0x3c5   : > { %7141 = vmatprep.mubr.bf16.mxu1 %v3393_v42  ;;  %7158 = vmatpush3.bf16.msra.mxu1 %v8112_v4  ;;  %v8122_v4 = vld [vmem:[%s10025_s2 + $0xc0] sm:$0xff]   ;;  %v3774_v42 = vrot.slane %v9413_v45, 1 }
 0x3c6   : > { %7159 = vmatprep.subr.bf16.mxu1 %v8113_v56 }
 0x3c9   : > { %7160 = vmatpush3.bf16.msra.mxu1 %v8113_v56  ;;  %v3772_v56 = vrot.slane %v9396_v32, 1 }
 0x3ca   : > { %7181 = vmatprep.subr.bf16.mxu1 %v8114_v55 }
 0x3cb   : > { %v3773_v62 = vsel %vm914_vm1, %v3770_v61, %v3772_v56  ;;  %v3775_v8 = vsel %vm914_vm1, %v3772_v56, %v3774_v42  ;;  %v8132_v56 = vld [vmem:[%s10025_s2 + $0x110] sm:$0xff]  }
 0x3cc   : > { %7142 = vmatmul.mubr.bf16.gmra.mrb[108].mxu1 %v3401_v23  ;;  %v8128_v23 = vld [vmem:[%s10025_s2 + $0xf0] sm:$0xff]  }
 0x3cd   : > { %7161 = vmatprep.mubr.bf16.mxu1 %v9551_v40  ;;  %v8117_v40 = vld [vmem:[%s10025_s2 + $0x98] sm:$0xff]  }
 0x3d4   : > { %7162 = vmatmul.mubr.bf16.vlgmr.msra.gmra.mrb[92].mxu1 %v9565_v25  ;;  %v8124_v25 = vld [vmem:[%s10025_s2 + $0xd0] sm:$0xff]  }
 0x3d5   : > { %7165 = vmatprep.mubr.bf16.mxu1 %v9575_v52  ;;  %7182 = vmatpush3.bf16.msra.mxu1 %v8114_v55  ;;  %v3776_v55 = vrot.slane %v9435_v6, 1 }
 0x3d6   : > { %7183 = vmatprep.subr.bf16.mxu1 %v8115_v7 }
 0x3d7   : > { %v3777_v58 = vsel %vm914_vm1, %v3774_v42, %v3776_v55  ;;  %v8134_v42 = vld [vmem:[%s10025_s2 + $0x120] sm:$0xff]  }
 0x3d9   : > { %7184 = vmatpush3.bf16.msra.mxu1 %v8115_v7  ;;  %v3778_v7 = vrot.slane %v9456_v18, 1 }
 0x3da   : > { %7185 = vmatprep.subr.bf16.mxu1 %v8116_v26 }
 0x3dc   : > { %7166 = vmatmul.mubr.bf16.gmra.mrb[96].mxu1 %v9368_v19 }
 0x3dd   : > { %7169 = vmatprep.mubr.bf16.mxu1 %v9383_v16  ;;  %7186 = vmatpush3.bf16.msra.mxu1 %v8116_v26  ;;  %v3780_v26 = vrot.slane %v9475_v59, 1 }
 0x3de   : > { %7187 = vmatprep.subr.bf16.mxu1 %v8117_v40 }
 0x3e1   : > { %7188 = vmatpush3.bf16.msra.mxu1 %v8117_v40  ;;  %v8129_v40 = vld [vmem:[%s10025_s2 + $0xf8] sm:$0xff]  }
 0x3e2   : > { %7189 = vmatprep.subr.bf16.mxu1 %v8118_v30 }
 0x3e4   : > { %7170 = vmatmul.mubr.bf16.gmra.mrb[100].mxu1 %v9396_v32 }
 0x3e5   : > { %7173 = vmatprep.mubr.bf16.mxu1 %v9413_v45  ;;  %7190 = vmatpush3.bf16.msra.mxu1 %v8118_v30  ;;  %v3779_v30 = vsel %vm914_vm1, %v3776_v55, %v3778_v7  ;;  %v4025_v55 = vrot.slane %v9435_v6, 2 }
 0x3e6   : > { %7191 = vmatprep.subr.bf16.mxu1 %v8119_v41 }
 0x3e9   : > { %7192 = vmatpush3.bf16.msra.mxu1 %v8119_v41  ;;  %v3781_v41 = vsel %vm914_vm1, %v3778_v7, %v3780_v26  ;;  %v8136_v7 = vld [vmem:[%s10025_s2 + $0x130] sm:$0xff]  }
 0x3ea   : > { %7193 = vmatprep.subr.bf16.mxu1 %v8120_v17 }
 0x3ec   : > { %7174 = vmatmul.mubr.bf16.gmra.mrb[104].mxu1 %v9435_v6 }
 0x3ed   : > { %7177 = vmatprep.mubr.bf16.mxu1 %v9456_v18  ;;  %7194 = vmatpush3.bf16.msra.mxu1 %v8120_v17  ;;  %v3975_v17 = vld [vmem:[#allocation3 + $0x8] sm:$0xfc] }
 0x3ee   : > { %7195 = vmatprep.subr.bf16.mxu1 %v8121_v33 }
 0x3f1   : > { %7196 = vmatpush3.bf16.msra.mxu1 %v8121_v33  ;;  %v8130_v33 = vld [vmem:[%s10025_s2 + $0x100] sm:$0xff]  }
 0x3f2   : > { %7217 = vmatprep.subr.bf16.mxu1 %v8122_v4 }
 0x3f4   : > { %7178 = vmatmul.mubr.bf16.gmra.mrb[108].mxu1 %v9475_v59 }
 0x3f5   : > { %7197 = vmatprep.mubr.bf16.mxu1 %v3765_v21  ;;  %v3783_v21 = vsel %vm914_vm1, %v3780_v26, %v3782_v28  ;;  %v4029_v26 = vrot.slane %v9475_v59, 2 }
 0x3fc   : > { %7198 = vmatmul.mubr.bf16.vlgmr.msra.gmra.mrb[92].mxu1 %v9588_v29  ;;  %v8125_v29 = vld [vmem:[%s10025_s2 + $0xd8] sm:$0xff]  }
 0x3fd   : > { %7201 = vmatprep.mubr.bf16.mxu1 %v3769_v9  ;;  %7218 = vmatpush3.bf16.msra.mxu1 %v8122_v4  ;;  %v4014_v4 = vrot.slane %v3975_v17, 2  ;;  %v4017_v9 = vrot.slane %v9368_v19, 2  ;;  %v4023_v19 = vrot.slane %v9413_v45, 2 }
 0x3fe   : > { %7219 = vmatprep.subr.bf16.mxu1 %v8123_v51 }
 0x3ff   : > { %v4016_v1 = vsel %vm1211_vm2, %v4014_v4, %v4015_v53  ;;  %v4018_v54 = vsel %vm1211_vm2, %v4015_v53, %v4017_v9  ;;  %v3985_v53 = vld [vmem:[#allocation3 + $0x58] sm:$0x3] }
 0x401   : > { %7220 = vmatpush3.bf16.msra.mxu1 %v8123_v51  ;;  %v4019_v51 = vrot.slane %v9383_v16, 2 }
 0x402   : > { %7221 = vmatprep.subr.bf16.mxu1 %v8124_v25 }
 0x403   : > { %v4020_v61 = vsel %vm1211_vm2, %v4017_v9, %v4019_v51 }
 0x404   : > { %7202 = vmatmul.mubr.bf16.gmra.mrb[96].mxu1 %v3771_v36  ;;  %v8133_v36 = vld [vmem:[%s10025_s2 + $0x118] sm:$0xff]  }
 0x405   : > { %7205 = vmatprep.mubr.bf16.mxu1 %v3773_v62  ;;  %7222 = vmatpush3.bf16.msra.mxu1 %v8124_v25  ;;  %v8131_v25 = vld [vmem:[%s10025_s2 + $0x108] sm:$0xff]  }
 0x406   : > { %7223 = vmatprep.subr.bf16.mxu1 %v8125_v29 }
 0x409   : > { %7224 = vmatpush3.bf16.msra.mxu1 %v8125_v29  ;;  %v4021_v29 = vrot.slane %v9396_v32, 2 }
 0x40a   : > { %7225 = vmatprep.subr.bf16.mxu1 %v8126_v31 }
 0x40b   : > { %v4022_v62 = vsel %vm1211_vm2, %v4019_v51, %v4021_v29  ;;  %v4033_v51 = vrot.slane %v3985_v53, 2 }
 0x40c   : > { %7206 = vmatmul.mubr.bf16.gmra.mrb[100].mxu1 %v3775_v8  ;;  %v8135_v8 = vld [vmem:[%s10025_s2 + $0x128] sm:$0xff]  }
 0x40d   : > { %7209 = vmatprep.mubr.bf16.mxu1 %v3777_v58  ;;  %7226 = vmatpush3.bf16.msra.mxu1 %v8126_v31  ;;  %v4024_v31 = vsel %vm1211_vm2, %v4021_v29, %v4023_v19  ;;  %v4026_v58 = vsel %vm1211_vm2, %v4023_v19, %v4025_v55  ;;  %v9807_v29 = vld [vmem:[#allocation3 + $0x58] sm:$0x7] }
 0x40e   : > { %7227 = vmatprep.subr.bf16.mxu1 %v8127_v43  ;;  %v4337_v19 = vshll.u32 %v9807_v29, 16 }
 0x411   : > { %7228 = vmatpush3.bf16.msra.mxu1 %v8127_v43  ;;  %v4027_v43 = vrot.slane %v9456_v18, 2 }
 0x412   : > { %7229 = vmatprep.subr.bf16.mxu1 %v8128_v23 }
 0x413   : > { %v4030_v28 = vsel %vm1211_vm2, %v4027_v43, %v4029_v26 }
 0x414   : > { %7210 = vmatmul.mubr.bf16.gmra.mrb[104].mxu1 %v3779_v30  ;;  %v4245_v30 = vshrl.u32 %v3975_v17, 16 }
 0x415   : > { %7213 = vmatprep.mubr.bf16.mxu1 %v3781_v41  ;;  %7230 = vmatpush3.bf16.msra.mxu1 %v8128_v23  ;;  %v4028_v23 = vsel %vm1211_vm2, %v4025_v55, %v4027_v43  ;;  %v4248_v41 = vshll.u32 %v3975_v17, 16  ;;  %v8138_v17 = vld [vmem:[%s10025_s2 + $0x140] sm:$0xff]   ;;  %v4554_v43 = vrot.slane %v9575_v52, 3 }
 0x416   : > { %7231 = vmatprep.subr.bf16.mxu1 %v8129_v40 }
 0x419   : > { %7232 = vmatpush3.bf16.msra.mxu1 %v8129_v40  ;;  %v4031_v40 = vrot.slane %v9494_v50, 2 }
 0x41a   : > { %7253 = vmatprep.subr.bf16.mxu1 %v8130_v33 }
 0x41b   : > { %v4032_v4 = vsel %vm1211_vm2, %v4029_v26, %v4031_v40 }
 0x41c   : > { %7214 = vmatmul.mubr.bf16.gmra.mrb[108].mxu1 %v3783_v21  ;;  %v4247_v21 = vrot.slane %v4245_v30, 2  ;;  %v8149_v30 = vld [vmem:[%s10025_s2 + $0x198] sm:$0xff]  }
 0x41d   : > { %7233 = vmatprep.mubr.bf16.mxu1 %v4016_v1  ;;  %v4250_v1 = vrot.slane %v4248_v41, 3 }
 0x41f   : > { %v4251_v9 = vor.u32 %v4250_v1, %v4247_v21  ;;  %v4570_v1 = vrot.slane %v9494_v50, 3  ;;  %v4572_v50 = vrot.slane %v9807_v29, 3 }
 0x424   : > { %7234 = vmatmul.mubr.bf16.vlgmr.msra.gmra.mrb[92].mxu1 %v4018_v54  ;;  %v4260_v54 = vsel %vm1481_vm4, %v4251_v9, %v9598_v24  ;;  %v8141_v24 = vld [vmem:[%s10025_s2 + $0x158] sm:$0xff]  }
 0x425   : > { %7237 = vmatprep.mubr.bf16.mxu1 %v4020_v61  ;;  %7254 = vmatpush3.bf16.msra.mxu1 %v8130_v33  ;;  %v8137_v33 = vld [vmem:[%s10025_s2 + $0x138] sm:$0xff]   ;;  %v8139_v61 = vld [vmem:[%s10025_s2 + $0x148] sm:$0xff]  }
 0x426   : > { %7255 = vmatprep.subr.bf16.mxu1 %v8131_v25 }
 0x429   : > { %7256 = vmatpush3.bf16.msra.mxu1 %v8131_v25  ;;  %v4034_v25 = vsel %vm1211_vm2, %v4031_v40, %v4033_v51  ;;  %v4562_v40 = vrot.slane %v9413_v45, 3  ;;  %v4564_v45 = vrot.slane %v9435_v6, 3  ;;  %v8152_v6 = vld [vmem:[%s10025_s2 + $0x1b0] sm:$0xff]  }
 0x42a   : > { %7257 = vmatprep.subr.bf16.mxu1 %v8132_v56 }
 0x42b   : > { %v4565_v53 = vsel %vm1851_vm5, %v4562_v40, %v4564_v45 }
 0x42c   : > { %7238 = vmatmul.mubr.bf16.gmra.mrb[96].mxu1 %v4022_v62  ;;  %v4339_v62 = vrot.slane %v4337_v19, 3  ;;  %v8156_v19 = vld [vmem:[%s10025_s2 + $0x1d0] sm:$0xff]  }
 0x42d   : > { %7241 = vmatprep.mubr.bf16.mxu1 %v4024_v31  ;;  %7258 = vmatpush3.bf16.msra.mxu1 %v8132_v56  ;;  %v8140_v56 = vld [vmem:[%s10025_s2 + $0x150] sm:$0xff]   ;;  %v8146_v31 = vld [vmem:[%s10025_s2 + $0x180] sm:$0xff]  }
 0x42e   : > { %7259 = vmatprep.subr.bf16.mxu1 %v8133_v36 }
 0x431   : > { %7260 = vmatpush3.bf16.msra.mxu1 %v8133_v36 }
 0x432   : > { %7261 = vmatprep.subr.bf16.mxu1 %v8134_v42 }
 0x434   : > { %7242 = vmatmul.mubr.bf16.gmra.mrb[100].mxu1 %v4026_v58  ;;  %v8179_v58 = vld [vmem:[#allocation3 + $0x18] sm:$0xff] }
 0x435   : > { %7245 = vmatprep.mubr.bf16.mxu1 %v4028_v23  ;;  %7262 = vmatpush3.bf16.msra.mxu1 %v8134_v42  ;;  %v4556_v23 = vrot.slane %v8179_v58, 3  ;;  %v4821_v58 = vrot.slane %v9547_v14, 4 }
 0x436   : > { %7263 = vmatprep.subr.bf16.mxu1 %v8135_v8 }
 0x437   : > { %v4557_v26 = vsel %vm1851_vm5, %v4554_v43, %v4556_v23 }
 0x439   : > { %7264 = vmatpush3.bf16.msra.mxu1 %v8135_v8 }
 0x43a   : > { %7265 = vmatprep.subr.bf16.mxu1 %v8136_v7 }
 0x43c   : > { %7246 = vmatmul.mubr.bf16.gmra.mrb[104].mxu1 %v4030_v28  ;;  %v4566_v28 = vrot.slane %v9456_v18, 3  ;;  %v4568_v18 = vrot.slane %v9475_v59, 3  ;;  %v8154_v59 = vld [vmem:[%s10025_s2 + $0x1c0] sm:$0xff]  }
 0x43d   : > { %7249 = vmatprep.mubr.bf16.mxu1 %v4032_v4  ;;  %7266 = vmatpush3.bf16.msra.mxu1 %v8136_v7  ;;  %v8147_v7 = vld [vmem:[%s10025_s2 + $0x188] sm:$0xff]  }
 0x43e   : > { %7267 = vmatprep.subr.bf16.mxu1 %v8137_v33  ;;  %v8151_v4 = vld [vmem:[%s10025_s2 + $0x1a8] sm:$0xff]   ;;  %v4567_v21 = vsel %vm1851_vm5, %v4564_v45, %v4566_v28  ;;  %v4569_v51 = vsel %vm1851_vm5, %v4566_v28, %v4568_v18  ;;  %v4571_v9 = vsel %vm1851_vm5, %v4568_v18, %v4570_v1 }
 0x441   : > { %7268 = vmatpush3.bf16.msra.mxu1 %v8137_v33 }
 0x442   : > { %7289 = vmatprep.subr.bf16.mxu1 %v8138_v17 }
 0x444   : > { %7250 = vmatmul.mubr.bf16.gmra.mrb[108].mxu1 %v4034_v25  ;;  %v4765_v25 = vld [vmem:[#allocation3 + $0x10] sm:$0xf0] }
 0x445   : > { %7269 = vmatprep.mubr.bf16.mxu1 %v4260_v54  ;;  %v4804_v54 = vrot.slane %v4765_v25, 4 }
 0x44c   : > { %7270 = vmatmul.mubr.bf16.vlgmr.msra.gmra.mrb[92].mxu1 %v9608_v44  ;;  %v8143_v44 = vld [vmem:[%s10025_s2 + $0x168] sm:$0xff]  }
 0x44d   : > { %7273 = vmatprep.mubr.bf16.mxu1 %v9402_v38  ;;  %7290 = vmatpush3.bf16.msra.mxu1 %v8138_v17  ;;  %v8142_v38 = vld [vmem:[%s10025_s2 + $0x160] sm:$0xff]   ;;  %v8153_v17 = vld [vmem:[%s10025_s2 + $0x1b8] sm:$0xff]  }
 0x44e   : > { %7291 = vmatprep.subr.bf16.mxu1 %v8139_v61 }
 0x451   : > { %7292 = vmatpush3.bf16.msra.mxu1 %v8139_v61  ;;  %v4805_v61 = vrot.slane %v9428_v48, 4 }
 0x452   : > { %7293 = vmatprep.subr.bf16.mxu1 %v8140_v56 }
 0x454   : > { %7274 = vmatmul.mubr.bf16.gmra.mrb[96].mxu1 %v9418_v49  ;;  %v8144_v49 = vld [vmem:[%s10025_s2 + $0x170] sm:$0xff]  }
 0x455   : > { %7277 = vmatprep.mubr.bf16.mxu1 %v9440_v39  ;;  %7294 = vmatpush3.bf16.msra.mxu1 %v8140_v56  ;;  %v4334_v39 = vshrl.u32 %v9807_v29, 16  ;;  %v4573_v56 = vsel %vm1851_vm5, %v4570_v1, %v4572_v50 }
 0x456   : > { %7295 = vmatprep.subr.bf16.mxu1 %v8141_v24 }
 0x457   : > { %v4336_v36 = vrot.slane %v4334_v39, 2 }
 0x459   : > { %7296 = vmatpush3.bf16.msra.mxu1 %v8141_v24  ;;  %v4340_v42 = vor.u32 %v4339_v62, %v4336_v36  ;;  %v4806_v24 = vsel %vm2148_vm6, %v4804_v54, %v4805_v61 }
 0x45a   : > { %7297 = vmatprep.subr.bf16.mxu1 %v8142_v38 }
 0x45b   : > { %v4341_v8 = vsel %vm1481_vm4, %v9508_v0, %v4340_v42  ;;  %v8148_v0 = vld [vmem:[%s10025_s2 + $0x190] sm:$0xff]   ;;  %v4817_v42 = vrot.slane %v9525_v57, 4 }
 0x45c   : > { %7278 = vmatmul.mubr.bf16.gmra.mrb[100].mxu1 %v9461_v60  ;;  %v8145_v60 = vld [vmem:[%s10025_s2 + $0x178] sm:$0xff]  }
 0x45d   : > { %7281 = vmatprep.mubr.bf16.mxu1 %v9480_v12  ;;  %7298 = vmatpush3.bf16.msra.mxu1 %v8142_v38  ;;  %v4533_v12 = vld [vmem:[#allocation3 + $0x8] sm:$0xf8]  ;;  %v4807_v38 = vrot.slane %v9424_v63, 4  ;;  %v4811_v63 = vrot.slane %v9505_v20, 4 }
 0x45e   : > { %7299 = vmatprep.subr.bf16.mxu1 %v8143_v44  ;;  %v4553_v55 = vrot.slane %v4533_v12, 3  ;;  %v8158_v12 = vld [vmem:[%s10025_s2 + $0x1e0] sm:$0xff]  }
 0x45f   : > { %v4808_v29 = vsel %vm2148_vm6, %v4805_v61, %v4807_v38 }
 0x461   : > { %7300 = vmatpush3.bf16.msra.mxu1 %v8143_v44  ;;  %v4809_v44 = vrot.slane %v9467_v2, 4  ;;  %v4813_v2 = vrot.slane %v9521_v11, 4 }
 0x462   : > { %7301 = vmatprep.subr.bf16.mxu1 %v8144_v49 }
 0x463   : > { %v4810_v39 = vsel %vm2148_vm6, %v4807_v38, %v4809_v44  ;;  %v4812_v36 = vsel %vm2148_vm6, %v4809_v44, %v4811_v63  ;;  %v4814_v62 = vsel %vm2148_vm6, %v4811_v63, %v4813_v2  ;;  %v5070_v44 = vshrl.u32 %v9505_v20, 16  ;;  %v8163_v63 = vld [vmem:[%s10025_s2 + $0x208] sm:$0xff]  }
 0x464   : > { %7282 = vmatmul.mubr.bf16.gmra.mrb[104].mxu1 %v9499_v47  ;;  %v4555_v47 = vsel %vm1851_vm5, %v4553_v55, %v4554_v43  ;;  %v8159_v55 = vld [vmem:[%s10025_s2 + $0x1e8] sm:$0xff]  }
 0x465   : > { %7285 = vmatprep.mubr.bf16.mxu1 %v9515_v15  ;;  %7302 = vmatpush3.bf16.msra.mxu1 %v8144_v49  ;;  %v4558_v15 = vrot.slane %v9383_v16, 3  ;;  %v4560_v16 = vrot.slane %v9396_v32, 3  ;;  %v8150_v32 = vld [vmem:[%s10025_s2 + $0x1a0] sm:$0xff]   ;;  %v8155_v49 = vld [vmem:[%s10025_s2 + $0x1c8] sm:$0xff]  }
 0x466   : > { %7303 = vmatprep.subr.bf16.mxu1 %v8145_v60 }
 0x467   : > { %v4559_v52 = vsel %vm1851_vm5, %v4556_v23, %v4558_v15  ;;  %v4561_v41 = vsel %vm1851_vm5, %v4558_v15, %v4560_v16  ;;  %v4563_v33 = vsel %vm1851_vm5, %v4560_v16, %v4562_v40  ;;  %v4819_v15 = vrot.slane %v9527_v22, 4  ;;  %v8161_v16 = vld [vmem:[%s10025_s2 + $0x1f8] sm:$0xff]  }
 0x468   : > { %v5035_v23 = vshrl.u32 %v4765_v25, 16 }
 0x469   : > { %7304 = vmatpush3.bf16.msra.mxu1 %v8145_v60  ;;  %v8157_v60 = vld [vmem:[%s10025_s2 + $0x1d8] sm:$0xff]   ;;  %v4820_v40 = vsel %vm2148_vm6, %v4817_v42, %v4819_v15 }
 0x46a   : > { %7325 = vmatprep.subr.bf16.mxu1 %v8146_v31 }
 0x46c   : > { %7286 = vmatmul.mubr.bf16.gmra.mrb[108].mxu1 %v4341_v8 }
 0x46d   : > { %7305 = vmatprep.mubr.bf16.mxu1 %v4555_v47  ;;  %v8160_v47 = vld [vmem:[%s10025_s2 + $0x1f0] sm:$0xff]  }
 0x474   : > { %7306 = vmatmul.mubr.bf16.vlgmr.msra.gmra.mrb[92].mxu1 %v4557_v26  ;;  %v8180_v26 = vld [vmem:[#allocation3 + $0x18] sm:$0xff] }
 0x475   : > { %7309 = vmatprep.mubr.bf16.mxu1 %v4559_v52  ;;  %7326 = vmatpush3.bf16.msra.mxu1 %v8146_v31  ;;  %v4815_v31 = vrot.slane %v9523_v10, 4  ;;  %v5043_v52 = vshrl.u32 %v8180_v26, 16 }
 0x476   : > { %7327 = vmatprep.subr.bf16.mxu1 %v8147_v7 }
 0x477   : > { %v4816_v43 = vsel %vm2148_vm6, %v4813_v2, %v4815_v31  ;;  %v4818_v8 = vsel %vm2148_vm6, %v4815_v31, %v4817_v42  ;;  %v5045_v45 = vrot.slane %v5043_v52, 4  ;;  %v5088_v42 = vshrl.u32 %v9523_v10, 16 }
 0x479   : > { %7328 = vmatpush3.bf16.msra.mxu1 %v8147_v7  ;;  %v5038_v7 = vshll.u32 %v4765_v25, 16 }
 0x47a   : > { %7329 = vmatprep.subr.bf16.mxu1 %v8148_v0 }
 0x47c   : > { %7310 = vmatmul.mubr.bf16.gmra.mrb[96].mxu1 %v4561_v41  ;;  %v4775_v41 = vld [vmem:[#allocation3 + $0x60] sm:$0xf] }
 0x47d   : > { %7313 = vmatprep.mubr.bf16.mxu1 %v4563_v33  ;;  %7330 = vmatpush3.bf16.msra.mxu1 %v8148_v0  ;;  %v5046_v0 = vshll.u32 %v8180_v26, 16  ;;  %v5037_v33 = vrot.slane %v5035_v23, 4  ;;  %v5090_v23 = vrot.slane %v5088_v42, 4  ;;  %v5560_v42 = vld [vmem:[%s8296_s16 + $0x28] sm:$0xff] }
 0x47e   : > { %7331 = vmatprep.subr.bf16.mxu1 %v8149_v30 }
 0x47f   : > { %v5048_v28 = vrot.slane %v5046_v0, 5 }
 0x481   : > { %7332 = vmatpush3.bf16.msra.mxu1 %v8149_v30  ;;  %v4822_v30 = vsel %vm2148_vm6, %v4819_v15, %v4821_v58  ;;  %v5049_v25 = vor.u32 %v5048_v28, %v5045_v45  ;;  %v8165_v15 = vld [vmem:[%s10025_s2 + $0x218] sm:$0xff]  }
 0x482   : > { %7333 = vmatprep.subr.bf16.mxu1 %v8150_v32 }
 0x484   : > { %7314 = vmatmul.mubr.bf16.gmra.mrb[100].mxu1 %v4565_v53  ;;  %v4823_v53 = vrot.slane %v4775_v41, 4  ;;  %v5115_v41 = vshrl.u32 %v9547_v14, 16 }
 0x485   : > { %7317 = vmatprep.mubr.bf16.mxu1 %v4567_v21  ;;  %7334 = vmatpush3.bf16.msra.mxu1 %v8150_v32  ;;  %v5040_v32 = vrot.slane %v5038_v7, 5  ;;  %v8181_v21 = vld [vmem:[#allocation3 + $0x20] sm:$0xff] }
 0x486   : > { %7335 = vmatprep.subr.bf16.mxu1 %v8151_v4  ;;  %v5055_v18 = vshll.u32 %v8181_v21, 16 }
 0x487   : > { %v5041_v1 = vor.u32 %v5040_v32, %v5037_v33  ;;  %v5118_v33 = vshll.u32 %v9547_v14, 16  ;;  %v8167_v32 = vld [vmem:[%s10025_s2 + $0x228] sm:$0xff]  }
 0x488   : > { %v5057_v54 = vrot.slane %v5055_v18, 5  ;;  %v8168_v18 = vld [vmem:[%s10025_s2 + $0x230] sm:$0xff]  }
 0x489   : > { %7336 = vmatpush3.bf16.msra.mxu1 %v8151_v4  ;;  %v8162_v4 = vld [vmem:[%s10025_s2 + $0x200] sm:$0xff]   ;;  %v5050_v61 = vsel %vm2418_vm8, %v5041_v1, %v5049_v25 }
 0x48a   : > { %7337 = vmatprep.subr.bf16.mxu1 %v8152_v6 }
 0x48c   : > { %7318 = vmatmul.mubr.bf16.gmra.mrb[104].mxu1 %v4569_v51 }
 0x48d   : > { %7321 = vmatprep.mubr.bf16.mxu1 %v4571_v9  ;;  %7338 = vmatpush3.bf16.msra.mxu1 %v8152_v6  ;;  %v5052_v6 = vshrl.u32 %v8181_v21, 16  ;;  %v5117_v21 = vrot.slane %v5115_v41, 4 }
 0x48e   : > { %7339 = vmatprep.subr.bf16.mxu1 %v8153_v17 }
 0x48f   : > { %v5054_v50 = vrot.slane %v5052_v6, 4  ;;  %v5016_v6 = vld [vmem:[#allocation3 + $0x60] sm:$0x1f] }
 0x491   : > { %7340 = vmatpush3.bf16.msra.mxu1 %v8153_v17  ;;  %v8182_v17 = vld [vmem:[#allocation3 + $0x28] sm:$0xff]  ;;  %v5058_v38 = vor.u32 %v5057_v54, %v5054_v50 }
 0x492   : > { %7361 = vmatprep.subr.bf16.mxu1 %v8154_v59  ;;  %v5061_v51 = vshrl.u32 %v8182_v17, 16  ;;  %v5064_v9 = vshll.u32 %v8182_v17, 16  ;;  %v5124_v17 = vshrl.u32 %v5016_v6, 16 }
 0x493   : > { %v5059_v2 = vsel %vm2418_vm8, %v5049_v25, %v5058_v38  ;;  %v8169_v25 = vld [vmem:[%s10025_s2 + $0x238] sm:$0xff]  }
 0x494   : > { %7322 = vmatmul.mubr.bf16.gmra.mrb[108].mxu1 %v4573_v56  ;;  %v5063_v56 = vrot.slane %v5061_v51, 4  ;;  %v5127_v51 = vshll.u32 %v5016_v6, 16  ;;  %v5126_v50 = vrot.slane %v5124_v17, 4 }
 0x495   : > { %7341 = vmatprep.mubr.bf16.mxu1 %v4806_v24  ;;  %v5066_v24 = vrot.slane %v5064_v9, 5 }
 0x496   : > { %v5129_v54 = vrot.slane %v5127_v51, 5  ;;  %v5573_v51 = vld [vmem:[%s8296_s16 + $0x90] sm:$0xff] }
 0x49c   : > { %7342 = vmatmul.mubr.bf16.vlgmr.msra.gmra.mrb[92].mxu1 %v4808_v29  ;;  %v5067_v29 = vor.u32 %v5066_v24, %v5063_v56  ;;  %v5323_v56 = vld [vmem:[#allocation3 + $0x10] sm:$0xe0]  ;;  %v5130_v24 = vor.u32 %v5129_v54, %v5126_v50 }
 0x49d   : > { %7345 = vmatprep.mubr.bf16.mxu1 %v4810_v39  ;;  %7362 = vmatpush3.bf16.msra.mxu1 %v8154_v59  ;;  %v4824_v59 = vsel %vm2148_vm6, %v4821_v58, %v4823_v53  ;;  %v5079_v39 = vshrl.u32 %v9521_v11, 16 }
 0x49e   : > { %7363 = vmatprep.subr.bf16.mxu1 %v8155_v49 }
 0x4a1   : > { %7364 = vmatpush3.bf16.msra.mxu1 %v8155_v49  ;;  %v5073_v49 = vshll.u32 %v9505_v20, 16  ;;  %v8164_v20 = vld [vmem:[%s10025_s2 + $0x210] sm:$0xff]  }
 0x4a2   : > { %7365 = vmatprep.subr.bf16.mxu1 %v8156_v19 }
 0x4a4   : > { %7346 = vmatmul.mubr.bf16.gmra.mrb[96].mxu1 %v4812_v36  ;;  %v5075_v36 = vrot.slane %v5073_v49, 5  ;;  %v10054_v49 = vrot.slane %v9428_v48, 5  ;;  %v5362_v48 = vrot.slane %v5016_v6, 5 }
 0x4a5   : > { %7349 = vmatprep.mubr.bf16.mxu1 %v4814_v62  ;;  %7366 = vmatpush3.bf16.msra.mxu1 %v8156_v19  ;;  %v5082_v19 = vshll.u32 %v9521_v11, 16  ;;  %v5068_v62 = vsel %vm2418_vm8, %v5058_v38, %v5067_v29  ;;  %v5343_v38 = vrot.slane %v5323_v56, 5 }
 0x4a6   : > { %7367 = vmatprep.subr.bf16.mxu1 %v8157_v60 }
 0x4a7   : > { %v5084_v31 = vrot.slane %v5082_v19, 5  ;;  %v5556_v19 = vld [vmem:[%s8296_s16 + $0x8] sm:$0xff] }
 0x4a9   : > { %7368 = vmatpush3.bf16.msra.mxu1 %v8157_v60  ;;  %v5072_v60 = vrot.slane %v5070_v44, 4 }
 0x4aa   : > { %7369 = vmatprep.subr.bf16.mxu1 %v8158_v12 }
 0x4ab   : > { %v5076_v11 = vor.u32 %v5075_v36, %v5072_v60  ;;  %v5561_v36 = vld [vmem:[%s8296_s16 + $0x30] sm:$0xff] }
 0x4ac   : > { %7350 = vmatmul.mubr.bf16.gmra.mrb[100].mxu1 %v4816_v43 }
 0x4ad   : > { %7353 = vmatprep.mubr.bf16.mxu1 %v4818_v8  ;;  %7370 = vmatpush3.bf16.msra.mxu1 %v8158_v12  ;;  %v5081_v12 = vrot.slane %v5079_v39, 4  ;;  %v5097_v8 = vshrl.u32 %v9525_v57, 16  ;;  %v5077_v58 = vsel %vm2418_vm8, %v5067_v29, %v5076_v11  ;;  %v5345_v29 = vsel %vm2788_vm7, %v5343_v38, %v10054_v49  ;;  %v5558_v39 = vld [vmem:[%s8296_s16 + $0x18] sm:$0xff] }
 0x4ae   : > { %7371 = vmatprep.subr.bf16.mxu1 %v8159_v55 }
 0x4af   : > { %v5085_v43 = vor.u32 %v5084_v31, %v5081_v12  ;;  %v5099_v52 = vrot.slane %v5097_v8, 4  ;;  %v5562_v31 = vld [vmem:[%s8296_s16 + $0x38] sm:$0xff] }
 0x4b1   : > { %7372 = vmatpush3.bf16.msra.mxu1 %v8159_v55  ;;  %v5091_v55 = vshll.u32 %v9523_v10, 16  ;;  %v5086_v26 = vsel %vm2418_vm8, %v5076_v11, %v5085_v43 }
 0x4b2   : > { %7373 = vmatprep.subr.bf16.mxu1 %v8160_v47 }
 0x4b3   : > { %v5093_v7 = vrot.slane %v5091_v55, 5 }
 0x4b4   : > { %7354 = vmatmul.mubr.bf16.gmra.mrb[104].mxu1 %v4820_v40  ;;  %v5109_v40 = vshll.u32 %v9527_v22, 16 }
 0x4b5   : > { %7357 = vmatprep.mubr.bf16.mxu1 %v4822_v30  ;;  %7374 = vmatpush3.bf16.msra.mxu1 %v8160_v47  ;;  %v5100_v47 = vshll.u32 %v9525_v57, 16  ;;  %v8166_v57 = vld [vmem:[%s10025_s2 + $0x220] sm:$0xff]   ;;  %v5094_v0 = vor.u32 %v5093_v7, %v5090_v23 }
 0x4b6   : > { %7375 = vmatprep.subr.bf16.mxu1 %v8161_v16  ;;  %v5563_v23 = vld [vmem:[%s8296_s16 + $0x40] sm:$0xff] }
 0x4b7   : > { %v5102_v10 = vrot.slane %v5100_v47, 5  ;;  %v5095_v45 = vsel %vm2418_vm8, %v5085_v43, %v5094_v0 }
 0x4b9   : > { %7376 = vmatpush3.bf16.msra.mxu1 %v8161_v16  ;;  %v5106_v16 = vshrl.u32 %v9527_v22, 16  ;;  %v5103_v30 = vor.u32 %v5102_v10, %v5099_v52  ;;  %v5120_v22 = vrot.slane %v5118_v33, 5  ;;  %v5569_v33 = vld [vmem:[%s8296_s16 + $0x70] sm:$0xff] }
 0x4ba   : > { %7397 = vmatprep.subr.bf16.mxu1 %v8162_v4 }
 0x4bb   : > { %v5108_v28 = vrot.slane %v5106_v16, 4  ;;  %v5104_v53 = vsel %vm2418_vm8, %v5094_v0, %v5103_v30  ;;  %v5121_v9 = vor.u32 %v5120_v22, %v5117_v21  ;;  %v5568_v21 = vld [vmem:[%s8296_s16 + $0x68] sm:$0xff] }
 0x4bc   : > { %7358 = vmatmul.mubr.bf16.gmra.mrb[108].mxu1 %v4824_v59 }
 0x4bd   : > { %7377 = vmatprep.mubr.bf16.mxu1 %v5050_v61  ;;  %v5131_v44 = vsel %vm2418_vm8, %v5121_v9, %v5130_v24 }
 0x4c4   : > { %7378 = vmatmul.mubr.bf16.vlgmr.msra.gmra.mrb[92].mxu1 %v5059_v2 }
 0x4c5   : > { %7381 = vmatprep.mubr.bf16.mxu1 %v5068_v62  ;;  %7398 = vmatpush3.bf16.msra.mxu1 %v8162_v4  ;;  %v5111_v4 = vrot.slane %v5109_v40, 5  ;;  %v5559_v62 = vld [vmem:[%s8296_s16 + $0x20] sm:$0xff] }
 0x4c6   : > { %7399 = vmatprep.subr.bf16.mxu1 %v8163_v63 }
 0x4c7   : > { %v5112_v1 = vor.u32 %v5111_v4, %v5108_v28  ;;  %v5570_v28 = vld [vmem:[%s8296_s16 + $0x78] sm:$0xff] }
 0x4c9   : > { %7400 = vmatpush3.bf16.msra.mxu1 %v8163_v63  ;;  %v5113_v59 = vsel %vm2418_vm8, %v5103_v30, %v5112_v1  ;;  %v5122_v61 = vsel %vm2418_vm8, %v5112_v1, %v5121_v9  ;;  %v5571_v9 = vld [vmem:[%s8296_s16 + $0x80] sm:$0xff] }
 0x4ca   : > { %7401 = vmatprep.subr.bf16.mxu1 %v8164_v20 }
 0x4cc   : > { %7382 = vmatmul.mubr.bf16.gmra.mrb[96].mxu1 %v5077_v58  ;;  %v5565_v58 = vld [vmem:[%s8296_s16 + $0x50] sm:$0xff] }
 0x4cd   : > { %7385 = vmatprep.mubr.bf16.mxu1 %v5086_v26  ;;  %7402 = vmatpush3.bf16.msra.mxu1 %v8164_v20  ;;  %v5566_v26 = vld [vmem:[%s8296_s16 + $0x58] sm:$0xff] }
 0x4ce   : > { %7403 = vmatprep.subr.bf16.mxu1 %v8165_v15 }
 0x4d1   : > { %7404 = vmatpush3.bf16.msra.mxu1 %v8165_v15 }
 0x4d2   : > { %7405 = vmatprep.subr.bf16.mxu1 %v8166_v57 }
 0x4d4   : > { %7386 = vmatmul.mubr.bf16.gmra.mrb[100].mxu1 %v5095_v45 }
 0x4d5   : > { %7389 = vmatprep.mubr.bf16.mxu1 %v5104_v53  ;;  %7406 = vmatpush3.bf16.msra.mxu1 %v8166_v57  ;;  %v5564_v57 = vld [vmem:[%s8296_s16 + $0x48] sm:$0xff] }
 0x4d6   : > { %7407 = vmatprep.subr.bf16.mxu1 %v8167_v32 }
 0x4d9   : > { %7408 = vmatpush3.bf16.msra.mxu1 %v8167_v32  ;;  %v5567_v32 = vld [vmem:[%s8296_s16 + $0x60] sm:$0xff] }
 0x4da   : > { %7409 = vmatprep.subr.bf16.mxu1 %v8168_v18 }
 0x4dc   : > { %7390 = vmatmul.mubr.bf16.gmra.mrb[104].mxu1 %v5113_v59  ;;  %v5574_v59 = vld [vmem:[%s8296_s16 + $0x98] sm:$0xff] }
 0x4dd   : > { %7393 = vmatprep.mubr.bf16.mxu1 %v5122_v61  ;;  %7410 = vmatpush3.bf16.msra.mxu1 %v8168_v18  ;;  %v5572_v61 = vld [vmem:[%s8296_s16 + $0x88] sm:$0xff] }
 0x4de   : > { %7411 = vmatprep.subr.bf16.mxu1 %v8169_v25 }
 0x4e1   : > { %7412 = vmatpush3.bf16.msra.mxu1 %v8169_v25 }
 0x4e4   : > { %7394 = vmatmul.mubr.bf16.gmra.mrb[108].mxu1 %v5131_v44 }
 0x4e5   : > { %7413 = vmatprep.mubr.bf16.mxu1 %v5345_v29 }
 0x4ec   : > { %7414 = vmatmul.mubr.bf16.vlgmr.msra.gmra.mrb[92].mxu1 %v9445_v27  ;;  %v10055_v27 = vrot.slane %v9547_v14, 5 }
 0x4ed   : > { %7417 = vmatprep.mubr.bf16.mxu1 %v9483_v46 }
 0x4ee   : > { %v5363_v46 = vsel %vm2788_vm7, %v10055_v27, %v5362_v48 }
 0x4f4   : > { %7418 = vmatmul.mubr.bf16.gmra.mrb[96].mxu1 %v9518_v34  ;;  %v5557_v34 = vld [vmem:[%s8296_s16 + $0x10] sm:$0xff] }
 0x4f5   : > { %7421 = vmatprep.mubr.bf16.mxu1 %v9536_v35  ;;  %v5555_v35 = vld [vmem:[%s8296_s16] sm:$0xff] }
 0x4fc   : > { %7422 = vmatmul.mubr.bf16.gmra.mrb[100].mxu1 %v9539_v37 }
 0x4fd   : > { %7425 = vmatprep.mubr.bf16.mxu1 %v9542_v5 }
 0x504   : > { %7426 = vmatmul.mubr.bf16.gmra.mrb[104].mxu1 %v9545_v13 }
 0x505   : > { %7429 = vmatprep.mubr.bf16.mxu1 %v9560_v3 }
 0x50c   : > { %7430 = vmatmul.mubr.bf16.gmra.mrb[108].mxu1 %v5363_v46 }
 0x5bf   : > { %v7415_v37 = vpop.f32.mrb[92].mxu1 }
 0x5c0   : > { %v5577_v5 = vadd.f32 %v7415_v37, %v5557_v34  ;;  %v5456_v13 = vpop.f32.mrb[93].mxu1 }
 0x5c1   : > { %v5575_v3 = vadd.f32 %v5555_v35, %v5456_v13  ;;  %v7416_v63 = vpop.f32.mrb[94].mxu1 }
 0x5c2   : > { %5597 = vst [vmem:[%s8301_s18 + $0x10] sm:$0xff] %v5577_v5  ;;  %v5578_v14 = vadd.f32 %v7416_v63, %v5558_v39  ;;  %v5459_v2 = vpop.f32.mrb[95].mxu1 }
 0x5c3   : > { %5595 = vst [vmem:[%s8301_s18] sm:$0xff] %v5575_v3  ;;  %v5576_v60 = vadd.f32 %v5556_v19, %v5459_v2 }
 0x5c4   : > { %5598 = vst [vmem:[%s8301_s18 + $0x18] sm:$0xff] %v5578_v14 }
 0x5c5   : > { %5596 = vst [vmem:[%s8301_s18 + $0x8] sm:$0xff] %v5576_v60 }
 0x5c7   : > { %v7419_v12 = vpop.f32.mrb[96].mxu1 }
 0x5c8   : > { %v5581_v20 = vadd.f32 %v7419_v12, %v5561_v36  ;;  %v5472_v11 = vpop.f32.mrb[97].mxu1 }
 0x5c9   : > { %v5579_v55 = vadd.f32 %v5559_v62, %v5472_v11  ;;  %v7420_v43 = vpop.f32.mrb[98].mxu1 }
 0x5ca   : > { %5601 = vst [vmem:[%s8301_s18 + $0x30] sm:$0xff] %v5581_v20  ;;  %v5582_v8 = vadd.f32 %v7420_v43, %v5562_v31  ;;  %v5475_v47 = vpop.f32.mrb[99].mxu1 }
 0x5cb   : > { %5599 = vst [vmem:[%s8301_s18 + $0x20] sm:$0xff] %v5579_v55  ;;  %v5580_v15 = vadd.f32 %v5560_v42, %v5475_v47 }
 0x5cc   : > { %5602 = vst [vmem:[%s8301_s18 + $0x38] sm:$0xff] %v5582_v8 }
 0x5cd   : > { %5600 = vst [vmem:[%s8301_s18 + $0x28] sm:$0xff] %v5580_v15 }
 0x5cf   : > { %v7423_v7 = vpop.f32.mrb[100].mxu1 }
 0x5d0   : > { %v5585_v52 = vadd.f32 %v7423_v7, %v5565_v58  ;;  %v5488_v10 = vpop.f32.mrb[101].mxu1 }
 0x5d1   : > { %v5583_v0 = vadd.f32 %v5563_v23, %v5488_v10  ;;  %v7424_v16 = vpop.f32.mrb[102].mxu1 }
 0x5d2   : > { %5605 = vst [vmem:[%s8301_s18 + $0x50] sm:$0xff] %v5585_v52  ;;  %v5586_v40 = vadd.f32 %v7424_v16, %v5566_v26  ;;  %v5491_v30 = vpop.f32.mrb[103].mxu1 }
 0x5d3   : > { %5603 = vst [vmem:[%s8301_s18 + $0x40] sm:$0xff] %v5583_v0  ;;  %v5584_v41 = vadd.f32 %v5564_v57, %v5491_v30 }
 0x5d4   : > { %5606 = vst [vmem:[%s8301_s18 + $0x58] sm:$0xff] %v5586_v40 }
 0x5d5   : > { %5604 = vst [vmem:[%s8301_s18 + $0x48] sm:$0xff] %v5584_v41 }
 0x5d7   : > { %v7427_v45 = vpop.f32.mrb[104].mxu1 }
 0x5d8   : > { %v5589_v4 = vadd.f32 %v7427_v45, %v5569_v33  ;;  %v5504_v53 = vpop.f32.mrb[105].mxu1 }
 0x5d9   : > { %v5587_v22 = vadd.f32 %v5567_v32, %v5504_v53  ;;  %v7428_v6 = vpop.f32.mrb[106].mxu1 }
 0x5da   : > { %5609 = vst [vmem:[%s8301_s18 + $0x70] sm:$0xff] %v5589_v4  ;;  %v5590_v18 = vadd.f32 %v7428_v6, %v5570_v28  ;;  %v5507_v1 = vpop.f32.mrb[107].mxu1 }
 0x5db   : > { %5607 = vst [vmem:[%s8301_s18 + $0x60] sm:$0xff] %v5587_v22  ;;  %v5588_v17 = vadd.f32 %v5568_v21, %v5507_v1 }
 0x5dc   : > { %5610 = vst [vmem:[%s8301_s18 + $0x78] sm:$0xff] %v5590_v18 }
 0x5dd   : > { %5608 = vst [vmem:[%s8301_s18 + $0x68] sm:$0xff] %v5588_v17 }
 0x5df   : > { %v7431_v25 = vpop.f32.mrb[108].mxu1 }
 0x5e0   : > { %v5593_v50 = vadd.f32 %v7431_v25, %v5573_v51  ;;  %v5520_v54 = vpop.f32.mrb[109].mxu1 }
 0x5e1   : > { %v5591_v56 = vadd.f32 %v5571_v9, %v5520_v54  ;;  %v7432_v24 = vpop.f32.mrb[110].mxu1 }
 0x5e2   : > { %5613 = vst [vmem:[%s8301_s18 + $0x90] sm:$0xff] %v5593_v50  ;;  %v5594_v38 = vadd.f32 %v7432_v24, %v5574_v59  ;;  %v5523_v44 = vpop.f32.mrb[111].mxu1 }
 0x5e3   : > { %5611 = vst [vmem:[%s8301_s18 + $0x80] sm:$0xff] %v5591_v56  ;;  %v5592_v49 = vadd.f32 %v5572_v61, %v5523_v44 }
 0x5e4   : > { %5614 = vst [vmem:[%s8301_s18 + $0x98] sm:$0xff] %v5594_v38 }
 0x5e5   : > { %5612 = vst [vmem:[%s8301_s18 + $0x88] sm:$0xff] %v5592_v49 }
 0x5e6 PF: > { %s15_s22 = sadd.s32 1, %s8223_s22   ;;  %s10056_s18 = smov %s8215_s20 }
 0x5e7   : > { %p12_p8 = scmp.ge.s32.totalorder %s15_s22, 6   ;;  %s10057_s19 = smov %s8219_s21 }
 0x5e8   : > { %s10058_s20 = smov %s10061_s23  ;;  %s10059_s21 = smov %s10065_s24 }
 0x5e9   :  { %14 = sbr.rel (!%p12_p8) target bundleno = 3 (0x3), region = 128 }
 0x5f0   :  { %5645 = vsyncmov [#allocation4] }
 0x5f3   :  { %s5646_s16 = vpop.sfrf %5645 }
 0x5f4   :  { %p6145_p9 = scmp.ne.s32.totalorder %s5646_s16, 0 }
 0x5f6   :  { %5650 = shalt.err (%p6145_p9)  }

</bundles_post_ra>
